<compile_context>
chip_gen: v7x
topology: tpu7x:2x2x1
jax: 0.10.0
libtpu: 0.0.40
codegen_flags: <defaults>
</compile_context>

<pallas_src>
import functools

import jax
import jax.numpy as jnp
from jax.experimental import pallas as pl
from jax.experimental.pallas import tpu as pltpu

K_IN = 784
N_OUT_PAD = 128  # lane-dense output width for the final Linear(256, 1)


def _round_up(n, m):
    return ((n + m - 1) // m) * m


def _leaky_relu(x, slope=0.2):
    return jnp.where(x > 0, x, slope * x)


def _pick_tile(batch, tb):
    """Batch-tile rows per grid step."""
    if batch < 256:
        # Small batch: one grid step; keep the tile a multiple of 8 sublanes.
        return _round_up(batch, 8)
    # Large batch: >= 2 grid steps so the "parallel" batch axis can shard
    # across v7x's two TensorCores; tile rows are a multiple of 128, capped
    # at tb (default 1024) to amortize per-step pipeline overhead.
    half = _round_up((batch + 1) // 2, 128)
    return int(min(tb, max(128, half)))


def _vmem_limit_bytes():
    """min(64 MiB, 3/4 of physical VMEM): ~48 MiB on v7x, 64 MiB on v5e/v6e."""
    cap = 128 << 20
    try:
        cap = int(pltpu.get_tpu_info().vmem_capacity_bytes)
    except Exception:
        pass
    return int(min(64 << 20, (cap * 3) // 4))


def discriminator_kernel(x_ref,
                         w1_ref, b1_ref,
                         w2_ref, b2_ref,
                         w3_ref, b3_ref,
                         w4_ref, b4_ref,
                         o_ref):
    # x_ref: (tb, 784) f32 batch tile.  w1..w4: bf16 (in, out).  Biases: f32.
    # All matmuls: bf16 operands on the MXU, f32 accumulation.
    x = x_ref[...].astype(jnp.bfloat16)

    h = jnp.dot(x, w1_ref[...], preferred_element_type=jnp.float32) + b1_ref[...]
    h = _leaky_relu(h)                     # Dropout(0.3) -> identity (eval mode)

    h = jnp.dot(h.astype(jnp.bfloat16), w2_ref[...],
                preferred_element_type=jnp.float32) + b2_ref[...]
    h = _leaky_relu(h)

    h = jnp.dot(h.astype(jnp.bfloat16), w3_ref[...],
                preferred_element_type=jnp.float32) + b3_ref[...]
    h = _leaky_relu(h)

    # Final Linear(256, 1), zero-padded to 128 output lanes so the sigmoid
    # result and its HBM store stay lane-dense (column 0 is the real logit).
    logit = jnp.dot(h.astype(jnp.bfloat16), w4_ref[...],
                    preferred_element_type=jnp.float32) + b4_ref[...]
    o_ref[...] = jax.nn.sigmoid(logit).astype(o_ref.dtype)


@functools.partial(jax.jit, static_argnames=("tb",))
def discriminator_forward(x, params, tb=1024):
    """x: (B, 784) float32. params: output of prepare_params(). Returns (B, 1)."""
    B, D = x.shape
    assert D == K_IN

    tb_eff = _pick_tile(B, tb)
    Bp = _round_up(B, tb_eff)
    x_in = x if Bp == B else jnp.pad(x, ((0, Bp - B), (0, 0)))

    w1, b1 = params["w1"], params["b1"]
    w2, b2 = params["w2"], params["b2"]
    w3, b3 = params["w3"], params["b3"]
    w4, b4 = params["w4"], params["b4"]

    # Weights/biases: one block covering the whole array with a constant block
    # index, so they stay resident in VMEM across all batch tiles.
    full = lambda a: pl.BlockSpec(a.shape, lambda i: (0, 0))

    out = pl.pallas_call(
        discriminator_kernel,
        out_shape=jax.ShapeDtypeStruct((Bp, N_OUT_PAD), jnp.float32),
        grid_spec=pltpu.PrefetchScalarGridSpec(
            num_scalar_prefetch=0,
            grid=(Bp // tb_eff,),
            in_specs=[
                pl.BlockSpec((tb_eff, K_IN), lambda i: (i, 0)),  # x batch tile
                full(w1), full(b1),
                full(w2), full(b2),
                full(w3), full(b3),
                full(w4), full(b4),
            ],
            out_specs=pl.BlockSpec((tb_eff, N_OUT_PAD), lambda i: (i, 0)),
        ),
        compiler_params=pltpu.CompilerParams(
            dimension_semantics=("parallel",),
            vmem_limit_bytes=_vmem_limit_bytes(),
        ),
    )(x_in, w1, b1, w2, b2, w3, b3, w4, b4)

    # Column 0 holds the real logit; padded batch rows are sliced off.
    return out[:B, 0:1]


def init_params(key):
    """PyTorch nn.Linear default init: U(-1/sqrt(fan_in), 1/sqrt(fan_in)); f32, (in, out)."""
    dims = [(784, 1024), (1024, 512), (512, 256), (256, 1)]
    params = {}
    for idx, (fan_in, fan_out) in enumerate(dims, start=1):
        key, kw, kb = jax.random.split(key, 3)
        bound = 1.0 / jnp.sqrt(fan_in)
        params[f"w{idx}"] = jax.random.uniform(
            kw, (fan_in, fan_out), jnp.float32, -bound, bound)
        params[f"b{idx}"] = jax.random.uniform(
            kb, (1, fan_out), jnp.float32, -bound, bound)
    return params


def prepare_params(params_f32):
    """Kernel-ready params: bf16 weights, final layer zero-padded to 128 lanes."""
    p = {}
    for i in (1, 2, 3):
        p[f"w{i}"] = params_f32[f"w{i}"].astype(jnp.bfloat16)
        p[f"b{i}"] = params_f32[f"b{i}"]
    p["w4"] = jnp.pad(params_f32["w4"],
                      ((0, 0), (0, N_OUT_PAD - 1))).astype(jnp.bfloat16)
    p["b4"] = jnp.pad(params_f32["b4"], ((0, 0), (0, N_OUT_PAD - 1)))
    return p


def reference_forward(x, params_f32):
    """Pure-JAX f32 reference (eval-mode dropout = identity)."""
    h = x
    for i in range(1, 4):
        h = h @ params_f32[f"w{i}"] + params_f32[f"b{i}"]
        h = jnp.where(h > 0, h, 0.2 * h)
    logit = h @ params_f32["w4"] + params_f32["b4"]
    return jax.nn.sigmoid(logit)


if __name__ == "__main__":
    key = jax.random.PRNGKey(0)
    params_f32 = init_params(key)
    params = prepare_params(params_f32)

    # Small batch: single grid step.
    key, kx = jax.random.split(key)
    x_small = jax.random.normal(kx, (16, K_IN), jnp.float32)
    out_small = jax.block_until_ready(discriminator_forward(x_small, params))
    ref_small = reference_forward(x_small, params_f32)
    assert out_small.shape == (16, 1)
    err_small = float(jnp.max(jnp.abs(out_small - ref_small)))

    # Larger, non-tile-aligned batch: multi-step grid + batch-padding path.
    key, kx = jax.random.split(key)
    x_big = jax.random.normal(kx, (300, K_IN), jnp.float32)
    out_big = jax.block_until_ready(discriminator_forward(x_big, params))
    ref_big = reference_forward(x_big, params_f32)
    assert out_big.shape == (300, 1)
    err_big = float(jnp.max(jnp.abs(out_big - ref_big)))

    # bf16 MXU operands vs f32 reference: intentionally loose tolerance on the
    # sigmoid output (documented precision loss, fine for a GAN discriminator).
    assert err_small < 3e-2, f"small-batch mismatch: max abs err = {err_small}"
    assert err_big < 3e-2, f"large-batch mismatch: max abs err = {err_big}"

    print("KERNEL_OK")
</pallas_src>

<mosaic_0001>
module attributes {stable_mosaic.version = 11 : i64} {
  func.func @discriminator_kernel(%arg0: i32, %arg1: memref<16x784xf32, #tpu.memory_space<vmem>>, %arg2: memref<784x1024xbf16, #tpu.memory_space<vmem>>, %arg3: memref<1x1024xf32, #tpu.memory_space<vmem>>, %arg4: memref<1024x512xbf16, #tpu.memory_space<vmem>>, %arg5: memref<1x512xf32, #tpu.memory_space<vmem>>, %arg6: memref<512x256xbf16, #tpu.memory_space<vmem>>, %arg7: memref<1x256xf32, #tpu.memory_space<vmem>>, %arg8: memref<256x128xbf16, #tpu.memory_space<vmem>>, %arg9: memref<1x128xf32, #tpu.memory_space<vmem>>, %arg10: memref<16x128xf32, #tpu.memory_space<vmem>>) attributes {dimension_semantics = [#tpu.dimension_semantics<parallel>], iteration_bounds = array<i64: 1>, scalar_prefetch = 0 : i64, scratch_operands = 0 : i64, tpu.core_type = #tpu.core_type<tc>, window_params = [{transform_indices = @transform_0, window_bounds = array<i64: 16, 784>}, {pipeline_mode = #tpu.pipeline_mode<synchronous>, transform_indices = @transform_1, window_bounds = array<i64: 784, 1024>}, {pipeline_mode = #tpu.pipeline_mode<synchronous>, transform_indices = @transform_2, window_bounds = array<i64: 1, 1024>}, {pipeline_mode = #tpu.pipeline_mode<synchronous>, transform_indices = @transform_3, window_bounds = array<i64: 1024, 512>}, {pipeline_mode = #tpu.pipeline_mode<synchronous>, transform_indices = @transform_4, window_bounds = array<i64: 1, 512>}, {pipeline_mode = #tpu.pipeline_mode<synchronous>, transform_indices = @transform_5, window_bounds = array<i64: 512, 256>}, {pipeline_mode = #tpu.pipeline_mode<synchronous>, transform_indices = @transform_6, window_bounds = array<i64: 1, 256>}, {pipeline_mode = #tpu.pipeline_mode<synchronous>, transform_indices = @transform_7, window_bounds = array<i64: 256, 128>}, {pipeline_mode = #tpu.pipeline_mode<synchronous>, transform_indices = @transform_8, window_bounds = array<i64: 1, 128>}, {transform_indices = @transform_9, window_bounds = array<i64: 16, 128>}]} {
    %c0 = arith.constant 0 : index
    %c0_0 = arith.constant 0 : index
    %0 = vector.load %arg1[%c0, %c0_0] : memref<16x784xf32, #tpu.memory_space<vmem>>, vector<16x784xf32>
    %1 = arith.truncf %0 : vector<16x784xf32> to vector<16x784xbf16>
    %c0_1 = arith.constant 0 : index
    %c0_2 = arith.constant 0 : index
    %2 = vector.load %arg2[%c0_1, %c0_2] : memref<784x1024xbf16, #tpu.memory_space<vmem>>, vector<784x1024xbf16>
    %cst = arith.constant dense<0.000000e+00> : vector<16x1024xf32>
    %3 = tpu.matmul %1, %2, %cst {dimension_numbers = #tpu.dot_dimension_numbers<[1], [0], [0], [1], [0, 0, 1, 1], [], []>} : vector<16x784xbf16>, vector<784x1024xbf16>, vector<16x1024xf32> -> vector<16x1024xf32>
    %c0_3 = arith.constant 0 : index
    %c0_4 = arith.constant 0 : index
    %4 = vector.load %arg3[%c0_3, %c0_4] : memref<1x1024xf32, #tpu.memory_space<vmem>>, vector<1x1024xf32>
    %5 = vector.broadcast %4 : vector<1x1024xf32> to vector<16x1024xf32>
    %6 = arith.addf %3, %5 : vector<16x1024xf32>
    %cst_5 = arith.constant 0.000000e+00 : f32
    %7 = vector.broadcast %cst_5 : f32 to vector<16x1024xf32>
    %8 = arith.cmpf ogt, %6, %7 : vector<16x1024xf32>
    %cst_6 = arith.constant 2.000000e-01 : f32
    %9 = vector.broadcast %cst_6 : f32 to vector<16x1024xf32>
    %10 = arith.mulf %9, %6 : vector<16x1024xf32>
    %11 = arith.select %8, %6, %10 : vector<16x1024xi1>, vector<16x1024xf32>
    %12 = arith.truncf %11 : vector<16x1024xf32> to vector<16x1024xbf16>
    %c0_7 = arith.constant 0 : index
    %c0_8 = arith.constant 0 : index
    %13 = vector.load %arg4[%c0_7, %c0_8] : memref<1024x512xbf16, #tpu.memory_space<vmem>>, vector<1024x512xbf16>
    %cst_9 = arith.constant dense<0.000000e+00> : vector<16x512xf32>
    %14 = tpu.matmul %12, %13, %cst_9 {dimension_numbers = #tpu.dot_dimension_numbers<[1], [0], [0], [1], [0, 0, 1, 1], [], []>} : vector<16x1024xbf16>, vector<1024x512xbf16>, vector<16x512xf32> -> vector<16x512xf32>
    %c0_10 = arith.constant 0 : index
    %c0_11 = arith.constant 0 : index
    %15 = vector.load %arg5[%c0_10, %c0_11] : memref<1x512xf32, #tpu.memory_space<vmem>>, vector<1x512xf32>
    %16 = vector.broadcast %15 : vector<1x512xf32> to vector<16x512xf32>
    %17 = arith.addf %14, %16 : vector<16x512xf32>
    %cst_12 = arith.constant 0.000000e+00 : f32
    %18 = vector.broadcast %cst_12 : f32 to vector<16x512xf32>
    %19 = arith.cmpf ogt, %17, %18 : vector<16x512xf32>
    %cst_13 = arith.constant 2.000000e-01 : f32
    %20 = vector.broadcast %cst_13 : f32 to vector<16x512xf32>
    %21 = arith.mulf %20, %17 : vector<16x512xf32>
    %22 = arith.select %19, %17, %21 : vector<16x512xi1>, vector<16x512xf32>
    %23 = arith.truncf %22 : vector<16x512xf32> to vector<16x512xbf16>
    %c0_14 = arith.constant 0 : index
    %c0_15 = arith.constant 0 : index
    %24 = vector.load %arg6[%c0_14, %c0_15] : memref<512x256xbf16, #tpu.memory_space<vmem>>, vector<512x256xbf16>
    %cst_16 = arith.constant dense<0.000000e+00> : vector<16x256xf32>
    %25 = tpu.matmul %23, %24, %cst_16 {dimension_numbers = #tpu.dot_dimension_numbers<[1], [0], [0], [1], [0, 0, 1, 1], [], []>} : vector<16x512xbf16>, vector<512x256xbf16>, vector<16x256xf32> -> vector<16x256xf32>
    %c0_17 = arith.constant 0 : index
    %c0_18 = arith.constant 0 : index
    %26 = vector.load %arg7[%c0_17, %c0_18] : memref<1x256xf32, #tpu.memory_space<vmem>>, vector<1x256xf32>
    %27 = vector.broadcast %26 : vector<1x256xf32> to vector<16x256xf32>
    %28 = arith.addf %25, %27 : vector<16x256xf32>
    %cst_19 = arith.constant 0.000000e+00 : f32
    %29 = vector.broadcast %cst_19 : f32 to vector<16x256xf32>
    %30 = arith.cmpf ogt, %28, %29 : vector<16x256xf32>
    %cst_20 = arith.constant 2.000000e-01 : f32
    %31 = vector.broadcast %cst_20 : f32 to vector<16x256xf32>
    %32 = arith.mulf %31, %28 : vector<16x256xf32>
    %33 = arith.select %30, %28, %32 : vector<16x256xi1>, vector<16x256xf32>
    %34 = arith.truncf %33 : vector<16x256xf32> to vector<16x256xbf16>
    %c0_21 = arith.constant 0 : index
    %c0_22 = arith.constant 0 : index
    %35 = vector.load %arg8[%c0_21, %c0_22] : memref<256x128xbf16, #tpu.memory_space<vmem>>, vector<256x128xbf16>
    %cst_23 = arith.constant dense<0.000000e+00> : vector<16x128xf32>
    %36 = tpu.matmul %34, %35, %cst_23 {dimension_numbers = #tpu.dot_dimension_numbers<[1], [0], [0], [1], [0, 0, 1, 1], [], []>} : vector<16x256xbf16>, vector<256x128xbf16>, vector<16x128xf32> -> vector<16x128xf32>
    %c0_24 = arith.constant 0 : index
    %c0_25 = arith.constant 0 : index
    %37 = vector.load %arg9[%c0_24, %c0_25] : memref<1x128xf32, #tpu.memory_space<vmem>>, vector<1x128xf32>
    %38 = vector.broadcast %37 : vector<1x128xf32> to vector<16x128xf32>
    %39 = arith.addf %36, %38 : vector<16x128xf32>
    %40 = arith.negf %39 : vector<16x128xf32>
    %41 = math.exp %40 : vector<16x128xf32>
    %cst_26 = arith.constant 1.000000e+00 : f32
    %42 = vector.broadcast %cst_26 : f32 to vector<16x128xf32>
    %43 = arith.addf %42, %41 : vector<16x128xf32>
    %44 = arith.divf %42, %43 : vector<16x128xf32>
    %c0_27 = arith.constant 0 : index
    %c0_28 = arith.constant 0 : index
    %45 = vector.load %arg10[%c0_27, %c0_28] : memref<16x128xf32, #tpu.memory_space<vmem>>, vector<16x128xf32>
    tpu.vector_store %arg10[%c0_27, %c0_28], %44 {strides = array<i32>} : memref<16x128xf32, #tpu.memory_space<vmem>>, vector<16x128xf32>,
    return
  }
  func.func @transform_0(%arg0: i32) -> (i32, i32) {
    %c0_i32 = arith.constant 0 : i32
    %c0_i32_0 = arith.constant 0 : i32
    return %arg0, %c0_i32 : i32, i32
  }
  func.func @transform_1(%arg0: i32) -> (i32, i32) {
    %c0_i32 = arith.constant 0 : i32
    %c0_i32_0 = arith.constant 0 : i32
    %c0_i32_1 = arith.constant 0 : i32
    return %c0_i32, %c0_i32_0 : i32, i32
  }
  func.func @transform_2(%arg0: i32) -> (i32, i32) {
    %c0_i32 = arith.constant 0 : i32
    %c0_i32_0 = arith.constant 0 : i32
    %c0_i32_1 = arith.constant 0 : i32
    return %c0_i32, %c0_i32_0 : i32, i32
  }
  func.func @transform_3(%arg0: i32) -> (i32, i32) {
    %c0_i32 = arith.constant 0 : i32
    %c0_i32_0 = arith.constant 0 : i32
    %c0_i32_1 = arith.constant 0 : i32
    return %c0_i32, %c0_i32_0 : i32, i32
  }
  func.func @transform_4(%arg0: i32) -> (i32, i32) {
    %c0_i32 = arith.constant 0 : i32
    %c0_i32_0 = arith.constant 0 : i32
    %c0_i32_1 = arith.constant 0 : i32
    return %c0_i32, %c0_i32_0 : i32, i32
  }
  func.func @transform_5(%arg0: i32) -> (i32, i32) {
    %c0_i32 = arith.constant 0 : i32
    %c0_i32_0 = arith.constant 0 : i32
    %c0_i32_1 = arith.constant 0 : i32
    return %c0_i32, %c0_i32_0 : i32, i32
  }
  func.func @transform_6(%arg0: i32) -> (i32, i32) {
    %c0_i32 = arith.constant 0 : i32
    %c0_i32_0 = arith.constant 0 : i32
    %c0_i32_1 = arith.constant 0 : i32
    return %c0_i32, %c0_i32_0 : i32, i32
  }
  func.func @transform_7(%arg0: i32) -> (i32, i32) {
    %c0_i32 = arith.constant 0 : i32
    %c0_i32_0 = arith.constant 0 : i32
    %c0_i32_1 = arith.constant 0 : i32
    return %c0_i32, %c0_i32_0 : i32, i32
  }
  func.func @transform_8(%arg0: i32) -> (i32, i32) {
    %c0_i32 = arith.constant 0 : i32
    %c0_i32_0 = arith.constant 0 : i32
    %c0_i32_1 = arith.constant 0 : i32
    return %c0_i32, %c0_i32_0 : i32, i32
  }
  func.func @transform_9(%arg0: i32) -> (i32, i32) {
    %c0_i32 = arith.constant 0 : i32
    %c0_i32_0 = arith.constant 0 : i32
    return %arg0, %c0_i32 : i32, i32
  }
}

</mosaic_0001>

<bundles_post_ra>
// kernel: discriminator_forward.1
= control target key start
LH: loop header
LB: loop body
LE: loop exit
PB: predicated region body
PF: predicated region fallthrough
CT: control target
= control target key end

     0   :  { %14 = vsyncpa [#allocation3], 0  ;;  %s7915_s0 = inlined_call_operand.hbm [shape: f32[16,784], index: 0, kind: input, shape index: {}]   ;;  %s7916_s1 = inlined_call_operand.hbm [shape: bf16[784,1024], index: 1, kind: input, shape index: {}]   ;;  %s7917_s2 = inlined_call_operand.hbm [shape: f32[1,1024], index: 2, kind: input, shape index: {}]   ;;  %s7918_s3 = inlined_call_operand.hbm [shape: bf16[1024,512], index: 3, kind: input, shape index: {}]   ;;  %s7919_s4 = inlined_call_operand.hbm [shape: f32[1,512], index: 4, kind: input, shape index: {}]   ;;  %s7920_s5 = inlined_call_operand.hbm [shape: bf16[512,256], index: 5, kind: input, shape index: {}]   ;;  %s7921_s6 = inlined_call_operand.hbm [shape: f32[1,256], index: 6, kind: input, shape index: {}]   ;;  %s7922_s7 = inlined_call_operand.hbm [shape: bf16[256,128], index: 7, kind: input, shape index: {}]   ;;  %s7923_s8 = inlined_call_operand.hbm [shape: f32[1,128], index: 8, kind: input, shape index: {}]   ;;  %s7924_s9 = inlined_call_operand.hbm [shape: f32[16,128], index: 9, kind: output, shape index: {}]  }
   0x1   :  { %15 = vsyncpa [#allocation6], 0 }
   0x2   :  { %16 = vsyncpa [#allocation9], 0 }
   0x3   :  { %17 = vsyncpa [#allocation12], 0 }
   0x4   :  { %18 = vsyncpa [#allocation15], 0 }
   0x5   :  { %19 = vsyncpa [#allocation4], 0  ;;  %s7567_s30 = smov [#allocation5]   ;;  %s7335_s13 = scalar_lea.hbm %s7916_s1, 50176 }
   0x6   :  { %s37_s10 = sshll.u32 %s7567_s30, 4  ;;  %p7336_p0 = scmp.ne.s32.totalorder %s7916_s1, %s7335_s13  ;;  %s38_s10 = int_to_ptr.vmem [resolvable:$true] %s37_s10 }
   0x7   :  { %p7339_p1 = scmp.lt.u32.totalorder %s7335_s13, %s7916_s1 }
   0x9   :  { %p7341_p2 = pnand %p7339_p1, %p7336_p0 }
   0xb   :  { %7344 = shalt.err (!%p7341_p2)
}
   0xc   :  { %s7345_s18 = scalar_lea.vmem %s38_s10, 50176  ;;  %p7350_p4 = scmp.lt.s32.totalorder %s38_s10, %s38_s10 }
   0xd   :  { %p7346_p3 = scmp.ne.s32.totalorder %s38_s10, %s7345_s18  ;;  %p7351_p5 = scmp.lt.s32.totalorder %s7345_s18, %s7345_s18 }
   0xf   :  { %p7352_p6 = por %p7351_p5, %p7350_p4 }
  0x11   :  { %p7353_p7 = pnand %p7352_p6, %p7346_p3 }
  0x13   :  { %7356 = shalt.err (!%p7353_p7)
}
  0x14   :  { %s7568_s19 = smov 512   ;;  %s7569_s20 = smov 32  }
  0x15   :  { %43 = dma.hbm_to_vmem [thread:$0]  %s7916_s1, 50176, %s38_s10, [#allocation6], %s7568_s19, %s7568_s19, %s7569_s20  }
  0x16   :  { %s7570_s23 = smov [#allocation8]   ;;  %s7357_s27 = scalar_lea.hbm %s7918_s3, 32768 }
  0x17   :  { %s59_s24 = sshll.u32 %s7570_s23, 4  ;;  %p7358_p8 = scmp.ne.s32.totalorder %s7918_s3, %s7357_s27  ;;  %s60_s24 = int_to_ptr.vmem [resolvable:$true] %s59_s24 }
  0x18   :  { %p7361_p9 = scmp.lt.u32.totalorder %s7357_s27, %s7918_s3 }
  0x1a   :  { %p7363_p10 = pnand %p7361_p9, %p7358_p8 }
  0x1c   :  { %7366 = shalt.err (!%p7363_p10)
}
  0x1d   :  { %s7367_s12 = scalar_lea.vmem %s60_s24, 32768  ;;  %p7372_p12 = scmp.lt.s32.totalorder %s60_s24, %s60_s24 }
  0x1e   :  { %p7368_p11 = scmp.ne.s32.totalorder %s60_s24, %s7367_s12  ;;  %p7373_p13 = scmp.lt.s32.totalorder %s7367_s12, %s7367_s12 }
  0x20   :  { %p7374_p0 = por %p7373_p13, %p7372_p12 }
  0x22   :  { %p7375_p1 = pnand %p7374_p0, %p7368_p11 }
  0x24   :  { %7378 = shalt.err (!%p7375_p1)
}
  0x25   :  { %s7571_s1 = smov 256   ;;  %s7572_s10 = smov 16  }
  0x26   :  { %65 = dma.hbm_to_vmem [thread:$0]  %s7918_s3, 32768, %s60_s24, [#allocation9], %s7571_s1, %s7571_s1, %s7572_s10  }
  0x27   :  { %s7573_s15 = smov [#allocation11]   ;;  %s7379_s19 = scalar_lea.hbm %s7920_s5, 8192 }
  0x28   :  { %s81_s16 = sshll.u32 %s7573_s15, 4  ;;  %p7380_p2 = scmp.ne.s32.totalorder %s7920_s5, %s7379_s19  ;;  %s82_s16 = int_to_ptr.vmem [resolvable:$true] %s81_s16 }
  0x29   :  { %p7383_p3 = scmp.lt.u32.totalorder %s7379_s19, %s7920_s5 }
  0x2b   :  { %p7385_p4 = pnand %p7383_p3, %p7380_p2 }
  0x2d   :  { %7388 = shalt.err (!%p7385_p4)
}
  0x2e   :  { %s7389_s25 = scalar_lea.vmem %s82_s16, 8192  ;;  %p7394_p6 = scmp.lt.s32.totalorder %s82_s16, %s82_s16 }
  0x2f   :  { %p7390_p5 = scmp.ne.s32.totalorder %s82_s16, %s7389_s25  ;;  %p7395_p7 = scmp.lt.s32.totalorder %s7389_s25, %s7389_s25 }
  0x31   :  { %p7396_p8 = por %p7395_p7, %p7394_p6 }
  0x33   :  { %p7397_p9 = pnand %p7396_p8, %p7390_p5 }
  0x35   :  { %7400 = shalt.err (!%p7397_p9)
}
  0x36   :  { %s7574_s3 = smov 128   ;;  %s7575_s24 = smov 8  }
  0x37   :  { %87 = dma.hbm_to_vmem [thread:$0]  %s7920_s5, 8192, %s82_s16, [#allocation12], %s7574_s3, %s7574_s3, %s7575_s24  }
  0x38   :  { %s7576_s28 = smov [#allocation14]   ;;  %s7401_s12 = scalar_lea.hbm %s7922_s7, 2048 }
  0x39   :  { %s103_s29 = sshll.u32 %s7576_s28, 4  ;;  %p7402_p10 = scmp.ne.s32.totalorder %s7922_s7, %s7401_s12  ;;  %s104_s29 = int_to_ptr.vmem [resolvable:$true] %s103_s29 }
  0x3a   :  { %p7405_p11 = scmp.lt.u32.totalorder %s7401_s12, %s7922_s7 }
  0x3c   :  { %p7407_p12 = pnand %p7405_p11, %p7402_p10 }
  0x3e   :  { %7410 = shalt.err (!%p7407_p12)
}
  0x3f   :  { %s7411_s15 = scalar_lea.vmem %s104_s29, 2048  ;;  %p7416_p0 = scmp.lt.s32.totalorder %s104_s29, %s104_s29 }
  0x40   :  { %p7412_p13 = scmp.ne.s32.totalorder %s104_s29, %s7411_s15  ;;  %p7417_p1 = scmp.lt.s32.totalorder %s7411_s15, %s7411_s15 }
  0x42   :  { %p7418_p2 = por %p7417_p1, %p7416_p0 }
  0x44   :  { %p7419_p3 = pnand %p7418_p2, %p7412_p13 }
  0x46   :  { %7422 = shalt.err (!%p7419_p3)
}
  0x47   :  { %s7577_s5 = smov 64   ;;  %s7578_s16 = smov 4  }
  0x48   :  { %109 = dma.hbm_to_vmem [thread:$0]  %s7922_s7, 2048, %s104_s29, [#allocation15], %s7577_s5, %s7577_s5, %s7578_s16  }
  0x49   :  { %s7579_s19 = smov [#allocation2]   ;;  %s7423_s23 = scalar_lea.hbm %s7915_s0, 1792 }
  0x4a   :  { %s25_s20 = sshll.u32 %s7579_s19, 4  ;;  %p7424_p4 = scmp.ne.s32.totalorder %s7915_s0, %s7423_s23  ;;  %s26_s20 = int_to_ptr.vmem [resolvable:$true] %s25_s20 }
  0x4b   :  { %p7427_p5 = scmp.lt.u32.totalorder %s7423_s23, %s7915_s0 }
  0x4d   :  { %p7429_p6 = pnand %p7427_p5, %p7424_p4 }
  0x4f   :  { %7432 = shalt.err (!%p7429_p6)
}
  0x50   :  { %s7433_s30 = scalar_lea.vmem %s26_s20, 1792  ;;  %p7438_p8 = scmp.lt.s32.totalorder %s26_s20, %s26_s20 }
  0x51   :  { %p7434_p7 = scmp.ne.s32.totalorder %s26_s20, %s7433_s30  ;;  %p7439_p9 = scmp.lt.s32.totalorder %s7433_s30, %s7433_s30 }
  0x53   :  { %p7440_p10 = por %p7439_p9, %p7438_p8 }
  0x55   :  { %p7441_p11 = pnand %p7440_p10, %p7434_p7 }
  0x57   :  { %7444 = shalt.err (!%p7441_p11)
}
  0x58   :  { %s7580_s7 = smov 896   ;;  %s7581_s29 = smov 56  }
  0x59   :  { %31 = dma.hbm_to_vmem [thread:$0]  %s7915_s0, 1792, %s26_s20, [#allocation3], %s7580_s7, %s7580_s7, %s7581_s29  }
  0x5a   :  { %s7582_s1 = smov [#allocation7]   ;;  %s7583_s13 = smov [#allocation10]  }
  0x5b   :  { %s50_s10 = sshll.u32 %s7582_s1, 4  ;;  %s72_s14 = sshll.u32 %s7583_s13, 4  ;;  %s51_s10 = int_to_ptr.vmem [resolvable:$true] %s50_s10  ;;  %s73_s14 = int_to_ptr.vmem [resolvable:$true] %s72_s14 }
  0x5c   :  { %s7445_s16 = scalar_lea.hbm %s7917_s2, 128 }
  0x5d   :  { %p7446_p12 = scmp.ne.s32.totalorder %s7917_s2, %s7445_s16  ;;  %p7449_p13 = scmp.lt.u32.totalorder %s7445_s16, %s7917_s2 }
  0x5f   :  { %p7451_p0 = pnand %p7449_p13, %p7446_p12 }
  0x61   :  { %7454 = shalt.err (!%p7451_p0)
}
  0x62   :  { %s7455_s0 = scalar_lea.vmem %s51_s10, 128  ;;  %p7460_p2 = scmp.lt.s32.totalorder %s51_s10, %s51_s10 }
  0x63   :  { %p7456_p1 = scmp.ne.s32.totalorder %s51_s10, %s7455_s0  ;;  %p7461_p3 = scmp.lt.s32.totalorder %s7455_s0, %s7455_s0 }
  0x65   :  { %p7462_p4 = por %p7461_p3, %p7460_p2 }
  0x67   :  { %p7463_p5 = pnand %p7462_p4, %p7456_p1 }
  0x69   :  { %7466 = shalt.err (!%p7463_p5)
}
  0x6a   :  { %53 = dma.hbm_to_vmem [thread:$0]  %s7917_s2, 128, %s51_s10, [#allocation6]  }
  0x6b   :  { %s7467_s26 = scalar_lea.hbm %s7919_s4, 64 }
  0x6c   :  { %p7468_p6 = scmp.ne.s32.totalorder %s7919_s4, %s7467_s26  ;;  %p7471_p7 = scmp.lt.u32.totalorder %s7467_s26, %s7919_s4 }
  0x6e   :  { %p7473_p8 = pnand %p7471_p7, %p7468_p6 }
  0x70   :  { %7476 = shalt.err (!%p7473_p8)
}
  0x71   :  { %s7477_s29 = scalar_lea.vmem %s73_s14, 64  ;;  %p7482_p10 = scmp.lt.s32.totalorder %s73_s14, %s73_s14 }
  0x72   :  { %p7478_p9 = scmp.ne.s32.totalorder %s73_s14, %s7477_s29  ;;  %p7483_p11 = scmp.lt.s32.totalorder %s7477_s29, %s7477_s29 }
  0x74   :  { %p7484_p12 = por %p7483_p11, %p7482_p10 }
  0x76   :  { %p7485_p13 = pnand %p7484_p12, %p7478_p9 }
  0x78   :  { %7488 = shalt.err (!%p7485_p13)
}
  0x79   :  { %75 = dma.hbm_to_vmem [thread:$0]  %s7919_s4, 64, %s73_s14, [#allocation9]  }
  0x7a   :  { %s7584_s12 = smov [#allocation13]   ;;  %s7585_s10 = smov [#allocation16]  }
  0x7b   :  { %s94_s1 = sshll.u32 %s7584_s12, 4  ;;  %s116_s13 = sshll.u32 %s7585_s10, 4  ;;  %s95_s1 = int_to_ptr.vmem [resolvable:$true] %s94_s1  ;;  %s117_s13 = int_to_ptr.vmem [resolvable:$true] %s116_s13 }
  0x7c   :  { %s7489_s16 = scalar_lea.hbm %s7921_s6, 32 }
  0x7d   :  { %p7490_p0 = scmp.ne.s32.totalorder %s7921_s6, %s7489_s16  ;;  %p7493_p1 = scmp.lt.u32.totalorder %s7489_s16, %s7921_s6 }
  0x7f   :  { %p7495_p2 = pnand %p7493_p1, %p7490_p0 }
  0x81   :  { %7498 = shalt.err (!%p7495_p2)
}
  0x82   :  { %s7499_s4 = scalar_lea.vmem %s95_s1, 32  ;;  %p7504_p4 = scmp.lt.s32.totalorder %s95_s1, %s95_s1 }
  0x83   :  { %p7500_p3 = scmp.ne.s32.totalorder %s95_s1, %s7499_s4  ;;  %p7505_p5 = scmp.lt.s32.totalorder %s7499_s4, %s7499_s4 }
  0x85   :  { %p7506_p6 = por %p7505_p5, %p7504_p4 }
  0x87   :  { %p7507_p7 = pnand %p7506_p6, %p7500_p3 }
  0x89   :  { %7510 = shalt.err (!%p7507_p7)
}
  0x8a   :  { %97 = dma.hbm_to_vmem [thread:$0]  %s7921_s6, 32, %s95_s1, [#allocation12]  }
  0x8b   :  { %s7511_s23 = scalar_lea.hbm %s7923_s8, 16 }
  0x8c   :  { %p7512_p8 = scmp.ne.s32.totalorder %s7923_s8, %s7511_s23  ;;  %p7515_p9 = scmp.lt.u32.totalorder %s7511_s23, %s7923_s8 }
  0x8e   :  { %p7517_p10 = pnand %p7515_p9, %p7512_p8 }
  0x90   :  { %7520 = shalt.err (!%p7517_p10)
}
  0x91   :  { %s7521_s30 = scalar_lea.vmem %s117_s13, 16  ;;  %s7525_s7 = scalar_lea.vmem %s117_s13, 32 }
  0x92   :  { %p7522_p11 = scmp.ne.s32.totalorder %s117_s13, %s7521_s30  ;;  %p7526_p12 = scmp.lt.s32.totalorder %s117_s13, %s117_s13 }
  0x93   :  { %p7527_p13 = scmp.lt.s32.totalorder %s7525_s7, %s7521_s30 }
  0x95   :  { %p7528_p0 = por %p7527_p13, %p7526_p12 }
  0x97   :  { %p7529_p1 = pnand %p7528_p0, %p7522_p11 }
  0x99   :  { %7532 = shalt.err (!%p7529_p1)
}
  0x9a   :  { %119 = dma.hbm_to_vmem [thread:$0]  %s7923_s8, 16, %s117_s13, [#allocation15]  }
  0x9b   :  { %7555 = dma.done.wait [#allocation3], 1792  }
  0x9c   :  { %7556 = vsyncadd [#allocation3], 4294965504 }
  0x9d   :  { %7557 = dma.done.wait [#allocation6], 50304  }
  0x9e   :  { %7558 = vsyncadd [#allocation6], 4294916992 }
  0x9f   :  { %7559 = dma.done.wait [#allocation9], 32832  }
  0xa0   :  { %7560 = vsyncadd [#allocation9], 4294934464 }
  0xa1   :  { %7561 = dma.done.wait [#allocation12], 8224  }
  0xa2   :  { %7562 = vsyncadd [#allocation12], 4294959072 }
  0xa3   :  { %7563 = dma.done.wait [#allocation15], 2064  }
  0xa4   :  { %7564 = vsyncadd [#allocation15], 4294965232  ;;  %v169_v0 = vld [vmem:[#allocation5] sm:$0xff]  ;;  %v149_v53 = vld [vmem:[#allocation2 + $0x8] sm:$0xff]  ;;  %vm2563_vm0 = vcmask 130048   ;;  %s7587_s8 = smov [#allocation17]  }
  0xa5   :  { %v173_v1 = vld [vmem:[#allocation5 + $0x20] sm:$0xff]  ;;  %v156_v54 = vld [vmem:[#allocation2 + $0x40] sm:$0xff]  ;;  %v151_v59 = vld [vmem:[#allocation2 + $0x18] sm:$0xff]  ;;  %s5932_s2 = sshll.u32 %s7587_s8, 4  ;;  %s5933_s2 = int_to_ptr.vmem [resolvable:$true] %s5932_s2 }
  0xa6   :  { %v297_v2 = vld [vmem:[#allocation5 + $0x400] sm:$0xff]  ;;  %v5949_v3 = vcombine.high %v169_v0, %v173_v1  ;;  %v5948_v5 = vcombine.low %v169_v0, %v173_v1  ;;  %v7749_v58 = vpack.c.bf16 %v156_v54, %v149_v53  ;;  %s7533_s11 = scalar_lea.vmem %s5933_s2, 256  ;;  %p7538_p3 = scmp.lt.s32.totalorder %s5933_s2, %s5933_s2 }
  0xa7   :  { %v301_v4 = vld [vmem:[#allocation5 + $0x420] sm:$0xff]  ;;  %p7534_p2 = scmp.ne.s32.totalorder %s5933_s2, %s7533_s11  ;;  %p7539_p4 = scmp.lt.s32.totalorder %s7533_s11, %s7533_s11 }
  0xa8   :  { %v177_v6 = vld [vmem:[#allocation5 + $0x40] sm:$0xff]  ;;  %v6077_v8 = vcombine.high %v297_v2, %v301_v4  ;;  %v6076_v9 = vcombine.low %v297_v2, %v301_v4  ;;  %2567 = vmatprep.subr.bf16.mxu1 %v5949_v3  ;;  %2599 = vmatprep.mubr.bf16.mxu1 %v7749_v58 }
  0xa9   :  { %v181_v7 = vld [vmem:[#allocation5 + $0x60] sm:$0xff]  ;;  %2568 = vmatpush1.bf16.msra.mxu1 %v5948_v5  ;;  %p7540_p5 = por %p7539_p4, %p7538_p3 }
  0xaa   :  { %v5957_v10 = vcombine.high %v177_v6, %v181_v7  ;;  %v305_v11 = vld [vmem:[#allocation5 + $0x440] sm:$0xff]  ;;  %2610 = vmatprep.subr.bf16.mxu0 %v6077_v8  ;;  %v5956_v18 = vcombine.low %v177_v6, %v181_v7 }
  0xab   :  { %v309_v12 = vld [vmem:[#allocation5 + $0x460] sm:$0xff]  ;;  %2611 = vmatpush1.bf16.msra.mxu0 %v6076_v9  ;;  %p7541_p6 = pnand %p7540_p5, %p7534_p2 }
  0xac   :  { %v185_v13 = vld [vmem:[#allocation5 + $0x80] sm:$0xff]  ;;  %v6085_v14 = vcombine.high %v305_v11, %v309_v12  ;;  %2569 = vmatprep.subr.bf16.mxu1 %v5957_v10  ;;  %v6084_v19 = vcombine.low %v305_v11, %v309_v12 }
  0xad   :  { %v189_v15 = vld [vmem:[#allocation5 + $0xa0] sm:$0xff]  ;;  %2570 = vmatpush1.bf16.msra.mxu1 %v5956_v18 }
  0xae   :  { %v313_v16 = vld [vmem:[#allocation5 + $0x480] sm:$0xff]  ;;  %v5965_v20 = vcombine.high %v185_v13, %v189_v15  ;;  %2612 = vmatprep.subr.bf16.mxu0 %v6085_v14  ;;  %v5964_v26 = vcombine.low %v185_v13, %v189_v15 }
  0xaf   :  { %v317_v17 = vld [vmem:[#allocation5 + $0x4a0] sm:$0xff]  ;;  %2613 = vmatpush1.bf16.msra.mxu0 %v6084_v19 }
  0xb0   :  { %v6093_v21 = vcombine.high %v313_v16, %v317_v17  ;;  %v193_v22 = vld [vmem:[#allocation5 + $0xc0] sm:$0xff]  ;;  %2571 = vmatprep.subr.bf16.mxu1 %v5965_v20  ;;  %v6092_v27 = vcombine.low %v313_v16, %v317_v17 }
  0xb1   :  { %v197_v23 = vld [vmem:[#allocation5 + $0xe0] sm:$0xff]  ;;  %2572 = vmatpush1.bf16.msra.mxu1 %v5964_v26 }
  0xb2   :  { %v321_v24 = vld [vmem:[#allocation5 + $0x4c0] sm:$0xff]  ;;  %v5973_v28 = vcombine.high %v193_v22, %v197_v23  ;;  %2614 = vmatprep.subr.bf16.mxu0 %v6093_v21  ;;  %v5972_v34 = vcombine.low %v193_v22, %v197_v23 }
  0xb3   :  { %v325_v25 = vld [vmem:[#allocation5 + $0x4e0] sm:$0xff]  ;;  %2615 = vmatpush1.bf16.msra.mxu0 %v6092_v27 }
  0xb4   :  { %v6101_v29 = vcombine.high %v321_v24, %v325_v25  ;;  %v201_v30 = vld [vmem:[#allocation5 + $0x100] sm:$0xff]  ;;  %2573 = vmatprep.subr.bf16.mxu1 %v5973_v28  ;;  %v6100_v35 = vcombine.low %v321_v24, %v325_v25 }
  0xb5   :  { %v205_v31 = vld [vmem:[#allocation5 + $0x120] sm:$0xff]  ;;  %2574 = vmatpush1.bf16.msra.mxu1 %v5972_v34 }
  0xb6   :  { %v329_v32 = vld [vmem:[#allocation5 + $0x500] sm:$0xff]  ;;  %v5981_v36 = vcombine.high %v201_v30, %v205_v31  ;;  %2616 = vmatprep.subr.bf16.mxu0 %v6101_v29  ;;  %v5980_v42 = vcombine.low %v201_v30, %v205_v31 }
  0xb7   :  { %v333_v33 = vld [vmem:[#allocation5 + $0x520] sm:$0xff]  ;;  %2617 = vmatpush1.bf16.msra.mxu0 %v6100_v35 }
  0xb8   :  { %v6109_v37 = vcombine.high %v329_v32, %v333_v33  ;;  %v209_v38 = vld [vmem:[#allocation5 + $0x140] sm:$0xff]  ;;  %2575 = vmatprep.subr.bf16.mxu1 %v5981_v36  ;;  %v6108_v43 = vcombine.low %v329_v32, %v333_v33 }
  0xb9   :  { %v213_v39 = vld [vmem:[#allocation5 + $0x160] sm:$0xff]  ;;  %2576 = vmatpush1.bf16.msra.mxu1 %v5980_v42 }
  0xba   :  { %v337_v40 = vld [vmem:[#allocation5 + $0x540] sm:$0xff]  ;;  %v5989_v44 = vcombine.high %v209_v38, %v213_v39  ;;  %2618 = vmatprep.subr.bf16.mxu0 %v6109_v37  ;;  %v5988_v50 = vcombine.low %v209_v38, %v213_v39 }
  0xbb   :  { %v341_v41 = vld [vmem:[#allocation5 + $0x560] sm:$0xff]  ;;  %2619 = vmatpush1.bf16.msra.mxu0 %v6108_v43 }
  0xbc   :  { %v6117_v45 = vcombine.high %v337_v40, %v341_v41  ;;  %v217_v46 = vld [vmem:[#allocation5 + $0x180] sm:$0xff]  ;;  %2577 = vmatprep.subr.bf16.mxu1 %v5989_v44  ;;  %v6116_v51 = vcombine.low %v337_v40, %v341_v41 }
  0xbd   :  { %v221_v47 = vld [vmem:[#allocation5 + $0x1a0] sm:$0xff]  ;;  %2578 = vmatpush1.bf16.msra.mxu1 %v5988_v50 }
  0xbe   :  { %v345_v48 = vld [vmem:[#allocation5 + $0x580] sm:$0xff]  ;;  %v5997_v52 = vcombine.high %v217_v46, %v221_v47  ;;  %2620 = vmatprep.subr.bf16.mxu0 %v6117_v45  ;;  %v5996_v63 = vcombine.low %v217_v46, %v221_v47 }
  0xbf   :  { %v349_v49 = vld [vmem:[#allocation5 + $0x5a0] sm:$0xff]  ;;  %2621 = vmatpush1.bf16.msra.mxu0 %v6116_v51 }
  0xc0   :  { %v6125_v55 = vcombine.high %v345_v48, %v349_v49  ;;  %v225_v56 = vld [vmem:[#allocation5 + $0x1c0] sm:$0xff]  ;;  %2579 = vmatprep.subr.bf16.mxu1 %v5997_v52  ;;  %v6124_v1 = vcombine.low %v345_v48, %v349_v49 }
  0xc1   :  { %v229_v57 = vld [vmem:[#allocation5 + $0x1e0] sm:$0xff]  ;;  %2580 = vmatpush1.bf16.msra.mxu1 %v5996_v63 }
  0xc2   :  { %v353_v60 = vld [vmem:[#allocation5 + $0x5c0] sm:$0xff]  ;;  %v6005_v2 = vcombine.high %v225_v56, %v229_v57  ;;  %2622 = vmatprep.subr.bf16.mxu0 %v6125_v55  ;;  %v6004_v8 = vcombine.low %v225_v56, %v229_v57 }
  0xc3   :  { %v357_v61 = vld [vmem:[#allocation5 + $0x5e0] sm:$0xff]  ;;  %2623 = vmatpush1.bf16.msra.mxu0 %v6124_v1 }
  0xc4   :  { %v158_v62 = vld [vmem:[#allocation2 + $0x50] sm:$0xff]  ;;  %v6133_v3 = vcombine.high %v353_v60, %v357_v61  ;;  %2581 = vmatprep.subr.bf16.mxu1 %v6005_v2  ;;  %v6132_v9 = vcombine.low %v353_v60, %v357_v61 }
  0xc5   :  { %v7752_v0 = vpack.c.bf16 %v158_v62, %v151_v59  ;;  %v233_v4 = vld [vmem:[#allocation5 + $0x200] sm:$0xff]  ;;  %2582 = vmatpush1.bf16.msra.mxu1 %v6004_v8 }
  0xc6   :  { %v237_v5 = vld [vmem:[#allocation5 + $0x220] sm:$0xff]  ;;  %2624 = vmatprep.subr.bf16.mxu0 %v6133_v3 }
  0xc7   :  { %2642 = vmatprep.mubr.bf16.mxu0 %v7752_v0  ;;  %v361_v6 = vld [vmem:[#allocation5 + $0x600] sm:$0xff]  ;;  %v6013_v10 = vcombine.high %v233_v4, %v237_v5  ;;  %v6012_v16 = vcombine.low %v233_v4, %v237_v5  ;;  %2625 = vmatpush1.bf16.msra.mxu0 %v6132_v9 }
  0xc8   :  { %v365_v7 = vld [vmem:[#allocation5 + $0x620] sm:$0xff] }
  0xc9   :  { %v6141_v11 = vcombine.high %v361_v6, %v365_v7  ;;  %v241_v12 = vld [vmem:[#allocation5 + $0x240] sm:$0xff]  ;;  %2583 = vmatprep.subr.bf16.mxu1 %v6013_v10  ;;  %v6140_v17 = vcombine.low %v361_v6, %v365_v7  ;;  %v170_v6 = vld [vmem:[#allocation5 + $0x8] sm:$0xff] }
  0xca   :  { %v245_v13 = vld [vmem:[#allocation5 + $0x260] sm:$0xff]  ;;  %2584 = vmatpush1.bf16.msra.mxu1 %v6012_v16  ;;  %v174_v7 = vld [vmem:[#allocation5 + $0x28] sm:$0xff]  ;;  %v157_v16 = vld [vmem:[#allocation2 + $0x48] sm:$0xff] }
  0xcb   :  { %v369_v14 = vld [vmem:[#allocation5 + $0x640] sm:$0xff]  ;;  %v6021_v18 = vcombine.high %v241_v12, %v245_v13  ;;  %2626 = vmatprep.subr.bf16.mxu0 %v6141_v11  ;;  %v6020_v24 = vcombine.low %v241_v12, %v245_v13  ;;  %v148_v11 = vld [vmem:[#allocation2] sm:$0xff]  ;;  %v155_v12 = vld [vmem:[#allocation2 + $0x38] sm:$0xff] }
  0xcc   :  { %v373_v15 = vld [vmem:[#allocation5 + $0x660] sm:$0xff]  ;;  %2627 = vmatpush1.bf16.msra.mxu0 %v6140_v17 }
  0xcd   :  { %v6149_v19 = vcombine.high %v369_v14, %v373_v15  ;;  %v249_v20 = vld [vmem:[#allocation5 + $0x280] sm:$0xff]  ;;  %2585 = vmatprep.subr.bf16.mxu1 %v6021_v18  ;;  %v6148_v25 = vcombine.low %v369_v14, %v373_v15  ;;  %v5951_v14 = vcombine.high %v170_v6, %v174_v7 }
  0xce   :  { %v253_v21 = vld [vmem:[#allocation5 + $0x2a0] sm:$0xff]  ;;  %2586 = vmatpush1.bf16.msra.mxu1 %v6020_v24  ;;  %v160_v24 = vld [vmem:[#allocation2 + $0x60] sm:$0xff] }
  0xcf   :  { %v377_v22 = vld [vmem:[#allocation5 + $0x680] sm:$0xff]  ;;  %v6029_v26 = vcombine.high %v249_v20, %v253_v21  ;;  %2628 = vmatprep.subr.bf16.mxu0 %v6149_v19  ;;  %v6028_v32 = vcombine.low %v249_v20, %v253_v21  ;;  %v178_v19 = vld [vmem:[#allocation5 + $0x48] sm:$0xff]  ;;  %v7755_v21 = vpack.c.bf16 %v155_v12, %v148_v11 }
  0xd0   :  { %v381_v23 = vld [vmem:[#allocation5 + $0x6a0] sm:$0xff]  ;;  %2629 = vmatpush1.bf16.msra.mxu0 %v6148_v25  ;;  %v182_v20 = vld [vmem:[#allocation5 + $0x68] sm:$0xff]  ;;  %v5950_v25 = vcombine.low %v170_v6, %v174_v7 }
  0xd1   :  { %v6157_v27 = vcombine.high %v377_v22, %v381_v23  ;;  %v257_v28 = vld [vmem:[#allocation5 + $0x2c0] sm:$0xff]  ;;  %2587 = vmatprep.subr.bf16.mxu1 %v6029_v26  ;;  %v6156_v33 = vcombine.low %v377_v22, %v381_v23  ;;  %v153_v23 = vld [vmem:[#allocation2 + $0x28] sm:$0xff]  ;;  %v226_v11 = vld [vmem:[#allocation5 + $0x1c8] sm:$0xff] }
  0xd2   :  { %v261_v29 = vld [vmem:[#allocation5 + $0x2e0] sm:$0xff]  ;;  %2588 = vmatpush1.bf16.msra.mxu1 %v6028_v32  ;;  %v7759_v32 = vpack.c.bf16 %v160_v24, %v153_v23  ;;  %v230_v12 = vld [vmem:[#allocation5 + $0x1e8] sm:$0xff] }
  0xd3   :  { %v385_v30 = vld [vmem:[#allocation5 + $0x6c0] sm:$0xff]  ;;  %v6037_v34 = vcombine.high %v257_v28, %v261_v29  ;;  %2630 = vmatprep.subr.bf16.mxu0 %v6157_v27  ;;  %v6036_v40 = vcombine.low %v257_v28, %v261_v29  ;;  %v5959_v28 = vcombine.high %v178_v19, %v182_v20 }
  0xd4   :  { %v389_v31 = vld [vmem:[#allocation5 + $0x6e0] sm:$0xff]  ;;  %2631 = vmatpush1.bf16.msra.mxu0 %v6156_v33 }
  0xd5   :  { %v6165_v35 = vcombine.high %v385_v30, %v389_v31  ;;  %v265_v36 = vld [vmem:[#allocation5 + $0x300] sm:$0xff]  ;;  %2589 = vmatprep.subr.bf16.mxu1 %v6037_v34  ;;  %v6164_v41 = vcombine.low %v385_v30, %v389_v31  ;;  %v186_v30 = vld [vmem:[#allocation5 + $0x88] sm:$0xff] }
  0xd6   :  { %v269_v37 = vld [vmem:[#allocation5 + $0x320] sm:$0xff]  ;;  %2590 = vmatpush1.bf16.msra.mxu1 %v6036_v40  ;;  %v190_v31 = vld [vmem:[#allocation5 + $0xa8] sm:$0xff] }
  0xd7   :  { %v393_v38 = vld [vmem:[#allocation5 + $0x700] sm:$0xff]  ;;  %v6045_v42 = vcombine.high %v265_v36, %v269_v37  ;;  %2632 = vmatprep.subr.bf16.mxu0 %v6165_v35  ;;  %v6044_v48 = vcombine.low %v265_v36, %v269_v37  ;;  %v5958_v35 = vcombine.low %v178_v19, %v182_v20  ;;  %v5967_v37 = vcombine.high %v186_v30, %v190_v31  ;;  %v234_v19 = vld [vmem:[#allocation5 + $0x208] sm:$0xff] }
  0xd8   :  { %v397_v39 = vld [vmem:[#allocation5 + $0x720] sm:$0xff]  ;;  %2633 = vmatpush1.bf16.msra.mxu0 %v6164_v41  ;;  %v194_v41 = vld [vmem:[#allocation5 + $0xc8] sm:$0xff] }
  0xd9   :  { %v6173_v43 = vcombine.high %v393_v38, %v397_v39  ;;  %v273_v44 = vld [vmem:[#allocation5 + $0x340] sm:$0xff]  ;;  %2591 = vmatprep.subr.bf16.mxu1 %v6045_v42  ;;  %v6172_v49 = vcombine.low %v393_v38, %v397_v39  ;;  %v198_v42 = vld [vmem:[#allocation5 + $0xe8] sm:$0xff] }
  0xda   :  { %v277_v45 = vld [vmem:[#allocation5 + $0x360] sm:$0xff]  ;;  %2592 = vmatpush1.bf16.msra.mxu1 %v6044_v48  ;;  %v238_v20 = vld [vmem:[#allocation5 + $0x228] sm:$0xff] }
  0xdb   :  { %v401_v46 = vld [vmem:[#allocation5 + $0x740] sm:$0xff]  ;;  %v6053_v50 = vcombine.high %v273_v44, %v277_v45  ;;  %2634 = vmatprep.subr.bf16.mxu0 %v6173_v43  ;;  %v6052_v56 = vcombine.low %v273_v44, %v277_v45  ;;  %v5966_v43 = vcombine.low %v186_v30, %v190_v31  ;;  %v5975_v45 = vcombine.high %v194_v41, %v198_v42  ;;  %v246_v30 = vld [vmem:[#allocation5 + $0x268] sm:$0xff] }
  0xdc   :  { %v405_v47 = vld [vmem:[#allocation5 + $0x760] sm:$0xff]  ;;  %2635 = vmatpush1.bf16.msra.mxu0 %v6172_v49  ;;  %v202_v49 = vld [vmem:[#allocation5 + $0x108] sm:$0xff]  ;;  %v6015_v24 = vcombine.high %v234_v19, %v238_v20  ;;  %v6014_v31 = vcombine.low %v234_v19, %v238_v20 }
  0xdd   :  { %v6181_v51 = vcombine.high %v401_v46, %v405_v47  ;;  %v281_v52 = vld [vmem:[#allocation5 + $0x380] sm:$0xff]  ;;  %2593 = vmatprep.subr.bf16.mxu1 %v6053_v50  ;;  %v6180_v57 = vcombine.low %v401_v46, %v405_v47  ;;  %v206_v50 = vld [vmem:[#allocation5 + $0x128] sm:$0xff] }
  0xde   :  { %v285_v53 = vld [vmem:[#allocation5 + $0x3a0] sm:$0xff]  ;;  %2594 = vmatpush1.bf16.msra.mxu1 %v6052_v56 }
  0xdf   :  { %v409_v54 = vld [vmem:[#allocation5 + $0x780] sm:$0xff]  ;;  %v6061_v59 = vcombine.high %v281_v52, %v285_v53  ;;  %2636 = vmatprep.subr.bf16.mxu0 %v6181_v51  ;;  %v6060_v2 = vcombine.low %v281_v52, %v285_v53  ;;  %v5974_v51 = vcombine.low %v194_v41, %v198_v42  ;;  %v5983_v53 = vcombine.high %v202_v49, %v206_v50 }
  0xe0   :  { %v413_v55 = vld [vmem:[#allocation5 + $0x7a0] sm:$0xff]  ;;  %2637 = vmatpush1.bf16.msra.mxu0 %v6180_v57  ;;  %v210_v57 = vld [vmem:[#allocation5 + $0x148] sm:$0xff] }
  0xe1   :  { %v6189_v60 = vcombine.high %v409_v54, %v413_v55  ;;  %v289_v61 = vld [vmem:[#allocation5 + $0x3c0] sm:$0xff]  ;;  %2595 = vmatprep.subr.bf16.mxu1 %v6061_v59  ;;  %v6188_v3 = vcombine.low %v409_v54, %v413_v55  ;;  %v214_v59 = vld [vmem:[#allocation5 + $0x168] sm:$0xff] }
  0xe2   :  { %v293_v62 = vld [vmem:[#allocation5 + $0x3e0] sm:$0xff]  ;;  %2596 = vmatpush1.bf16.msra.mxu1 %v6060_v2 }
  0xe3   :  { %v417_v63 = vld [vmem:[#allocation5 + $0x7c0] sm:$0xff]  ;;  %v6069_v4 = vcombine.high %v289_v61, %v293_v62  ;;  %2638 = vmatprep.subr.bf16.mxu0 %v6189_v60  ;;  %v6068_v10 = vcombine.low %v289_v61, %v293_v62  ;;  %v5982_v60 = vcombine.low %v202_v49, %v206_v50  ;;  %v5991_v62 = vcombine.high %v210_v57, %v214_v59 }
  0xe4   :  { %v421_v1 = vld [vmem:[#allocation5 + $0x7e0] sm:$0xff]  ;;  %2639 = vmatpush1.bf16.msra.mxu0 %v6188_v3  ;;  %v218_v3 = vld [vmem:[#allocation5 + $0x188] sm:$0xff] }
  0xe5   :  { %v6197_v5 = vcombine.high %v417_v63, %v421_v1  ;;  %v425_v8 = vld [vmem:[#allocation5 + $0x800] sm:$0xff]  ;;  %2597 = vmatprep.subr.bf16.mxu1 %v6069_v4  ;;  %v6196_v13 = vcombine.low %v417_v63, %v421_v1  ;;  %v222_v4 = vld [vmem:[#allocation5 + $0x1a8] sm:$0xff] }
  0xe6   :  { %v429_v9 = vld [vmem:[#allocation5 + $0x820] sm:$0xff]  ;;  %2598 = vmatpush1.bf16.msra.mxu1 %v6068_v10  ;;  %v5999_v7 = vcombine.high %v218_v3, %v222_v4 }
  0xe7   :  { %v150_v15 = vld [vmem:[#allocation2 + $0x10] sm:$0xff]  ;;  %2640 = vmatprep.subr.bf16.mxu0 %v6197_v5  ;;  %v6205_v17 = vcombine.high %v425_v8, %v429_v9  ;;  %v6204_v27 = vcombine.low %v425_v8, %v429_v9  ;;  %2739 = vmatprep.subr.bf16.mxu1 %v5951_v14  ;;  %v5990_v5 = vcombine.low %v210_v57, %v214_v59 }
  0xe8   :  { %v433_v18 = vld [vmem:[#allocation5 + $0x840] sm:$0xff]  ;;  %v7757_v26 = vpack.c.bf16 %v157_v16, %v150_v15  ;;  %2641 = vmatpush1.bf16.msra.mxu0 %v6196_v13  ;;  %v5998_v13 = vcombine.low %v218_v3, %v222_v4  ;;  %v6007_v15 = vcombine.high %v226_v11, %v230_v12 }
  0xe9   :  { %v437_v22 = vld [vmem:[#allocation5 + $0x860] sm:$0xff]  ;;  %2653 = vmatprep.subr.bf16.mxu0 %v6205_v17  ;;  %2600 = vmatmul.mubr.bf16.vlgmr.msra.gmra.mrb[0].mxu1 %v7755_v21 }
  0xea   :  { %v6213_v29 = vcombine.high %v433_v18, %v437_v22  ;;  %v441_v33 = vld [vmem:[#allocation5 + $0x880] sm:$0xff]  ;;  %2740 = vmatpush1.bf16.msra.mxu1 %v5950_v25  ;;  %v6212_v36 = vcombine.low %v433_v18, %v437_v22  ;;  %2771 = vmatprep.mubr.bf16.mxu1 %v7749_v58  ;;  %v6006_v22 = vcombine.low %v226_v11, %v230_v12 }
  0xeb   :  { %v445_v34 = vld [vmem:[#allocation5 + $0x8a0] sm:$0xff]  ;;  %2643 = vmatmul.mubr.bf16.vlgmr.msra.gmra.mrb[0].mxu0 %v7757_v26  ;;  %2741 = vmatprep.subr.bf16.mxu1 %v5959_v28 }
  0xec   :  { %2654 = vmatpush1.bf16.msra.mxu0 %v6204_v27  ;;  %v449_v38 = vld [vmem:[#allocation5 + $0x8c0] sm:$0xff]  ;;  %v6221_v40 = vcombine.high %v441_v33, %v445_v34  ;;  %2685 = vmatprep.mubr.bf16.mxu0 %v7759_v32  ;;  %v6220_v44 = vcombine.low %v441_v33, %v445_v34 }
  0xed   :  { %v453_v39 = vld [vmem:[#allocation5 + $0x8e0] sm:$0xff]  ;;  %2655 = vmatprep.subr.bf16.mxu0 %v6213_v29  ;;  %v242_v29 = vld [vmem:[#allocation5 + $0x248] sm:$0xff] }
  0xee   :  { %2742 = vmatpush1.bf16.msra.mxu1 %v5958_v35  ;;  %v457_v46 = vld [vmem:[#allocation5 + $0x900] sm:$0xff]  ;;  %v6229_v48 = vcombine.high %v449_v38, %v453_v39  ;;  %v6228_v52 = vcombine.low %v449_v38, %v453_v39  ;;  %v6023_v34 = vcombine.high %v242_v29, %v246_v30  ;;  %v250_v38 = vld [vmem:[#allocation5 + $0x288] sm:$0xff] }
  0xef   :  { %2743 = vmatprep.subr.bf16.mxu1 %v5967_v37  ;;  %v461_v47 = vld [vmem:[#allocation5 + $0x920] sm:$0xff]  ;;  %v254_v39 = vld [vmem:[#allocation5 + $0x2a8] sm:$0xff] }
  0xf0   :  { %2656 = vmatpush1.bf16.msra.mxu0 %v6212_v36  ;;  %v465_v54 = vld [vmem:[#allocation5 + $0x940] sm:$0xff]  ;;  %v6237_v56 = vcombine.high %v457_v46, %v461_v47  ;;  %v6236_v61 = vcombine.low %v457_v46, %v461_v47  ;;  %v6031_v42 = vcombine.high %v250_v38, %v254_v39  ;;  %v258_v46 = vld [vmem:[#allocation5 + $0x2c8] sm:$0xff] }
  0xf1   :  { %2657 = vmatprep.subr.bf16.mxu0 %v6221_v40  ;;  %v469_v55 = vld [vmem:[#allocation5 + $0x960] sm:$0xff]  ;;  %v6022_v40 = vcombine.low %v242_v29, %v246_v30  ;;  %v262_v47 = vld [vmem:[#allocation5 + $0x2e8] sm:$0xff] }
  0xf2   :  { %2744 = vmatpush1.bf16.msra.mxu1 %v5966_v43  ;;  %v473_v63 = vld [vmem:[#allocation5 + $0x980] sm:$0xff]  ;;  %v6245_v2 = vcombine.high %v465_v54, %v469_v55  ;;  %v6244_v6 = vcombine.low %v465_v54, %v469_v55  ;;  %v6039_v50 = vcombine.high %v258_v46, %v262_v47  ;;  %v266_v54 = vld [vmem:[#allocation5 + $0x308] sm:$0xff] }
  0xf3   :  { %2745 = vmatprep.subr.bf16.mxu1 %v5975_v45  ;;  %v477_v1 = vld [vmem:[#allocation5 + $0x9a0] sm:$0xff]  ;;  %v270_v55 = vld [vmem:[#allocation5 + $0x328] sm:$0xff] }
  0xf4   :  { %2658 = vmatpush1.bf16.msra.mxu0 %v6220_v44  ;;  %v481_v8 = vld [vmem:[#allocation5 + $0x9c0] sm:$0xff]  ;;  %v6253_v10 = vcombine.high %v473_v63, %v477_v1  ;;  %v6252_v14 = vcombine.low %v473_v63, %v477_v1  ;;  %v6047_v59 = vcombine.high %v266_v54, %v270_v55  ;;  %v274_v63 = vld [vmem:[#allocation5 + $0x348] sm:$0xff] }
  0xf5   :  { %2659 = vmatprep.subr.bf16.mxu0 %v6229_v48  ;;  %v485_v9 = vld [vmem:[#allocation5 + $0x9e0] sm:$0xff]  ;;  %v6030_v48 = vcombine.low %v250_v38, %v254_v39  ;;  %v278_v1 = vld [vmem:[#allocation5 + $0x368] sm:$0xff] }
  0xf6   :  { %2746 = vmatpush1.bf16.msra.mxu1 %v5974_v51  ;;  %v489_v16 = vld [vmem:[#allocation5 + $0xa00] sm:$0xff]  ;;  %v6261_v18 = vcombine.high %v481_v8, %v485_v9  ;;  %v6260_v23 = vcombine.low %v481_v8, %v485_v9  ;;  %v6055_v4 = vcombine.high %v274_v63, %v278_v1  ;;  %v282_v8 = vld [vmem:[#allocation5 + $0x388] sm:$0xff] }
  0xf7   :  { %2747 = vmatprep.subr.bf16.mxu1 %v5983_v53  ;;  %v493_v17 = vld [vmem:[#allocation5 + $0xa20] sm:$0xff]  ;;  %v286_v9 = vld [vmem:[#allocation5 + $0x3a8] sm:$0xff] }
  0xf8   :  { %2660 = vmatpush1.bf16.msra.mxu0 %v6228_v52  ;;  %v497_v25 = vld [vmem:[#allocation5 + $0xa40] sm:$0xff]  ;;  %v6269_v28 = vcombine.high %v489_v16, %v493_v17  ;;  %v6268_v33 = vcombine.low %v489_v16, %v493_v17  ;;  %v6063_v12 = vcombine.high %v282_v8, %v286_v9  ;;  %v290_v16 = vld [vmem:[#allocation5 + $0x3c8] sm:$0xff] }
  0xf9   :  { %2661 = vmatprep.subr.bf16.mxu0 %v6237_v56  ;;  %v501_v27 = vld [vmem:[#allocation5 + $0xa60] sm:$0xff]  ;;  %v6038_v56 = vcombine.low %v258_v46, %v262_v47  ;;  %v294_v17 = vld [vmem:[#allocation5 + $0x3e8] sm:$0xff] }
  0xfa   :  { %2748 = vmatpush1.bf16.msra.mxu1 %v5982_v60  ;;  %v505_v35 = vld [vmem:[#allocation5 + $0xa80] sm:$0xff]  ;;  %v6277_v37 = vcombine.high %v497_v25, %v501_v27  ;;  %v6276_v41 = vcombine.low %v497_v25, %v501_v27  ;;  %v6071_v20 = vcombine.high %v290_v16, %v294_v17  ;;  %v159_v29 = vld [vmem:[#allocation2 + $0x58] sm:$0xff]  ;;  %v6070_v30 = vcombine.low %v290_v16, %v294_v17 }
  0xfb   :  { %2749 = vmatprep.subr.bf16.mxu1 %v5991_v62  ;;  %v509_v36 = vld [vmem:[#allocation5 + $0xaa0] sm:$0xff]  ;;  %v558_v38 = vld [vmem:[#allocation5 + $0xc28] sm:$0xff] }
  0xfc   :  { %2662 = vmatpush1.bf16.msra.mxu0 %v6236_v61  ;;  %v513_v43 = vld [vmem:[#allocation5 + $0xac0] sm:$0xff]  ;;  %v6285_v45 = vcombine.high %v505_v35, %v509_v36  ;;  %v6284_v49 = vcombine.low %v505_v35, %v509_v36  ;;  %v310_v35 = vld [vmem:[#allocation5 + $0x468] sm:$0xff] }
  0xfd   :  { %2663 = vmatprep.subr.bf16.mxu0 %v6245_v2  ;;  %v517_v44 = vld [vmem:[#allocation5 + $0xae0] sm:$0xff]  ;;  %v6046_v2 = vcombine.low %v266_v54, %v270_v55  ;;  %v330_v55 = vld [vmem:[#allocation5 + $0x508] sm:$0xff] }
  0xfe   :  { %2750 = vmatpush1.bf16.msra.mxu1 %v5990_v5  ;;  %v521_v51 = vld [vmem:[#allocation5 + $0xb00] sm:$0xff]  ;;  %v6293_v53 = vcombine.high %v513_v43, %v517_v44  ;;  %v6292_v57 = vcombine.low %v513_v43, %v517_v44  ;;  %v314_v43 = vld [vmem:[#allocation5 + $0x488] sm:$0xff] }
  0xff   :  { %2751 = vmatprep.subr.bf16.mxu1 %v5999_v7  ;;  %v525_v52 = vld [vmem:[#allocation5 + $0xb20] sm:$0xff]  ;;  %v318_v44 = vld [vmem:[#allocation5 + $0x4a8] sm:$0xff] }
 0x100   :  { %2664 = vmatpush1.bf16.msra.mxu0 %v6244_v6  ;;  %v529_v60 = vld [vmem:[#allocation5 + $0xb40] sm:$0xff]  ;;  %v6301_v62 = vcombine.high %v521_v51, %v525_v52  ;;  %v6300_v3 = vcombine.low %v521_v51, %v525_v52  ;;  %v6095_v47 = vcombine.high %v314_v43, %v318_v44  ;;  %v161_v52 = vld [vmem:[#allocation2 + $0x68] sm:$0xff]  ;;  %v354_v16 = vld [vmem:[#allocation5 + $0x5c8] sm:$0xff] }
 0x101   :  { %2665 = vmatprep.subr.bf16.mxu0 %v6253_v10  ;;  %v533_v61 = vld [vmem:[#allocation5 + $0xb60] sm:$0xff]  ;;  %v6054_v10 = vcombine.low %v274_v63, %v278_v1  ;;  %v358_v17 = vld [vmem:[#allocation5 + $0x5e8] sm:$0xff] }
 0x102   :  { %2752 = vmatpush1.bf16.msra.mxu1 %v5998_v13  ;;  %v537_v5 = vld [vmem:[#allocation5 + $0xb80] sm:$0xff]  ;;  %v6309_v7 = vcombine.high %v529_v60, %v533_v61  ;;  %v6308_v11 = vcombine.low %v529_v60, %v533_v61 }
 0x103   :  { %2753 = vmatprep.subr.bf16.mxu1 %v6007_v15  ;;  %v541_v6 = vld [vmem:[#allocation5 + $0xba0] sm:$0xff] }
 0x104   :  { %2666 = vmatpush1.bf16.msra.mxu0 %v6252_v14  ;;  %v545_v13 = vld [vmem:[#allocation5 + $0xbc0] sm:$0xff]  ;;  %v6317_v15 = vcombine.high %v537_v5, %v541_v6  ;;  %v6316_v19 = vcombine.low %v537_v5, %v541_v6  ;;  %v179_v6 = vld [vmem:[#allocation5 + $0x50] sm:$0xff] }
 0x105   :  { %2667 = vmatprep.subr.bf16.mxu0 %v6261_v18  ;;  %v549_v14 = vld [vmem:[#allocation5 + $0xbe0] sm:$0xff]  ;;  %v6062_v18 = vcombine.low %v282_v8, %v286_v9  ;;  %v346_v8 = vld [vmem:[#allocation5 + $0x588] sm:$0xff] }
 0x106   :  { %2754 = vmatpush1.bf16.msra.mxu1 %v6006_v22  ;;  %v298_v22 = vld [vmem:[#allocation5 + $0x408] sm:$0xff]  ;;  %v553_v25 = vld [vmem:[#allocation5 + $0xc00] sm:$0xff] }
 0x107   :  { %2755 = vmatprep.subr.bf16.mxu1 %v6015_v24  ;;  %v6325_v24 = vcombine.high %v545_v13, %v549_v14  ;;  %v557_v27 = vld [vmem:[#allocation5 + $0xc20] sm:$0xff]  ;;  %v350_v9 = vld [vmem:[#allocation5 + $0x5a8] sm:$0xff] }
 0x108   :  { %2668 = vmatpush1.bf16.msra.mxu0 %v6260_v23  ;;  %v302_v23 = vld [vmem:[#allocation5 + $0x428] sm:$0xff]  ;;  %v6333_v36 = vcombine.high %v553_v25, %v557_v27  ;;  %v154_v51 = vld [vmem:[#allocation2 + $0x30] sm:$0xff] }
 0x109   :  { %2669 = vmatprep.subr.bf16.mxu0 %v6269_v28  ;;  %v152_v28 = vld [vmem:[#allocation2 + $0x20] sm:$0xff]  ;;  %v7771_v60 = vpack.c.bf16 %v161_v52, %v154_v51 }
 0x10a   :  { %2756 = vmatpush1.bf16.msra.mxu1 %v6014_v31  ;;  %v6324_v31 = vcombine.low %v545_v13, %v549_v14  ;;  %v7765_v39 = vpack.c.bf16 %v159_v29, %v152_v28  ;;  %v187_v13 = vld [vmem:[#allocation5 + $0x90] sm:$0xff]  ;;  %v6134_v28 = vcombine.low %v354_v16, %v358_v17 }
 0x10b   :  { %2757 = vmatprep.subr.bf16.mxu1 %v6023_v34  ;;  %v306_v34 = vld [vmem:[#allocation5 + $0x448] sm:$0xff]  ;;  %v191_v14 = vld [vmem:[#allocation5 + $0xb0] sm:$0xff] }
 0x10c   :  { %2670 = vmatpush1.bf16.msra.mxu0 %v6268_v33  ;;  %v6079_v33 = vcombine.high %v298_v22, %v302_v23  ;;  %v6086_v46 = vcombine.low %v306_v34, %v310_v35  ;;  %v5968_v29 = vcombine.low %v187_v13, %v191_v14  ;;  %v223_v51 = vld [vmem:[#allocation5 + $0x1b0] sm:$0xff] }
 0x10d   :  { %2671 = vmatprep.subr.bf16.mxu0 %v6277_v37  ;;  %v554_v37 = vld [vmem:[#allocation5 + $0xc08] sm:$0xff] }
 0x10e   :  { %2758 = vmatpush1.bf16.msra.mxu1 %v6022_v40  ;;  %v6078_v40 = vcombine.low %v298_v22, %v302_v23  ;;  %v195_v22 = vld [vmem:[#allocation5 + $0xd0] sm:$0xff] }
 0x10f   :  { %2759 = vmatprep.subr.bf16.mxu1 %v6031_v42  ;;  %v6332_v42 = vcombine.low %v553_v25, %v557_v27  ;;  %v199_v23 = vld [vmem:[#allocation5 + $0xf0] sm:$0xff]  ;;  %v362_v25 = vld [vmem:[#allocation5 + $0x608] sm:$0xff] }
 0x110   :  { %2672 = vmatpush1.bf16.msra.mxu0 %v6276_v41  ;;  %v6087_v41 = vcombine.high %v306_v34, %v310_v35  ;;  %v366_v27 = vld [vmem:[#allocation5 + $0x628] sm:$0xff]  ;;  %v5977_v34 = vcombine.high %v195_v22, %v199_v23 }
 0x111   :  { %2673 = vmatprep.subr.bf16.mxu0 %v6285_v45  ;;  %v6335_v45 = vcombine.high %v554_v37, %v558_v38  ;;  %v370_v35 = vld [vmem:[#allocation5 + $0x648] sm:$0xff] }
 0x112   :  { %2760 = vmatpush1.bf16.msra.mxu1 %v6030_v48  ;;  %v7586_v48 = vmov 0  }
 0x113   :  { %2761 = vmatprep.subr.bf16.mxu1 %v6039_v50  ;;  %v326_v50 = vld [vmem:[#allocation5 + $0x4e8] sm:$0xff] }
 0x114   :  { %2674 = vmatpush1.bf16.msra.mxu0 %v6284_v49  ;;  %v322_v49 = vld [vmem:[#allocation5 + $0x4c8] sm:$0xff] }
 0x115   :  { %2675 = vmatprep.subr.bf16.mxu0 %v6293_v53  ;;  %v6094_v53 = vcombine.low %v314_v43, %v318_v44  ;;  %v6103_v54 = vcombine.high %v322_v49, %v326_v50  ;;  %v6102_v61 = vcombine.low %v322_v49, %v326_v50  ;;  %v378_v44 = vld [vmem:[#allocation5 + $0x688] sm:$0xff]  ;;  %v219_v50 = vld [vmem:[#allocation5 + $0x190] sm:$0xff] }
 0x116   :  { %2762 = vmatpush1.bf16.msra.mxu1 %v6038_v56  ;;  %v334_v56 = vld [vmem:[#allocation5 + $0x528] sm:$0xff] }
 0x117   :  { %2763 = vmatprep.subr.bf16.mxu1 %v6047_v59  ;;  %v175_v59 = vld [vmem:[#allocation5 + $0x30] sm:$0xff]  ;;  %v6111_v63 = vcombine.high %v330_v55, %v334_v56 }
 0x118   :  { %2676 = vmatpush1.bf16.msra.mxu0 %v6292_v57  ;;  %v171_v57 = vld [vmem:[#allocation5 + $0x10] sm:$0xff] }
 0x119   :  { %2677 = vmatprep.subr.bf16.mxu0 %v6301_v62  ;;  %v6334_v62 = vcombine.low %v554_v37, %v558_v38  ;;  %v5953_v1 = vcombine.high %v171_v57, %v175_v59  ;;  %v6142_v37 = vcombine.low %v362_v25, %v366_v27  ;;  %v5976_v38 = vcombine.low %v195_v22, %v199_v23  ;;  %v251_v22 = vld [vmem:[#allocation5 + $0x290] sm:$0xff] }
 0x11a   :  { %2764 = vmatpush1.bf16.msra.mxu1 %v6046_v2  ;;  %v338_v2 = vld [vmem:[#allocation5 + $0x548] sm:$0xff]  ;;  %v255_v23 = vld [vmem:[#allocation5 + $0x2b0] sm:$0xff] }
 0x11b   :  { %2765 = vmatprep.subr.bf16.mxu1 %v6055_v4  ;;  %v6110_v4 = vcombine.low %v330_v55, %v334_v56 }
 0x11c   :  { %2678 = vmatpush1.bf16.msra.mxu0 %v6300_v3  ;;  %v342_v3 = vld [vmem:[#allocation5 + $0x568] sm:$0xff] }
 0x11d   :  { %2679 = vmatprep.subr.bf16.mxu0 %v6309_v7  ;;  %v6119_v5 = vcombine.high %v338_v2, %v342_v3  ;;  %v183_v7 = vld [vmem:[#allocation5 + $0x70] sm:$0xff] }
 0x11e   :  { %2766 = vmatpush1.bf16.msra.mxu1 %v6054_v10  ;;  %v6118_v10 = vcombine.low %v338_v2, %v342_v3  ;;  %v6000_v3 = vcombine.low %v219_v50, %v223_v51 }
 0x11f   :  { %2767 = vmatprep.subr.bf16.mxu1 %v6063_v12  ;;  %v6127_v12 = vcombine.high %v346_v8, %v350_v9 }
 0x120   :  { %2680 = vmatpush1.bf16.msra.mxu0 %v6308_v11  ;;  %v5952_v11 = vcombine.low %v171_v57, %v175_v59  ;;  %v227_v59 = vld [vmem:[#allocation5 + $0x1d0] sm:$0xff] }
 0x121   :  { %2681 = vmatprep.subr.bf16.mxu0 %v6317_v15  ;;  %v5961_v15 = vcombine.high %v179_v6, %v183_v7 }
 0x122   :  { %2768 = vmatpush1.bf16.msra.mxu1 %v6062_v18  ;;  %v6126_v18 = vcombine.low %v346_v8, %v350_v9  ;;  %v402_v8 = vld [vmem:[#allocation5 + $0x748] sm:$0xff] }
 0x123   :  { %2769 = vmatprep.subr.bf16.mxu1 %v6071_v20  ;;  %v6135_v20 = vcombine.high %v354_v16, %v358_v17  ;;  %v406_v9 = vld [vmem:[#allocation5 + $0x768] sm:$0xff] }
 0x124   :  { %2682 = vmatpush1.bf16.msra.mxu0 %v6316_v19  ;;  %v5960_v19 = vcombine.low %v179_v6, %v183_v7  ;;  %v239_v6 = vld [vmem:[#allocation5 + $0x230] sm:$0xff]  ;;  %v410_v16 = vld [vmem:[#allocation5 + $0x788] sm:$0xff] }
 0x125   :  { %2683 = vmatprep.subr.bf16.mxu0 %v6325_v24  ;;  %v5969_v24 = vcombine.high %v187_v13, %v191_v14  ;;  %v243_v13 = vld [vmem:[#allocation5 + $0x250] sm:$0xff]  ;;  %v414_v17 = vld [vmem:[#allocation5 + $0x7a8] sm:$0xff] }
 0x126   :  { %2770 = vmatpush1.bf16.msra.mxu1 %v6070_v30  ;;  %v6143_v30 = vcombine.high %v362_v25, %v366_v27  ;;  %v247_v14 = vld [vmem:[#allocation5 + $0x270] sm:$0xff]  ;;  %v418_v25 = vld [vmem:[#allocation5 + $0x7c8] sm:$0xff] }
 0x127   :  { %2782 = vmatprep.subr.bf16.mxu1 %v6079_v33  ;;  %v207_v33 = vld [vmem:[#allocation5 + $0x130] sm:$0xff]  ;;  %v422_v27 = vld [vmem:[#allocation5 + $0x7e8] sm:$0xff] }
 0x128   :  { %2684 = vmatpush1.bf16.msra.mxu0 %v6324_v31  ;;  %v203_v31 = vld [vmem:[#allocation5 + $0x110] sm:$0xff] }
 0x129   :  { %2696 = vmatprep.subr.bf16.mxu0 %v6333_v36  ;;  %2772 = vmatmul.mubr.bf16.vlgmr.msra.gmra.mrb[4].mxu1 %v7755_v21  ;;  %v374_v36 = vld [vmem:[#allocation5 + $0x668] sm:$0xff]  ;;  %v5985_v43 = vcombine.high %v203_v31, %v207_v33 }
 0x12a   :  { %2783 = vmatpush1.bf16.msra.mxu1 %v6078_v40  ;;  %2814 = vmatprep.mubr.bf16.mxu1 %v7752_v0  ;;  %v6151_v40 = vcombine.high %v370_v35, %v374_v36 }
 0x12b   :  { %2686 = vmatmul.mubr.bf16.vlgmr.msra.gmra.mrb[0].mxu0 %v7765_v39  ;;  %2784 = vmatprep.subr.bf16.mxu1 %v6087_v41  ;;  %v211_v41 = vld [vmem:[#allocation5 + $0x150] sm:$0xff] }
 0x12c   :  { %2697 = vmatpush1.bf16.msra.mxu0 %v6332_v42  ;;  %2728 = vmatprep.mubr.bf16.mxu0 %v7586_v48  ;;  %v215_v42 = vld [vmem:[#allocation5 + $0x170] sm:$0xff] }
 0x12d   :  { %2868 = vmatprep.subr.bf16.mxu0 %v6335_v45  ;;  %v382_v45 = vld [vmem:[#allocation5 + $0x6a8] sm:$0xff]  ;;  %v5993_v52 = vcombine.high %v211_v41, %v215_v42  ;;  %v5992_v56 = vcombine.low %v211_v41, %v215_v42  ;;  %v267_v41 = vld [vmem:[#allocation5 + $0x310] sm:$0xff] }
 0x12e   :  { %2785 = vmatpush1.bf16.msra.mxu1 %v6086_v46  ;;  %v6150_v46 = vcombine.low %v370_v35, %v374_v36  ;;  %v6159_v49 = vcombine.high %v378_v44, %v382_v45  ;;  %v6158_v55 = vcombine.low %v378_v44, %v382_v45  ;;  %v426_v35 = vld [vmem:[#allocation5 + $0x808] sm:$0xff]  ;;  %v271_v42 = vld [vmem:[#allocation5 + $0x330] sm:$0xff] }
 0x12f   :  { %2786 = vmatprep.subr.bf16.mxu1 %v6095_v47  ;;  %v5984_v47 = vcombine.low %v203_v31, %v207_v33  ;;  %v259_v31 = vld [vmem:[#allocation5 + $0x2d0] sm:$0xff]  ;;  %v430_v36 = vld [vmem:[#allocation5 + $0x828] sm:$0xff] }
 0x130   :  { %v263_v33 = vld [vmem:[#allocation5 + $0x2f0] sm:$0xff]  ;;  %v434_v44 = vld [vmem:[#allocation5 + $0x848] sm:$0xff] }
 0x131   :  { %v438_v45 = vld [vmem:[#allocation5 + $0x868] sm:$0xff] }
 0x132   :  { %2787 = vmatpush1.bf16.msra.mxu1 %v6094_v53  ;;  %v386_v53 = vld [vmem:[#allocation5 + $0x6c8] sm:$0xff] }
 0x133   :  { %2788 = vmatprep.subr.bf16.mxu1 %v6103_v54  ;;  %v390_v54 = vld [vmem:[#allocation5 + $0x6e8] sm:$0xff] }
 0x134   :  { %v6167_v57 = vcombine.high %v386_v53, %v390_v54  ;;  %v6166_v2 = vcombine.low %v386_v53, %v390_v54  ;;  %v442_v53 = vld [vmem:[#allocation5 + $0x888] sm:$0xff] }
 0x135   :  { %v446_v54 = vld [vmem:[#allocation5 + $0x8a8] sm:$0xff] }
 0x136   :  { %2789 = vmatpush1.bf16.msra.mxu1 %v6102_v61  ;;  %v231_v61 = vld [vmem:[#allocation5 + $0x1f0] sm:$0xff] }
 0x137   :  { %6340 = vmatmul.mubr.msk.bf16.vlgmr.msra.gmra.mrb[0].mxu0 %vm2563_vm0, %v7771_v60  ;;  %2790 = vmatprep.subr.bf16.mxu1 %v6111_v63  ;;  %v394_v63 = vld [vmem:[#allocation5 + $0x708] sm:$0xff]  ;;  %v6009_v7 = vcombine.high %v227_v59, %v231_v61 }
 0x138   :  { %2869 = vmatpush1.bf16.msra.mxu0 %v6334_v62  ;;  %2900 = vmatprep.mubr.bf16.mxu0 %v7586_v48  ;;  %v6001_v62 = vcombine.high %v219_v50, %v223_v51  ;;  %v275_v50 = vld [vmem:[#allocation5 + $0x350] sm:$0xff] }
 0x139   :  { %2911 = vmatprep.subr.bf16.mxu0 %v5953_v1  ;;  %v398_v1 = vld [vmem:[#allocation5 + $0x728] sm:$0xff]  ;;  %v279_v51 = vld [vmem:[#allocation5 + $0x370] sm:$0xff] }
 0x13a   :  { %2791 = vmatpush1.bf16.msra.mxu1 %v6110_v4  ;;  %v6175_v4 = vcombine.high %v394_v63, %v398_v1 }
 0x13b   :  { %2792 = vmatprep.subr.bf16.mxu1 %v6119_v5  ;;  %v235_v5 = vld [vmem:[#allocation5 + $0x210] sm:$0xff] }
 0x13e   :  { %2793 = vmatpush1.bf16.msra.mxu1 %v6118_v10  ;;  %v6174_v10 = vcombine.low %v394_v63, %v398_v1  ;;  %v450_v63 = vld [vmem:[#allocation5 + $0x8c8] sm:$0xff] }
 0x13f   :  { %6341 = vmatmul.mubr.msk.bf16.vlgmr.msra.gmra.mrb[4].mxu0 %vm2563_vm0, %v7771_v60  ;;  %2794 = vmatprep.subr.bf16.mxu1 %v6127_v12  ;;  %v6183_v12 = vcombine.high %v402_v8, %v406_v9  ;;  %v454_v1 = vld [vmem:[#allocation5 + $0x8e8] sm:$0xff] }
 0x140   :  { %2912 = vmatpush1.bf16.msra.mxu0 %v5952_v11  ;;  %2943 = vmatprep.mubr.bf16.mxu0 %v7749_v58  ;;  %v6008_v11 = vcombine.low %v227_v59, %v231_v61  ;;  %v283_v59 = vld [vmem:[#allocation5 + $0x390] sm:$0xff] }
 0x141   :  { %2913 = vmatprep.subr.bf16.mxu0 %v5961_v15  ;;  %v6017_v15 = vcombine.high %v235_v5, %v239_v6  ;;  %v287_v61 = vld [vmem:[#allocation5 + $0x3b0] sm:$0xff] }
 0x142   :  { %2795 = vmatpush1.bf16.msra.mxu1 %v6126_v18  ;;  %v6182_v18 = vcombine.low %v402_v8, %v406_v9  ;;  %v458_v8 = vld [vmem:[#allocation5 + $0x908] sm:$0xff] }
 0x143   :  { %2796 = vmatprep.subr.bf16.mxu1 %v6135_v20  ;;  %v6191_v20 = vcombine.high %v410_v16, %v414_v17  ;;  %v462_v9 = vld [vmem:[#allocation5 + $0x928] sm:$0xff] }
 0x144   :  { %2914 = vmatpush1.bf16.msra.mxu0 %v5960_v19  ;;  %v6016_v19 = vcombine.low %v235_v5, %v239_v6  ;;  %v291_v5 = vld [vmem:[#allocation5 + $0x3d0] sm:$0xff] }
 0x145   :  { %2915 = vmatprep.subr.bf16.mxu0 %v5969_v24  ;;  %v6025_v24 = vcombine.high %v243_v13, %v247_v14  ;;  %v295_v6 = vld [vmem:[#allocation5 + $0x3f0] sm:$0xff] }
 0x146   :  { %2797 = vmatpush1.bf16.msra.mxu1 %v6134_v28  ;;  %v6190_v28 = vcombine.low %v410_v16, %v414_v17  ;;  %v466_v16 = vld [vmem:[#allocation5 + $0x948] sm:$0xff] }
 0x147   :  { %2798 = vmatprep.subr.bf16.mxu1 %v6143_v30  ;;  %v6199_v30 = vcombine.high %v418_v25, %v422_v27  ;;  %v470_v17 = vld [vmem:[#allocation5 + $0x968] sm:$0xff] }
 0x148   :  { %2916 = vmatpush1.bf16.msra.mxu0 %v5968_v29  ;;  %v6024_v29 = vcombine.low %v243_v13, %v247_v14  ;;  %v299_v13 = vld [vmem:[#allocation5 + $0x410] sm:$0xff] }
 0x149   :  { %2917 = vmatprep.subr.bf16.mxu0 %v5977_v34  ;;  %v6033_v34 = vcombine.high %v251_v22, %v255_v23  ;;  %v303_v14 = vld [vmem:[#allocation5 + $0x430] sm:$0xff] }
 0x14a   :  { %2799 = vmatpush1.bf16.msra.mxu1 %v6142_v37  ;;  %v6198_v37 = vcombine.low %v418_v25, %v422_v27  ;;  %v474_v25 = vld [vmem:[#allocation5 + $0x988] sm:$0xff] }
 0x14b   :  { %2800 = vmatprep.subr.bf16.mxu1 %v6151_v40  ;;  %v6207_v40 = vcombine.high %v426_v35, %v430_v36  ;;  %v478_v27 = vld [vmem:[#allocation5 + $0x9a8] sm:$0xff] }
 0x14c   :  { %2918 = vmatpush1.bf16.msra.mxu0 %v5976_v38  ;;  %v6032_v38 = vcombine.low %v251_v22, %v255_v23  ;;  %v307_v22 = vld [vmem:[#allocation5 + $0x450] sm:$0xff] }
 0x14d   :  { %2919 = vmatprep.subr.bf16.mxu0 %v5985_v43  ;;  %v6041_v43 = vcombine.high %v259_v31, %v263_v33  ;;  %v311_v23 = vld [vmem:[#allocation5 + $0x470] sm:$0xff] }
 0x14e   :  { %2801 = vmatpush1.bf16.msra.mxu1 %v6150_v46  ;;  %v6206_v46 = vcombine.low %v426_v35, %v430_v36  ;;  %v482_v35 = vld [vmem:[#allocation5 + $0x9c8] sm:$0xff] }
 0x14f   :  { %2802 = vmatprep.subr.bf16.mxu1 %v6159_v49  ;;  %v6215_v49 = vcombine.high %v434_v44, %v438_v45  ;;  %v486_v36 = vld [vmem:[#allocation5 + $0x9e8] sm:$0xff] }
 0x150   :  { %2920 = vmatpush1.bf16.msra.mxu0 %v5984_v47  ;;  %v6040_v47 = vcombine.low %v259_v31, %v263_v33  ;;  %v315_v31 = vld [vmem:[#allocation5 + $0x490] sm:$0xff] }
 0x151   :  { %2921 = vmatprep.subr.bf16.mxu0 %v5993_v52  ;;  %v6049_v52 = vcombine.high %v267_v41, %v271_v42  ;;  %v319_v33 = vld [vmem:[#allocation5 + $0x4b0] sm:$0xff] }
 0x152   :  { %2803 = vmatpush1.bf16.msra.mxu1 %v6158_v55  ;;  %v6214_v55 = vcombine.low %v434_v44, %v438_v45  ;;  %v327_v44 = vld [vmem:[#allocation5 + $0x4f0] sm:$0xff]  ;;  %v6097_v45 = vcombine.high %v315_v31, %v319_v33 }
 0x153   :  { %2804 = vmatprep.subr.bf16.mxu1 %v6167_v57  ;;  %v6223_v57 = vcombine.high %v442_v53, %v446_v54 }
 0x154   :  { %2922 = vmatpush1.bf16.msra.mxu0 %v5992_v56  ;;  %v6048_v56 = vcombine.low %v267_v41, %v271_v42  ;;  %v6088_v41 = vcombine.low %v307_v22, %v311_v23  ;;  %v6263_v42 = vcombine.high %v482_v35, %v486_v36 }
 0x155   :  { %2923 = vmatprep.subr.bf16.mxu0 %v6001_v62  ;;  %v6057_v62 = vcombine.high %v275_v50, %v279_v51 }
 0x156   :  { %2805 = vmatpush1.bf16.msra.mxu1 %v6166_v2  ;;  %v6222_v2 = vcombine.low %v442_v53, %v446_v54  ;;  %v502_v53 = vld [vmem:[#allocation5 + $0xa68] sm:$0xff] }
 0x157   :  { %2806 = vmatprep.subr.bf16.mxu1 %v6175_v4  ;;  %v6231_v4 = vcombine.high %v450_v63, %v454_v1 }
 0x158   :  { %2924 = vmatpush1.bf16.msra.mxu0 %v6000_v3  ;;  %v6056_v3 = vcombine.low %v275_v50, %v279_v51  ;;  %v331_v51 = vld [vmem:[#allocation5 + $0x510] sm:$0xff] }
 0x159   :  { %2925 = vmatprep.subr.bf16.mxu0 %v6009_v7  ;;  %v6065_v7 = vcombine.high %v283_v59, %v287_v61 }
 0x15a   :  { %2807 = vmatpush1.bf16.msra.mxu1 %v6174_v10  ;;  %v6230_v10 = vcombine.low %v450_v63, %v454_v1  ;;  %v506_v63 = vld [vmem:[#allocation5 + $0xa88] sm:$0xff] }
 0x15b   :  { %2808 = vmatprep.subr.bf16.mxu1 %v6183_v12  ;;  %v6239_v12 = vcombine.high %v458_v8, %v462_v9  ;;  %v510_v1 = vld [vmem:[#allocation5 + $0xaa8] sm:$0xff] }
 0x15c   :  { %2926 = vmatpush1.bf16.msra.mxu0 %v6008_v11  ;;  %v6064_v11 = vcombine.low %v283_v59, %v287_v61  ;;  %v339_v59 = vld [vmem:[#allocation5 + $0x550] sm:$0xff] }
 0x15d   :  { %2927 = vmatprep.subr.bf16.mxu0 %v6017_v15  ;;  %v6073_v15 = vcombine.high %v291_v5, %v295_v6  ;;  %v343_v61 = vld [vmem:[#allocation5 + $0x570] sm:$0xff] }
 0x15e   :  { %2809 = vmatpush1.bf16.msra.mxu1 %v6182_v18  ;;  %v6238_v18 = vcombine.low %v458_v8, %v462_v9  ;;  %v514_v8 = vld [vmem:[#allocation5 + $0xac8] sm:$0xff] }
 0x15f   :  { %2810 = vmatprep.subr.bf16.mxu1 %v6191_v20  ;;  %v6247_v20 = vcombine.high %v466_v16, %v470_v17  ;;  %v518_v9 = vld [vmem:[#allocation5 + $0xae8] sm:$0xff] }
 0x160   :  { %2928 = vmatpush1.bf16.msra.mxu0 %v6016_v19  ;;  %v6072_v19 = vcombine.low %v291_v5, %v295_v6  ;;  %v347_v5 = vld [vmem:[#allocation5 + $0x590] sm:$0xff] }
 0x161   :  { %2929 = vmatprep.subr.bf16.mxu0 %v6025_v24  ;;  %v6081_v24 = vcombine.high %v299_v13, %v303_v14  ;;  %v351_v6 = vld [vmem:[#allocation5 + $0x5b0] sm:$0xff] }
 0x162   :  { %2811 = vmatpush1.bf16.msra.mxu1 %v6190_v28  ;;  %v6246_v28 = vcombine.low %v466_v16, %v470_v17  ;;  %v355_v16 = vld [vmem:[#allocation5 + $0x5d0] sm:$0xff] }
 0x163   :  { %2812 = vmatprep.subr.bf16.mxu1 %v6199_v30  ;;  %v6255_v30 = vcombine.high %v474_v25, %v478_v27  ;;  %v359_v17 = vld [vmem:[#allocation5 + $0x5f0] sm:$0xff] }
 0x164   :  { %2930 = vmatpush1.bf16.msra.mxu0 %v6024_v29  ;;  %v6080_v29 = vcombine.low %v299_v13, %v303_v14  ;;  %v522_v13 = vld [vmem:[#allocation5 + $0xb08] sm:$0xff]  ;;  %v6129_v14 = vcombine.high %v347_v5, %v351_v6 }
 0x165   :  { %2931 = vmatprep.subr.bf16.mxu0 %v6033_v34  ;;  %v6089_v34 = vcombine.high %v307_v22, %v311_v23  ;;  %v530_v22 = vld [vmem:[#allocation5 + $0xb48] sm:$0xff] }
 0x166   :  { %2813 = vmatpush1.bf16.msra.mxu1 %v6198_v37  ;;  %v6254_v37 = vcombine.low %v474_v25, %v478_v27  ;;  %v534_v23 = vld [vmem:[#allocation5 + $0xb68] sm:$0xff]  ;;  %v363_v25 = vld [vmem:[#allocation5 + $0x610] sm:$0xff] }
 0x167   :  { %2825 = vmatprep.subr.bf16.mxu1 %v6207_v40  ;;  %v494_v40 = vld [vmem:[#allocation5 + $0xa28] sm:$0xff]  ;;  %v367_v27 = vld [vmem:[#allocation5 + $0x630] sm:$0xff] }
 0x168   :  { %2932 = vmatpush1.bf16.msra.mxu0 %v6032_v38  ;;  %v490_v38 = vld [vmem:[#allocation5 + $0xa08] sm:$0xff] }
 0x169   :  { %2933 = vmatprep.subr.bf16.mxu0 %v6041_v43  ;;  %2815 = vmatmul.mubr.bf16.vlgmr.msra.gmra.mrb[4].mxu1 %v7757_v26  ;;  %v323_v43 = vld [vmem:[#allocation5 + $0x4d0] sm:$0xff]  ;;  %v6271_v50 = vcombine.high %v490_v38, %v494_v40 }
 0x16a   :  { %2826 = vmatpush1.bf16.msra.mxu1 %v6206_v46  ;;  %2857 = vmatprep.mubr.bf16.mxu1 %v7759_v32  ;;  %v6262_v46 = vcombine.low %v482_v35, %v486_v36  ;;  %v6105_v54 = vcombine.high %v323_v43, %v327_v44  ;;  %v371_v35 = vld [vmem:[#allocation5 + $0x650] sm:$0xff] }
 0x16b   :  { %2827 = vmatprep.subr.bf16.mxu1 %v6215_v49  ;;  %v6096_v49 = vcombine.low %v315_v31, %v319_v33  ;;  %v6145_v31 = vcombine.high %v363_v25, %v367_v27  ;;  %v538_v33 = vld [vmem:[#allocation5 + $0xb88] sm:$0xff]  ;;  %v375_v36 = vld [vmem:[#allocation5 + $0x670] sm:$0xff] }
 0x16c   :  { %2934 = vmatpush1.bf16.msra.mxu0 %v6040_v47  ;;  %v498_v47 = vld [vmem:[#allocation5 + $0xa48] sm:$0xff] }
 0x16d   :  { %2935 = vmatprep.subr.bf16.mxu0 %v6049_v52  ;;  %v335_v52 = vld [vmem:[#allocation5 + $0x530] sm:$0xff] }
 0x16e   :  { %2828 = vmatpush1.bf16.msra.mxu1 %v6214_v55  ;;  %v6270_v55 = vcombine.low %v490_v38, %v494_v40  ;;  %v6144_v38 = vcombine.low %v363_v25, %v367_v27  ;;  %v423_v25 = vld [vmem:[#allocation5 + $0x7f0] sm:$0xff] }
 0x16f   :  { %2829 = vmatprep.subr.bf16.mxu1 %v6223_v57  ;;  %v6279_v57 = vcombine.high %v498_v47, %v502_v53 }
 0x170   :  { %2936 = vmatpush1.bf16.msra.mxu0 %v6048_v56  ;;  %v6104_v56 = vcombine.low %v323_v43, %v327_v44  ;;  %v550_v43 = vld [vmem:[#allocation5 + $0xbe8] sm:$0xff]  ;;  %v379_v44 = vld [vmem:[#allocation5 + $0x690] sm:$0xff] }
 0x171   :  { %2937 = vmatprep.subr.bf16.mxu0 %v6057_v62  ;;  %v6113_v62 = vcombine.high %v331_v51, %v335_v52 }
 0x172   :  { %2830 = vmatpush1.bf16.msra.mxu1 %v6222_v2  ;;  %v6278_v2 = vcombine.low %v498_v47, %v502_v53  ;;  %v6152_v47 = vcombine.low %v371_v35, %v375_v36  ;;  %v387_v53 = vld [vmem:[#allocation5 + $0x6d0] sm:$0xff] }
 0x173   :  { %2831 = vmatprep.subr.bf16.mxu1 %v6231_v4  ;;  %v6287_v4 = vcombine.high %v506_v63, %v510_v1 }
 0x174   :  { %2938 = vmatpush1.bf16.msra.mxu0 %v6056_v3  ;;  %v6112_v3 = vcombine.low %v331_v51, %v335_v52  ;;  %v172_v51 = vld [vmem:[#allocation5 + $0x18] sm:$0xff] }
 0x175   :  { %2939 = vmatprep.subr.bf16.mxu0 %v6065_v7  ;;  %v6121_v7 = vcombine.high %v339_v59, %v343_v61  ;;  %v176_v52 = vld [vmem:[#allocation5 + $0x38] sm:$0xff] }
 0x176   :  { %2832 = vmatpush1.bf16.msra.mxu1 %v6230_v10  ;;  %v6286_v10 = vcombine.low %v506_v63, %v510_v1  ;;  %v395_v63 = vld [vmem:[#allocation5 + $0x710] sm:$0xff] }
 0x177   :  { %2833 = vmatprep.subr.bf16.mxu1 %v6239_v12  ;;  %v6295_v12 = vcombine.high %v514_v8, %v518_v9  ;;  %v399_v1 = vld [vmem:[#allocation5 + $0x730] sm:$0xff] }
 0x178   :  { %2940 = vmatpush1.bf16.msra.mxu0 %v6064_v11  ;;  %v6120_v11 = vcombine.low %v339_v59, %v343_v61  ;;  %v180_v61 = vld [vmem:[#allocation5 + $0x58] sm:$0xff] }
 0x179   :  { %2941 = vmatprep.subr.bf16.mxu0 %v6073_v15  ;;  %v526_v15 = vld [vmem:[#allocation5 + $0xb28] sm:$0xff] }
 0x17a   :  { %2834 = vmatpush1.bf16.msra.mxu1 %v6238_v18  ;;  %v6294_v18 = vcombine.low %v514_v8, %v518_v9  ;;  %v403_v8 = vld [vmem:[#allocation5 + $0x750] sm:$0xff] }
 0x17b   :  { %2835 = vmatprep.subr.bf16.mxu1 %v6247_v20  ;;  %v6303_v20 = vcombine.high %v522_v13, %v526_v15  ;;  %v407_v9 = vld [vmem:[#allocation5 + $0x770] sm:$0xff] }
 0x17c   :  { %2942 = vmatpush1.bf16.msra.mxu0 %v6072_v19  ;;  %v6128_v19 = vcombine.low %v347_v5, %v351_v6  ;;  %v6177_v5 = vcombine.high %v395_v63, %v399_v1  ;;  %v188_v6 = vld [vmem:[#allocation5 + $0x98] sm:$0xff] }
 0x17d   :  { %2954 = vmatprep.subr.bf16.mxu0 %v6081_v24  ;;  %v6137_v24 = vcombine.high %v355_v16, %v359_v17 }
 0x17e   :  { %2836 = vmatpush1.bf16.msra.mxu1 %v6246_v28  ;;  %v6302_v28 = vcombine.low %v522_v13, %v526_v15  ;;  %v6185_v13 = vcombine.high %v403_v8, %v407_v9  ;;  %v200_v15 = vld [vmem:[#allocation5 + $0xf8] sm:$0xff] }
 0x17f   :  { %2944 = vmatmul.mubr.bf16.vlgmr.msra.gmra.mrb[8].mxu0 %v7755_v21  ;;  %2837 = vmatprep.subr.bf16.mxu1 %v6255_v30  ;;  %v6311_v30 = vcombine.high %v530_v22, %v534_v23 }
 0x180   :  { %2955 = vmatpush1.bf16.msra.mxu0 %v6080_v29  ;;  %2986 = vmatprep.mubr.bf16.mxu0 %v7752_v0  ;;  %v6136_v29 = vcombine.low %v355_v16, %v359_v17  ;;  %v411_v16 = vld [vmem:[#allocation5 + $0x790] sm:$0xff] }
 0x181   :  { %2956 = vmatprep.subr.bf16.mxu0 %v6089_v34  ;;  %v542_v34 = vld [vmem:[#allocation5 + $0xba8] sm:$0xff]  ;;  %v415_v17 = vld [vmem:[#allocation5 + $0x7b0] sm:$0xff] }
 0x182   :  { %2838 = vmatpush1.bf16.msra.mxu1 %v6254_v37  ;;  %v6310_v37 = vcombine.low %v530_v22, %v534_v23  ;;  %v6319_v40 = vcombine.high %v538_v33, %v542_v34  ;;  %v6193_v22 = vcombine.high %v411_v16, %v415_v17  ;;  %v204_v23 = vld [vmem:[#allocation5 + $0x118] sm:$0xff] }
 0x183   :  { %2839 = vmatprep.subr.bf16.mxu1 %v6263_v42  ;;  %v546_v42 = vld [vmem:[#allocation5 + $0xbc8] sm:$0xff] }
 0x184   :  { %2957 = vmatpush1.bf16.msra.mxu0 %v6088_v41  ;;  %v6153_v41 = vcombine.high %v371_v35, %v375_v36  ;;  %v431_v35 = vld [vmem:[#allocation5 + $0x830] sm:$0xff] }
 0x185   :  { %2958 = vmatprep.subr.bf16.mxu0 %v6097_v45  ;;  %v383_v45 = vld [vmem:[#allocation5 + $0x6b0] sm:$0xff] }
 0x186   :  { %2840 = vmatpush1.bf16.msra.mxu1 %v6262_v46  ;;  %v6318_v46 = vcombine.low %v538_v33, %v542_v34  ;;  %v216_v33 = vld [vmem:[#allocation5 + $0x178] sm:$0xff]  ;;  %v427_v34 = vld [vmem:[#allocation5 + $0x810] sm:$0xff] }
 0x187   :  { %2841 = vmatprep.subr.bf16.mxu1 %v6271_v50  ;;  %v6161_v50 = vcombine.high %v379_v44, %v383_v45 }
 0x188   :  { %2959 = vmatpush1.bf16.msra.mxu0 %v6096_v49  ;;  %v6327_v49 = vcombine.high %v546_v42, %v550_v43 }
 0x189   :  { %2960 = vmatprep.subr.bf16.mxu0 %v6105_v54  ;;  %v391_v54 = vld [vmem:[#allocation5 + $0x6f0] sm:$0xff] }
 0x18a   :  { %2842 = vmatpush1.bf16.msra.mxu1 %v6270_v55  ;;  %v6326_v55 = vcombine.low %v546_v42, %v550_v43  ;;  %v6169_v59 = vcombine.high %v387_v53, %v391_v54  ;;  %v224_v42 = vld [vmem:[#allocation5 + $0x1b8] sm:$0xff]  ;;  %v435_v43 = vld [vmem:[#allocation5 + $0x850] sm:$0xff] }
 0x18b   :  { %2843 = vmatprep.subr.bf16.mxu1 %v6279_v57  ;;  %v5955_v57 = vcombine.high %v172_v51, %v176_v52 }
 0x18c   :  { %2961 = vmatpush1.bf16.msra.mxu0 %v6104_v56  ;;  %v6160_v56 = vcombine.low %v379_v44, %v383_v45  ;;  %v439_v44 = vld [vmem:[#allocation5 + $0x870] sm:$0xff] }
 0x18d   :  { %2962 = vmatprep.subr.bf16.mxu0 %v6113_v62  ;;  %v184_v62 = vld [vmem:[#allocation5 + $0x78] sm:$0xff] }
 0x18e   :  { %2844 = vmatpush1.bf16.msra.mxu1 %v6278_v2  ;;  %v5954_v2 = vcombine.low %v172_v51, %v176_v52  ;;  %v228_v51 = vld [vmem:[#allocation5 + $0x1d8] sm:$0xff] }
 0x18f   :  { %2845 = vmatprep.subr.bf16.mxu1 %v6287_v4  ;;  %v5963_v4 = vcombine.high %v180_v61, %v184_v62  ;;  %v232_v52 = vld [vmem:[#allocation5 + $0x1f8] sm:$0xff] }
 0x190   :  { %2963 = vmatpush1.bf16.msra.mxu0 %v6112_v3  ;;  %v6168_v3 = vcombine.low %v387_v53, %v391_v54  ;;  %v443_v54 = vld [vmem:[#allocation5 + $0x890] sm:$0xff] }
 0x191   :  { %2964 = vmatprep.subr.bf16.mxu0 %v6121_v7  ;;  %v192_v7 = vld [vmem:[#allocation5 + $0xb8] sm:$0xff] }
 0x192   :  { %2846 = vmatpush1.bf16.msra.mxu1 %v6286_v10  ;;  %v5962_v10 = vcombine.low %v180_v61, %v184_v62  ;;  %v6216_v61 = vcombine.low %v435_v43, %v439_v44  ;;  %v6011_v62 = vcombine.high %v228_v51, %v232_v52 }
 0x193   :  { %2847 = vmatprep.subr.bf16.mxu1 %v6295_v12  ;;  %v5971_v12 = vcombine.high %v188_v6, %v192_v7 }
 0x194   :  { %2965 = vmatpush1.bf16.msra.mxu0 %v6120_v11  ;;  %v6176_v11 = vcombine.low %v395_v63, %v399_v1  ;;  %v236_v1 = vld [vmem:[#allocation5 + $0x218] sm:$0xff] }
 0x195   :  { %2966 = vmatprep.subr.bf16.mxu0 %v6129_v14  ;;  %v196_v14 = vld [vmem:[#allocation5 + $0xd8] sm:$0xff] }
 0x196   :  { %2848 = vmatpush1.bf16.msra.mxu1 %v6294_v18  ;;  %v5970_v18 = vcombine.low %v188_v6, %v192_v7  ;;  %v5978_v27 = vcombine.low %v196_v14, %v200_v15 }
 0x197   :  { %2849 = vmatprep.subr.bf16.mxu1 %v6303_v20  ;;  %v5979_v20 = vcombine.high %v196_v14, %v200_v15 }
 0x198   :  { %2967 = vmatpush1.bf16.msra.mxu0 %v6128_v19  ;;  %v6184_v19 = vcombine.low %v403_v8, %v407_v9  ;;  %v244_v9 = vld [vmem:[#allocation5 + $0x258] sm:$0xff] }
 0x199   :  { %2968 = vmatprep.subr.bf16.mxu0 %v6137_v24  ;;  %v419_v24 = vld [vmem:[#allocation5 + $0x7d0] sm:$0xff] }
 0x19a   :  { %2850 = vmatpush1.bf16.msra.mxu1 %v6302_v28  ;;  %v6192_v28 = vcombine.low %v411_v16, %v415_v17  ;;  %v252_v17 = vld [vmem:[#allocation5 + $0x298] sm:$0xff] }
 0x19b   :  { %2851 = vmatprep.subr.bf16.mxu1 %v6311_v30  ;;  %v6201_v30 = vcombine.high %v419_v24, %v423_v25 }
 0x19c   :  { %2969 = vmatpush1.bf16.msra.mxu0 %v6136_v29 }
 0x19d   :  { %2970 = vmatprep.subr.bf16.mxu0 %v6145_v31  ;;  %v212_v31 = vld [vmem:[#allocation5 + $0x158] sm:$0xff] }
 0x19e   :  { %2852 = vmatpush1.bf16.msra.mxu1 %v6310_v37  ;;  %v6200_v37 = vcombine.low %v419_v24, %v423_v25  ;;  %v5994_v45 = vcombine.low %v212_v31, %v216_v33  ;;  %v260_v25 = vld [vmem:[#allocation5 + $0x2d8] sm:$0xff] }
 0x19f   :  { %2853 = vmatprep.subr.bf16.mxu1 %v6319_v40  ;;  %v6209_v40 = vcombine.high %v427_v34, %v431_v35 }
 0x1a0   :  { %2971 = vmatpush1.bf16.msra.mxu0 %v6144_v38  ;;  %v5995_v38 = vcombine.high %v212_v31, %v216_v33 }
 0x1a1   :  { %2972 = vmatprep.subr.bf16.mxu0 %v6153_v41  ;;  %v220_v41 = vld [vmem:[#allocation5 + $0x198] sm:$0xff] }
 0x1a2   :  { %2854 = vmatpush1.bf16.msra.mxu1 %v6318_v46  ;;  %v6208_v46 = vcombine.low %v427_v34, %v431_v35  ;;  %v268_v35 = vld [vmem:[#allocation5 + $0x318] sm:$0xff] }
 0x1a3   :  { %2855 = vmatprep.subr.bf16.mxu1 %v6327_v49 }
 0x1a4   :  { %2973 = vmatpush1.bf16.msra.mxu0 %v6152_v47  ;;  %v6003_v47 = vcombine.high %v220_v41, %v224_v42 }
 0x1a5   :  { %2974 = vmatprep.subr.bf16.mxu0 %v6161_v50  ;;  %v6217_v50 = vcombine.high %v435_v43, %v439_v44  ;;  %v276_v44 = vld [vmem:[#allocation5 + $0x358] sm:$0xff] }
 0x1a6   :  { %2856 = vmatpush1.bf16.msra.mxu1 %v6326_v55  ;;  %v447_v55 = vld [vmem:[#allocation5 + $0x8b0] sm:$0xff] }
 0x1a7   :  { %3083 = vmatprep.subr.bf16.mxu1 %v5955_v57  ;;  %v6002_v57 = vcombine.low %v220_v41, %v224_v42  ;;  %v6225_v63 = vcombine.high %v443_v54, %v447_v55  ;;  %v6224_v6 = vcombine.low %v443_v54, %v447_v55  ;;  %v284_v55 = vld [vmem:[#allocation5 + $0x398] sm:$0xff] }
 0x1a8   :  { %2975 = vmatpush1.bf16.msra.mxu0 %v6160_v56 }
 0x1a9   :  { %2976 = vmatprep.subr.bf16.mxu0 %v6169_v59  ;;  %2858 = vmatmul.mubr.bf16.vlgmr.msra.gmra.mrb[4].mxu1 %v7765_v39 }
 0x1aa   :  { %3084 = vmatpush1.bf16.msra.mxu1 %v5954_v2  ;;  %3115 = vmatprep.mubr.bf16.mxu1 %v7749_v58  ;;  %v208_v58 = vld [vmem:[#allocation5 + $0x138] sm:$0xff] }
 0x1ab   :  { %3085 = vmatprep.subr.bf16.mxu1 %v5963_v4  ;;  %v5987_v29 = vcombine.high %v204_v23, %v208_v58  ;;  %v5986_v36 = vcombine.low %v204_v23, %v208_v58  ;;  %v240_v2 = vld [vmem:[#allocation5 + $0x238] sm:$0xff]  ;;  %v455_v4 = vld [vmem:[#allocation5 + $0x8f0] sm:$0xff] }
 0x1ac   :  { %2977 = vmatpush1.bf16.msra.mxu0 %v6168_v3  ;;  %v451_v3 = vld [vmem:[#allocation5 + $0x8d0] sm:$0xff]  ;;  %v6019_v7 = vcombine.high %v236_v1, %v240_v2 }
 0x1ad   :  { %2978 = vmatprep.subr.bf16.mxu0 %v6177_v5  ;;  %v6010_v5 = vcombine.low %v228_v51, %v232_v52  ;;  %v6233_v8 = vcombine.high %v451_v3, %v455_v4  ;;  %v6232_v14 = vcombine.low %v451_v3, %v455_v4  ;;  %v292_v4 = vld [vmem:[#allocation5 + $0x3d8] sm:$0xff] }
 0x1ae   :  { %3086 = vmatpush1.bf16.msra.mxu1 %v5962_v10  ;;  %v248_v10 = vld [vmem:[#allocation5 + $0x278] sm:$0xff] }
 0x1af   :  { %3087 = vmatprep.subr.bf16.mxu1 %v5971_v12  ;;  %v463_v12 = vld [vmem:[#allocation5 + $0x930] sm:$0xff]  ;;  %v6027_v15 = vcombine.high %v244_v9, %v248_v10 }
 0x1b0   :  { %2979 = vmatpush1.bf16.msra.mxu0 %v6176_v11  ;;  %v459_v11 = vld [vmem:[#allocation5 + $0x910] sm:$0xff] }
 0x1b1   :  { %2980 = vmatprep.subr.bf16.mxu0 %v6185_v13  ;;  %v6018_v13 = vcombine.low %v236_v1, %v240_v2  ;;  %v6241_v16 = vcombine.high %v459_v11, %v463_v12  ;;  %v6240_v23 = vcombine.low %v459_v11, %v463_v12  ;;  %v300_v12 = vld [vmem:[#allocation5 + $0x418] sm:$0xff] }
 0x1b2   :  { %3088 = vmatpush1.bf16.msra.mxu1 %v5970_v18  ;;  %v256_v18 = vld [vmem:[#allocation5 + $0x2b8] sm:$0xff] }
 0x1b3   :  { %3089 = vmatprep.subr.bf16.mxu1 %v5979_v20  ;;  %v471_v20 = vld [vmem:[#allocation5 + $0x970] sm:$0xff]  ;;  %v6035_v58 = vcombine.high %v252_v17, %v256_v18 }
 0x1b4   :  { %2981 = vmatpush1.bf16.msra.mxu0 %v6184_v19  ;;  %v467_v19 = vld [vmem:[#allocation5 + $0x950] sm:$0xff] }
 0x1b5   :  { %2982 = vmatprep.subr.bf16.mxu0 %v6193_v22  ;;  %v6026_v22 = vcombine.low %v244_v9, %v248_v10  ;;  %v6249_v24 = vcombine.high %v467_v19, %v471_v20  ;;  %v6248_v31 = vcombine.low %v467_v19, %v471_v20  ;;  %v308_v20 = vld [vmem:[#allocation5 + $0x458] sm:$0xff] }
 0x1b6   :  { %3090 = vmatpush1.bf16.msra.mxu1 %v5978_v27  ;;  %v264_v27 = vld [vmem:[#allocation5 + $0x2f8] sm:$0xff] }
 0x1b7   :  { %3091 = vmatprep.subr.bf16.mxu1 %v5987_v29  ;;  %v479_v29 = vld [vmem:[#allocation5 + $0x9b0] sm:$0xff]  ;;  %v6043_v33 = vcombine.high %v260_v25, %v264_v27 }
 0x1b8   :  { %2983 = vmatpush1.bf16.msra.mxu0 %v6192_v28  ;;  %v475_v28 = vld [vmem:[#allocation5 + $0x990] sm:$0xff] }
 0x1b9   :  { %2984 = vmatprep.subr.bf16.mxu0 %v6201_v30  ;;  %v6034_v30 = vcombine.low %v252_v17, %v256_v18  ;;  %v6257_v34 = vcombine.high %v475_v28, %v479_v29  ;;  %v6256_v41 = vcombine.low %v475_v28, %v479_v29  ;;  %v316_v29 = vld [vmem:[#allocation5 + $0x498] sm:$0xff] }
 0x1ba   :  { %3092 = vmatpush1.bf16.msra.mxu1 %v5986_v36  ;;  %v272_v36 = vld [vmem:[#allocation5 + $0x338] sm:$0xff] }
 0x1bb   :  { %3093 = vmatprep.subr.bf16.mxu1 %v5995_v38  ;;  %v487_v38 = vld [vmem:[#allocation5 + $0x9f0] sm:$0xff]  ;;  %v6051_v42 = vcombine.high %v268_v35, %v272_v36 }
 0x1bc   :  { %2985 = vmatpush1.bf16.msra.mxu0 %v6200_v37  ;;  %v7785_v49 = vpop.f32.mrb[0].mxu1  ;;  %v483_v37 = vld [vmem:[#allocation5 + $0x9d0] sm:$0xff] }
 0x1bd   :  { %2997 = vmatprep.subr.bf16.mxu0 %v6209_v40  ;;  %v7787_v53 = vpop.f32.mrb[1].mxu1  ;;  %v6042_v40 = vcombine.low %v260_v25, %v264_v27  ;;  %v6265_v43 = vcombine.high %v483_v37, %v487_v38  ;;  %v6264_v51 = vcombine.low %v483_v37, %v487_v38  ;;  %v324_v38 = vld [vmem:[#allocation5 + $0x4d8] sm:$0xff] }
 0x1be   :  { %v7790_v56 = vpop.f32.mrb[2].mxu1  ;;  %3094 = vmatpush1.bf16.msra.mxu1 %v5994_v45  ;;  %v280_v45 = vld [vmem:[#allocation5 + $0x378] sm:$0xff] }
 0x1bf   :  { %2987 = vmatmul.mubr.bf16.vlgmr.msra.gmra.mrb[8].mxu0 %v7757_v26  ;;  %v7792_v59 = vpop.f32.mrb[3].mxu1  ;;  %3095 = vmatprep.subr.bf16.mxu1 %v6003_v47  ;;  %v495_v47 = vld [vmem:[#allocation5 + $0xa30] sm:$0xff]  ;;  %v6059_v52 = vcombine.high %v276_v44, %v280_v45 }
 0x1c0   :  { %2998 = vmatpush1.bf16.msra.mxu0 %v6208_v46  ;;  %3029 = vmatprep.mubr.bf16.mxu0 %v7759_v32  ;;  %v491_v46 = vld [vmem:[#allocation5 + $0xa10] sm:$0xff] }
 0x1c1   :  { %2999 = vmatprep.subr.bf16.mxu0 %v6217_v50  ;;  %v6050_v50 = vcombine.low %v268_v35, %v272_v36  ;;  %v6273_v54 = vcombine.high %v491_v46, %v495_v47  ;;  %v6272_v1 = vcombine.low %v491_v46, %v495_v47  ;;  %v332_v46 = vld [vmem:[#allocation5 + $0x518] sm:$0xff]  ;;  %v547_v47 = vld [vmem:[#allocation5 + $0xbd0] sm:$0xff] }
 0x1c2   :  { %3096 = vmatpush1.bf16.msra.mxu1 %v6002_v57  ;;  %v288_v57 = vld [vmem:[#allocation5 + $0x3b8] sm:$0xff] }
 0x1c3   :  { %3097 = vmatprep.subr.bf16.mxu1 %v6011_v62  ;;  %v503_v62 = vld [vmem:[#allocation5 + $0xa70] sm:$0xff]  ;;  %v6067_v2 = vcombine.high %v284_v55, %v288_v57 }
 0x1c4   :  { %3000 = vmatpush1.bf16.msra.mxu0 %v6216_v61  ;;  %v499_v61 = vld [vmem:[#allocation5 + $0xa50] sm:$0xff] }
 0x1c5   :  { %3001 = vmatprep.subr.bf16.mxu0 %v6225_v63  ;;  %v6058_v63 = vcombine.low %v276_v44, %v280_v45  ;;  %v6281_v3 = vcombine.high %v499_v61, %v503_v62  ;;  %v6280_v9 = vcombine.low %v499_v61, %v503_v62  ;;  %v344_v61 = vld [vmem:[#allocation5 + $0x578] sm:$0xff]  ;;  %v555_v62 = vld [vmem:[#allocation5 + $0xc10] sm:$0xff] }
 0x1c6   :  { %3098 = vmatpush1.bf16.msra.mxu1 %v6010_v5  ;;  %v296_v5 = vld [vmem:[#allocation5 + $0x3f8] sm:$0xff] }
 0x1c7   :  { %3099 = vmatprep.subr.bf16.mxu1 %v6019_v7  ;;  %v511_v7 = vld [vmem:[#allocation5 + $0xab0] sm:$0xff]  ;;  %v6075_v10 = vcombine.high %v292_v4, %v296_v5 }
 0x1c8   :  { %3002 = vmatpush1.bf16.msra.mxu0 %v6224_v6  ;;  %v507_v6 = vld [vmem:[#allocation5 + $0xa90] sm:$0xff] }
 0x1c9   :  { %3003 = vmatprep.subr.bf16.mxu0 %v6233_v8  ;;  %v6066_v8 = vcombine.low %v284_v55, %v288_v57  ;;  %v6289_v11 = vcombine.high %v507_v6, %v511_v7  ;;  %v6288_v17 = vcombine.low %v507_v6, %v511_v7  ;;  %v340_v57 = vld [vmem:[#allocation5 + $0x558] sm:$0xff] }
 0x1ca   :  { %3100 = vmatpush1.bf16.msra.mxu1 %v6018_v13  ;;  %v304_v13 = vld [vmem:[#allocation5 + $0x438] sm:$0xff] }
 0x1cb   :  { %3101 = vmatprep.subr.bf16.mxu1 %v6027_v15  ;;  %v519_v15 = vld [vmem:[#allocation5 + $0xaf0] sm:$0xff]  ;;  %v6083_v18 = vcombine.high %v300_v12, %v304_v13  ;;  %v352_v6 = vld [vmem:[#allocation5 + $0x5b8] sm:$0xff] }
 0x1cc   :  { %3004 = vmatpush1.bf16.msra.mxu0 %v6232_v14  ;;  %v515_v14 = vld [vmem:[#allocation5 + $0xad0] sm:$0xff] }
 0x1cd   :  { %3005 = vmatprep.subr.bf16.mxu0 %v6241_v16  ;;  %v6074_v16 = vcombine.low %v292_v4, %v296_v5  ;;  %v6297_v19 = vcombine.high %v515_v14, %v519_v15  ;;  %v6296_v25 = vcombine.low %v515_v14, %v519_v15  ;;  %v563_v4 = vlaneseq  ;;  %v348_v5 = vld [vmem:[#allocation5 + $0x598] sm:$0xff] }
 0x1ce   :  { %3102 = vmatpush1.bf16.msra.mxu1 %v6026_v22  ;;  %v312_v22 = vld [vmem:[#allocation5 + $0x478] sm:$0xff] }
 0x1cf   :  { %3103 = vmatprep.subr.bf16.mxu1 %v6035_v58  ;;  %v527_v58 = vld [vmem:[#allocation5 + $0xb30] sm:$0xff]  ;;  %v6091_v27 = vcombine.high %v308_v20, %v312_v22  ;;  %v356_v14 = vld [vmem:[#allocation5 + $0x5d8] sm:$0xff] }
 0x1d0   :  { %3006 = vmatpush1.bf16.msra.mxu0 %v6240_v23  ;;  %v523_v23 = vld [vmem:[#allocation5 + $0xb10] sm:$0xff]  ;;  %v360_v15 = vld [vmem:[#allocation5 + $0x5f8] sm:$0xff] }
 0x1d1   :  { %3007 = vmatprep.subr.bf16.mxu0 %v6249_v24  ;;  %v6082_v24 = vcombine.low %v300_v12, %v304_v13  ;;  %v6305_v28 = vcombine.high %v523_v23, %v527_v58  ;;  %v6304_v35 = vcombine.low %v523_v23, %v527_v58  ;;  %v7797_v13 = vshrl.u32 %v563_v4, 7  ;;  %v7804_v23 = vld [vmem:[#allocation7] sm:$0xff] }
 0x1d2   :  { %3104 = vmatpush1.bf16.msra.mxu1 %v6034_v30  ;;  %v320_v30 = vld [vmem:[#allocation5 + $0x4b8] sm:$0xff] }
 0x1d3   :  { %3105 = vmatprep.subr.bf16.mxu1 %v6043_v33  ;;  %v535_v33 = vld [vmem:[#allocation5 + $0xb70] sm:$0xff]  ;;  %v6099_v36 = vcombine.high %v316_v29, %v320_v30  ;;  %v7807_v58 = vsub.s32 1, %v7797_v13 }
 0x1d4   :  { %3008 = vmatpush1.bf16.msra.mxu0 %v6248_v31  ;;  %v531_v31 = vld [vmem:[#allocation5 + $0xb50] sm:$0xff] }
 0x1d5   :  { %3009 = vmatprep.subr.bf16.mxu0 %v6257_v34  ;;  %v6090_v34 = vcombine.low %v308_v20, %v312_v22  ;;  %v6313_v37 = vcombine.high %v531_v31, %v535_v33  ;;  %v364_v20 = vld [vmem:[#allocation5 + $0x618] sm:$0xff] }
 0x1d6   :  { %3106 = vmatpush1.bf16.msra.mxu1 %v6042_v40  ;;  %v328_v40 = vld [vmem:[#allocation5 + $0x4f8] sm:$0xff] }
 0x1d7   :  { %3107 = vmatprep.subr.bf16.mxu1 %v6051_v42  ;;  %v543_v42 = vld [vmem:[#allocation5 + $0xbb0] sm:$0xff]  ;;  %v6107_v44 = vcombine.high %v324_v38, %v328_v40  ;;  %v368_v22 = vld [vmem:[#allocation5 + $0x638] sm:$0xff] }
 0x1d8   :  { %3010 = vmatpush1.bf16.msra.mxu0 %v6256_v41  ;;  %v539_v41 = vld [vmem:[#allocation5 + $0xb90] sm:$0xff] }
 0x1d9   :  { %3011 = vmatprep.subr.bf16.mxu0 %v6265_v43  ;;  %v6098_v43 = vcombine.low %v316_v29, %v320_v30  ;;  %v6321_v45 = vcombine.high %v539_v41, %v543_v42  ;;  %v376_v29 = vld [vmem:[#allocation5 + $0x678] sm:$0xff]  ;;  %v570_v30 = vrot.slane %v7804_v23, %v7807_v58 }
 0x1da   :  { %3108 = vmatpush1.bf16.msra.mxu1 %v6050_v50  ;;  %v551_v50 = vld [vmem:[#allocation5 + $0xbf0] sm:$0xff] }
 0x1db   :  { %3109 = vmatprep.subr.bf16.mxu1 %v6059_v52  ;;  %v6320_v52 = vcombine.low %v539_v41, %v543_v42  ;;  %v6329_v55 = vcombine.high %v547_v47, %v551_v50 }
 0x1dc   :  { %3012 = vmatpush1.bf16.msra.mxu0 %v6264_v51  ;;  %v6106_v51 = vcombine.low %v324_v38, %v328_v40  ;;  %v384_v38 = vld [vmem:[#allocation5 + $0x6b8] sm:$0xff]  ;;  %v2604_v40 = vadd.f32 %v7787_v53, %v570_v30 }
 0x1dd   :  { %3013 = vmatprep.subr.bf16.mxu0 %v6273_v54 }
 0x1de   :  { %3110 = vmatpush1.bf16.msra.mxu1 %v6058_v63  ;;  %v559_v63 = vld [vmem:[#allocation5 + $0xc30] sm:$0xff] }
 0x1df   :  { %3111 = vmatprep.subr.bf16.mxu1 %v6067_v2  ;;  %v6328_v2 = vcombine.low %v547_v47, %v551_v50  ;;  %v6337_v7 = vcombine.high %v555_v62, %v559_v63  ;;  %v6336_v12 = vcombine.low %v555_v62, %v559_v63 }
 0x1e0   :  { %3014 = vmatpush1.bf16.msra.mxu0 %v6272_v1 }
 0x1e1   :  { %3015 = vmatprep.subr.bf16.mxu0 %v6281_v3  ;;  %v6123_v3 = vcombine.high %v340_v57, %v344_v61 }
 0x1e2   :  { %3112 = vmatpush1.bf16.msra.mxu1 %v6066_v8  ;;  %v556_v8 = vld [vmem:[#allocation5 + $0xc18] sm:$0xff] }
 0x1e3   :  { %3113 = vmatprep.subr.bf16.mxu1 %v6075_v10  ;;  %v6122_v10 = vcombine.low %v340_v57, %v344_v61  ;;  %v6830_v61 = vld [vmem:[#allocation8] ss:$16 sps:$4 sm:$0xff]  }
 0x1e4   :  { %3016 = vmatpush1.bf16.msra.mxu0 %v6280_v9  ;;  %v560_v9 = vld [vmem:[#allocation5 + $0xc38] sm:$0xff] }
 0x1e5   :  { %3017 = vmatprep.subr.bf16.mxu0 %v6289_v11  ;;  %v6131_v11 = vcombine.high %v348_v5, %v352_v6 }
 0x1e6   :  { %3114 = vmatpush1.bf16.msra.mxu1 %v6074_v16  ;;  %v6339_v16 = vcombine.high %v556_v8, %v560_v9 }
 0x1e7   :  { %3126 = vmatprep.subr.bf16.mxu1 %v6083_v18  ;;  %v6139_v18 = vcombine.high %v356_v14, %v360_v15 }
 0x1e8   :  { %3018 = vmatpush1.bf16.msra.mxu0 %v6288_v17  ;;  %v6130_v17 = vcombine.low %v348_v5, %v352_v6 }
 0x1e9   :  { %3019 = vmatprep.subr.bf16.mxu0 %v6297_v19  ;;  %3116 = vmatmul.mubr.bf16.vlgmr.msra.gmra.mrb[8].mxu1 %v7755_v21  ;;  %v6312_v21 = vcombine.low %v531_v31, %v535_v33  ;;  %v7801_v19 = vsub.s32 0, %v7797_v13  ;;  %v6146_v31 = vcombine.low %v364_v20, %v368_v22  ;;  %v6338_v33 = vcombine.low %v556_v8, %v560_v9 }
 0x1ea   :  { %3127 = vmatpush1.bf16.msra.mxu1 %v6082_v24  ;;  %3158 = vmatprep.mubr.bf16.mxu1 %v7752_v0  ;;  %v336_v0 = vld [vmem:[#allocation5 + $0x538] sm:$0xff]  ;;  %v6138_v24 = vcombine.low %v356_v14, %v360_v15 }
 0x1eb   :  { %3128 = vmatprep.subr.bf16.mxu1 %v6091_v27  ;;  %v6115_v54 = vcombine.high %v332_v46, %v336_v0  ;;  %v6114_v1 = vcombine.low %v332_v46, %v336_v0  ;;  %v566_v27 = vrot.slane %v7804_v23, %v7801_v19  ;;  %v6838_v15 = vld [vmem:[#allocation8 + $0x44] ss:$16 sps:$4 sm:$0xff]  }
 0x1ec   :  { %3020 = vmatpush1.bf16.msra.mxu0 %v6296_v25  ;;  %v6147_v25 = vcombine.high %v364_v20, %v368_v22  ;;  %v6836_v20 = vld [vmem:[#allocation8 + $0x40] ss:$16 sps:$4 sm:$0xff]  }
 0x1ed   :  { %3021 = vmatprep.subr.bf16.mxu0 %v6305_v28  ;;  %v372_v28 = vld [vmem:[#allocation5 + $0x658] sm:$0xff]  ;;  %v2606_v42 = vadd.f32 %v7790_v56, %v566_v27 }
 0x1ee   :  { %3129 = vmatpush1.bf16.msra.mxu1 %v6090_v34  ;;  %v6155_v34 = vcombine.high %v372_v28, %v376_v29  ;;  %v388_v56 = vld [vmem:[#allocation5 + $0x6d8] sm:$0xff] }
 0x1ef   :  { %3130 = vmatprep.subr.bf16.mxu1 %v6099_v36  ;;  %v6832_v36 = vld [vmem:[#allocation8 + $0x4] ss:$16 sps:$4 sm:$0xff]  }
 0x1f0   :  { %3022 = vmatpush1.bf16.msra.mxu0 %v6304_v35  ;;  %v2602_v35 = vadd.f32 %v7785_v49, %v566_v27  ;;  %v416_v27 = vld [vmem:[#allocation5 + $0x7b8] sm:$0xff] }
 0x1f1   :  { %3023 = vmatprep.subr.bf16.mxu0 %v6313_v37  ;;  %v380_v37 = vld [vmem:[#allocation5 + $0x698] sm:$0xff] }
 0x1f2   :  { %3131 = vmatpush1.bf16.msra.mxu1 %v6098_v43  ;;  %v6163_v49 = vcombine.high %v380_v37, %v384_v38 }
 0x1f3   :  { %3132 = vmatprep.subr.bf16.mxu1 %v6107_v44  ;;  %v6154_v44 = vcombine.low %v372_v28, %v376_v29  ;;  %v6839_v29 = vld [vmem:[#allocation8 + $0x60] ss:$16 sps:$4 sm:$0xff]  }
 0x1f4   :  { %3024 = vmatpush1.bf16.msra.mxu0 %v6312_v21 }
 0x1f5   :  { %3025 = vmatprep.subr.bf16.mxu0 %v6321_v45  ;;  %v2608_v45 = vadd.f32 %v7792_v59, %v570_v30  ;;  %v6162_v59 = vcombine.low %v380_v37, %v384_v38  ;;  %v6847_v38 = vld [vmem:[#allocation8 + $0xa4] ss:$16 sps:$4 sm:$0xff]  }
 0x1f6   :  { %3133 = vmatpush1.bf16.msra.mxu1 %v6106_v51  ;;  %v392_v51 = vld [vmem:[#allocation5 + $0x6f8] sm:$0xff] }
 0x1f7   :  { %3134 = vmatprep.subr.bf16.mxu1 %v6115_v54  ;;  %v6171_v62 = vcombine.high %v388_v56, %v392_v51  ;;  %v6170_v9 = vcombine.low %v388_v56, %v392_v51  ;;  %v448_v56 = vld [vmem:[#allocation5 + $0x8b8] sm:$0xff] }
 0x1f8   :  { %3026 = vmatpush1.bf16.msra.mxu0 %v6320_v52 }
 0x1f9   :  { %3027 = vmatprep.subr.bf16.mxu0 %v6329_v55 }
 0x1fa   :  { %3135 = vmatpush1.bf16.msra.mxu1 %v6114_v1 }
 0x1fb   :  { %3136 = vmatprep.subr.bf16.mxu1 %v6123_v3  ;;  %v400_v3 = vld [vmem:[#allocation5 + $0x738] sm:$0xff] }
 0x1fc   :  { %3028 = vmatpush1.bf16.msra.mxu0 %v6328_v2  ;;  %v6835_v2 = vld [vmem:[#allocation8 + $0x24] ss:$16 sps:$4 sm:$0xff]  }
 0x1fd   :  { %3040 = vmatprep.subr.bf16.mxu0 %v6337_v7 }
 0x1fe   :  { %3137 = vmatpush1.bf16.msra.mxu1 %v6122_v10 }
 0x1ff   :  { %3030 = vmatmul.mubr.bf16.vlgmr.msra.gmra.mrb[8].mxu0 %v7765_v39  ;;  %3138 = vmatprep.subr.bf16.mxu1 %v6131_v11  ;;  %v6833_v11 = vld [vmem:[#allocation8 + $0x20] ss:$16 sps:$4 sm:$0xff]  }
 0x200   :  { %3041 = vmatpush1.bf16.msra.mxu0 %v6336_v12  ;;  %3072 = vmatprep.mubr.bf16.mxu0 %v7586_v48 }
 0x201   :  { %3212 = vmatprep.subr.bf16.mxu0 %v6339_v16  ;;  %v404_v16 = vld [vmem:[#allocation5 + $0x758] sm:$0xff] }
 0x202   :  { %3139 = vmatpush1.bf16.msra.mxu1 %v6130_v17  ;;  %v408_v17 = vld [vmem:[#allocation5 + $0x778] sm:$0xff] }
 0x203   :  { %3140 = vmatprep.subr.bf16.mxu1 %v6139_v18  ;;  %v6187_v22 = vcombine.high %v404_v16, %v408_v17  ;;  %v6186_v28 = vcombine.low %v404_v16, %v408_v17  ;;  %v6865_v16 = vld [vmem:[#allocation8 + $0x164] ss:$16 sps:$4 sm:$0xff]  }
 0x204   :  { %v476_v17 = vld [vmem:[#allocation5 + $0x998] sm:$0xff] }
 0x206   :  { %3141 = vmatpush1.bf16.msra.mxu1 %v6138_v24  ;;  %v6841_v24 = vld [vmem:[#allocation8 + $0x64] ss:$16 sps:$4 sm:$0xff]  }
 0x207   :  { %3142 = vmatprep.subr.bf16.mxu1 %v6147_v25  ;;  %v412_v25 = vld [vmem:[#allocation5 + $0x798] sm:$0xff] }
 0x208   :  { %v6195_v30 = vcombine.high %v412_v25, %v416_v27 }
 0x20a   :  { %v2730_v41 = vpop.f32.mrb[0].mxu0  ;;  %3143 = vmatpush1.bf16.msra.mxu1 %v6146_v31  ;;  %v6844_v31 = vld [vmem:[#allocation8 + $0x84] ss:$16 sps:$4 sm:$0xff]  }
 0x20b   :  { %v6706_v43 = vadd.f32 %v2730_v41, %v2602_v35  ;;  %6342 = vmatmul.mubr.msk.bf16.vlgmr.msra.gmra.mrb[8].mxu0 %vm2563_vm0, %v7771_v60  ;;  %v2732_v21 = vpop.f32.mrb[1].mxu0  ;;  %3144 = vmatprep.subr.bf16.mxu1 %v6155_v34  ;;  %v424_v34 = vld [vmem:[#allocation5 + $0x7f8] sm:$0xff]  ;;  %v6194_v35 = vcombine.low %v412_v25, %v416_v27 }
 0x20c   :  { %v6708_v46 = vadd.f32 %v2732_v21, %v2604_v40  ;;  %v2734_v0 = vpop.f32.mrb[2].mxu0  ;;  %3213 = vmatpush1.bf16.msra.mxu0 %v6338_v33  ;;  %3244 = vmatprep.mubr.bf16.mxu0 %v7586_v48  ;;  %v396_v48 = vld [vmem:[#allocation5 + $0x718] sm:$0xff] }
 0x20d   :  { %v3271_v47 = vmul.f32 0.2, %v6706_v43  ;;  %v6710_v50 = vadd.f32 %v2734_v0, %v2606_v42  ;;  %v2736_v53 = vpop.f32.mrb[3].mxu0  ;;  %4869 = vmatprep.subr.bf16.mxu0 %v6832_v36  ;;  %vm3255_vm1 = vcmp.gt.f32.partialorder %v6706_v43, 0.0  ;;  %v6179_v12 = vcombine.high %v396_v48, %v400_v3  ;;  %v420_v33 = vld [vmem:[#allocation5 + $0x7d8] sm:$0xff] }
 0x20e   :  { %v3272_v52 = vmul.f32 0.2, %v6708_v46  ;;  %v6712_v54 = vadd.f32 %v2736_v53, %v2608_v45  ;;  %vm3256_vm2 = vcmp.gt.f32.partialorder %v6708_v46, 0.0  ;;  %3145 = vmatpush1.bf16.msra.mxu1 %v6154_v44  ;;  %v6842_v36 = vld [vmem:[#allocation8 + $0x80] ss:$16 sps:$4 sm:$0xff]   ;;  %v6203_v37 = vcombine.high %v420_v33, %v424_v34 }
 0x20f   :  { %vm3263_vm3 = vcmp.gt.f32.partialorder %v6710_v50, 0.0  ;;  %v3279_v55 = vmul.f32 0.2, %v6710_v50  ;;  %3146 = vmatprep.subr.bf16.mxu1 %v6163_v49  ;;  %v3287_v63 = vsel %vm3255_vm1, %v6706_v43, %v3271_v47  ;;  %v428_v40 = vld [vmem:[#allocation5 + $0x818] sm:$0xff]  ;;  %v6202_v42 = vcombine.low %v420_v33, %v424_v34 }
 0x210   :  { %vm3264_vm4 = vcmp.gt.f32.partialorder %v6712_v54, 0.0  ;;  %v3280_v57 = vmul.f32 0.2, %v6712_v54  ;;  %v3288_v5 = vsel %vm3256_vm2, %v6708_v46, %v3272_v52  ;;  %v432_v41 = vld [vmem:[#allocation5 + $0x838] sm:$0xff] }
 0x211   :  { %v3295_v1 = vsel %vm3263_vm3, %v6710_v50, %v3279_v55  ;;  %v6845_v43 = vld [vmem:[#allocation8 + $0xa0] ss:$16 sps:$4 sm:$0xff]   ;;  %v6211_v21 = vcombine.high %v428_v40, %v432_v41  ;;  %v6850_v44 = vld [vmem:[#allocation8 + $0xc4] ss:$16 sps:$4 sm:$0xff]   ;;  %v6210_v0 = vcombine.low %v428_v40, %v432_v41 }
 0x212   :  { %v7820_v4 = vpack.c.bf16 %v3295_v1, %v3287_v63  ;;  %v3296_v6 = vsel %vm3264_vm4, %v6712_v54, %v3280_v57  ;;  %v7823_v7 = vpop.f32.mrb[4].mxu0  ;;  %3147 = vmatpush1.bf16.msra.mxu1 %v6162_v59  ;;  %v436_v45 = vld [vmem:[#allocation5 + $0x858] sm:$0xff] }
 0x213   :  { %6343 = vmatmul.mubr.msk.bf16.vlgmr.msra.gmra.mrb[12].mxu0 %vm2563_vm0, %v7771_v60  ;;  %v7827_v8 = vpack.c.bf16 %v3296_v6, %v3288_v5  ;;  %v7829_v10 = vpop.f32.mrb[5].mxu0  ;;  %3148 = vmatprep.subr.bf16.mxu1 %v6171_v62  ;;  %v6178_v60 = vcombine.low %v396_v48, %v400_v3  ;;  %v440_v46 = vld [vmem:[#allocation5 + $0x878] sm:$0xff] }
 0x214   :  { %4870 = vmatpush1.bf16.msra.mxu0 %v6830_v61  ;;  %v7831_v14 = vpop.f32.mrb[6].mxu0  ;;  %v6848_v49 = vld [vmem:[#allocation8 + $0xc0] ss:$16 sps:$4 sm:$0xff]   ;;  %v6219_v47 = vcombine.high %v436_v45, %v440_v46  ;;  %v6853_v50 = vld [vmem:[#allocation8 + $0xe4] ss:$16 sps:$4 sm:$0xff]   ;;  %v6218_v51 = vcombine.low %v436_v45, %v440_v46 }
 0x215   :  { %4871 = vmatprep.subr.bf16.mxu0 %v6835_v2  ;;  %4901 = vmatprep.mubr.bf16.mxu0 %v7827_v8  ;;  %v7834_v18 = vpop.f32.mrb[7].mxu0  ;;  %v444_v53 = vld [vmem:[#allocation5 + $0x898] sm:$0xff] }
 0x216   :  { %3149 = vmatpush1.bf16.msra.mxu1 %v6170_v9  ;;  %v6851_v52 = vld [vmem:[#allocation8 + $0xe0] ss:$16 sps:$4 sm:$0xff]   ;;  %v6227_v54 = vcombine.high %v444_v53, %v448_v56  ;;  %v6856_v55 = vld [vmem:[#allocation8 + $0x104] ss:$16 sps:$4 sm:$0xff]   ;;  %v6226_v61 = vcombine.low %v444_v53, %v448_v56 }
 0x217   :  { %3150 = vmatprep.subr.bf16.mxu1 %v6179_v12  ;;  %v452_v59 = vld [vmem:[#allocation5 + $0x8d8] sm:$0xff] }
 0x218   :  { %4872 = vmatpush1.bf16.msra.mxu0 %v6833_v11  ;;  %v456_v57 = vld [vmem:[#allocation5 + $0x8f8] sm:$0xff] }
 0x219   :  { %4873 = vmatprep.subr.bf16.mxu0 %v6838_v15  ;;  %v6854_v62 = vld [vmem:[#allocation8 + $0x100] ss:$16 sps:$4 sm:$0xff]   ;;  %v6235_v63 = vcombine.high %v452_v59, %v456_v57  ;;  %v6862_v5 = vld [vmem:[#allocation8 + $0x144] ss:$16 sps:$4 sm:$0xff]  }
 0x21a   :  { %3151 = vmatpush1.bf16.msra.mxu1 %v6178_v60  ;;  %v460_v1 = vld [vmem:[#allocation5 + $0x918] sm:$0xff] }
 0x21b   :  { %3152 = vmatprep.subr.bf16.mxu1 %v6187_v22  ;;  %v464_v2 = vld [vmem:[#allocation5 + $0x938] sm:$0xff] }
 0x21c   :  { %4874 = vmatpush1.bf16.msra.mxu0 %v6836_v20  ;;  %v6857_v48 = vld [vmem:[#allocation8 + $0x120] ss:$16 sps:$4 sm:$0xff]   ;;  %v6243_v3 = vcombine.high %v460_v1, %v464_v2  ;;  %v6242_v11 = vcombine.low %v460_v1, %v464_v2  ;;  %v6868_v25 = vld [vmem:[#allocation8 + $0x184] ss:$16 sps:$4 sm:$0xff]  }
 0x21d   :  { %4875 = vmatprep.subr.bf16.mxu0 %v6841_v24  ;;  %v468_v6 = vld [vmem:[#allocation5 + $0x958] sm:$0xff] }
 0x21e   :  { %3153 = vmatpush1.bf16.msra.mxu1 %v6186_v28  ;;  %v472_v9 = vld [vmem:[#allocation5 + $0x978] sm:$0xff] }
 0x21f   :  { %3154 = vmatprep.subr.bf16.mxu1 %v6195_v30  ;;  %v6860_v12 = vld [vmem:[#allocation8 + $0x140] ss:$16 sps:$4 sm:$0xff]   ;;  %v6251_v15 = vcombine.high %v468_v6, %v472_v9  ;;  %v6250_v20 = vcombine.low %v468_v6, %v472_v9  ;;  %v6871_v33 = vld [vmem:[#allocation8 + $0x1a4] ss:$16 sps:$4 sm:$0xff]  }
 0x220   :  { %4876 = vmatpush1.bf16.msra.mxu0 %v6839_v29  ;;  %v480_v60 = vld [vmem:[#allocation5 + $0x9b8] sm:$0xff] }
 0x221   :  { %4877 = vmatprep.subr.bf16.mxu0 %v6844_v31  ;;  %v6863_v22 = vld [vmem:[#allocation8 + $0x160] ss:$16 sps:$4 sm:$0xff]   ;;  %v6259_v24 = vcombine.high %v476_v17, %v480_v60  ;;  %v6258_v29 = vcombine.low %v476_v17, %v480_v60  ;;  %v6874_v40 = vld [vmem:[#allocation8 + $0x1c4] ss:$16 sps:$4 sm:$0xff]  }
 0x222   :  { %3155 = vmatpush1.bf16.msra.mxu1 %v6194_v35  ;;  %v484_v27 = vld [vmem:[#allocation5 + $0x9d8] sm:$0xff] }
 0x223   :  { %3156 = vmatprep.subr.bf16.mxu1 %v6203_v37  ;;  %v488_v28 = vld [vmem:[#allocation5 + $0x9f8] sm:$0xff] }
 0x224   :  { %4878 = vmatpush1.bf16.msra.mxu0 %v6842_v36  ;;  %v6866_v30 = vld [vmem:[#allocation8 + $0x180] ss:$16 sps:$4 sm:$0xff]   ;;  %v6267_v31 = vcombine.high %v484_v27, %v488_v28  ;;  %v6266_v36 = vcombine.low %v484_v27, %v488_v28  ;;  %v6877_v45 = vld [vmem:[#allocation8 + $0x1e4] ss:$16 sps:$4 sm:$0xff]  }
 0x225   :  { %4879 = vmatprep.subr.bf16.mxu0 %v6847_v38  ;;  %v492_v34 = vld [vmem:[#allocation5 + $0xa18] sm:$0xff] }
 0x226   :  { %3157 = vmatpush1.bf16.msra.mxu1 %v6202_v42  ;;  %v496_v35 = vld [vmem:[#allocation5 + $0xa38] sm:$0xff] }
 0x227   :  { %3169 = vmatprep.subr.bf16.mxu1 %v6211_v21  ;;  %v6869_v37 = vld [vmem:[#allocation8 + $0x1a0] ss:$16 sps:$4 sm:$0xff]   ;;  %v6275_v38 = vcombine.high %v492_v34, %v496_v35  ;;  %v6880_v53 = vld [vmem:[#allocation8 + $0x204] ss:$16 sps:$4 sm:$0xff]  }
 0x228   :  { %4880 = vmatpush1.bf16.msra.mxu0 %v6845_v43  ;;  %v500_v41 = vld [vmem:[#allocation5 + $0xa58] sm:$0xff]  ;;  %v6274_v43 = vcombine.low %v492_v34, %v496_v35  ;;  %v6907_v35 = vld [vmem:[#allocation8 + $0x2c] ss:$16 sps:$4 sm:$0xff]  }
 0x229   :  { %4881 = vmatprep.subr.bf16.mxu0 %v6850_v44  ;;  %3159 = vmatmul.mubr.bf16.vlgmr.msra.gmra.mrb[8].mxu1 %v7757_v26  ;;  %v6859_v26 = vld [vmem:[#allocation8 + $0x124] ss:$16 sps:$4 sm:$0xff]   ;;  %v6872_v21 = vld [vmem:[#allocation8 + $0x1c0] ss:$16 sps:$4 sm:$0xff]  }
 0x22a   :  { %3170 = vmatpush1.bf16.msra.mxu1 %v6210_v0  ;;  %3201 = vmatprep.mubr.bf16.mxu1 %v7759_v32  ;;  %v6234_v32 = vcombine.low %v452_v59, %v456_v57  ;;  %v504_v42 = vld [vmem:[#allocation5 + $0xa78] sm:$0xff] }
 0x22b   :  { %3171 = vmatprep.subr.bf16.mxu1 %v6219_v47  ;;  %v6283_v44 = vcombine.high %v500_v41, %v504_v42  ;;  %v508_v46 = vld [vmem:[#allocation5 + $0xa98] sm:$0xff] }
 0x22c   :  { %4882 = vmatpush1.bf16.msra.mxu0 %v6848_v49  ;;  %v512_v0 = vld [vmem:[#allocation5 + $0xab8] sm:$0xff]  ;;  %v6282_v49 = vcombine.low %v500_v41, %v504_v42  ;;  %v6911_v42 = vld [vmem:[#allocation8 + $0x48] ss:$16 sps:$4 sm:$0xff]  }
 0x22d   :  { %4883 = vmatprep.subr.bf16.mxu0 %v6853_v50  ;;  %v6875_v47 = vld [vmem:[#allocation8 + $0x1e0] ss:$16 sps:$4 sm:$0xff]   ;;  %v6291_v50 = vcombine.high %v508_v46, %v512_v0  ;;  %v6883_v59 = vld [vmem:[#allocation8 + $0x224] ss:$16 sps:$4 sm:$0xff]  }
 0x22e   :  { %3172 = vmatpush1.bf16.msra.mxu1 %v6218_v51  ;;  %v516_v56 = vld [vmem:[#allocation5 + $0xad8] sm:$0xff] }
 0x22f   :  { %3173 = vmatprep.subr.bf16.mxu1 %v6227_v54  ;;  %v520_v51 = vld [vmem:[#allocation5 + $0xaf8] sm:$0xff] }
 0x230   :  { %4884 = vmatpush1.bf16.msra.mxu0 %v6851_v52  ;;  %v6290_v52 = vcombine.low %v508_v46, %v512_v0  ;;  %v6878_v54 = vld [vmem:[#allocation8 + $0x200] ss:$16 sps:$4 sm:$0xff]   ;;  %v6886_v1 = vld [vmem:[#allocation8 + $0x244] ss:$16 sps:$4 sm:$0xff]   ;;  %v573_v0 = vsub.s32 2, %v7797_v13 }
 0x231   :  { %4885 = vmatprep.subr.bf16.mxu0 %v6856_v55  ;;  %v6299_v55 = vcombine.high %v516_v56, %v520_v51  ;;  %v524_v57 = vld [vmem:[#allocation5 + $0xb18] sm:$0xff] }
 0x232   :  { %3174 = vmatpush1.bf16.msra.mxu1 %v6226_v61  ;;  %v528_v61 = vld [vmem:[#allocation5 + $0xb38] sm:$0xff] }
 0x233   :  { %3175 = vmatprep.subr.bf16.mxu1 %v6235_v63  ;;  %v6881_v63 = vld [vmem:[#allocation8 + $0x220] ss:$16 sps:$4 sm:$0xff]   ;;  %v6889_v6 = vld [vmem:[#allocation8 + $0x264] ss:$16 sps:$4 sm:$0xff]  }
 0x234   :  { %4886 = vmatpush1.bf16.msra.mxu0 %v6854_v62  ;;  %v6298_v62 = vcombine.low %v516_v56, %v520_v51  ;;  %v532_v2 = vld [vmem:[#allocation5 + $0xb58] sm:$0xff]  ;;  %v574_v51 = vrot.slane %v7804_v23, %v573_v0 }
 0x235   :  { %4887 = vmatprep.subr.bf16.mxu0 %v6859_v26  ;;  %v6307_v26 = vcombine.high %v524_v57, %v528_v61  ;;  %v540_v9 = vld [vmem:[#allocation5 + $0xb98] sm:$0xff] }
 0x236   :  { %3176 = vmatpush1.bf16.msra.mxu1 %v6234_v32  ;;  %v536_v32 = vld [vmem:[#allocation5 + $0xb78] sm:$0xff] }
 0x237   :  { %3177 = vmatprep.subr.bf16.mxu1 %v6243_v3  ;;  %v6884_v3 = vld [vmem:[#allocation8 + $0x240] ss:$16 sps:$4 sm:$0xff]   ;;  %v6892_v17 = vld [vmem:[#allocation8 + $0x284] ss:$16 sps:$4 sm:$0xff]  }
 0x238   :  { %4888 = vmatpush1.bf16.msra.mxu0 %v6857_v48  ;;  %v6306_v48 = vcombine.low %v524_v57, %v528_v61  ;;  %v548_v60 = vld [vmem:[#allocation5 + $0xbd8] sm:$0xff] }
 0x239   :  { %4889 = vmatprep.subr.bf16.mxu0 %v6862_v5  ;;  %v6315_v5 = vcombine.high %v532_v2, %v536_v32  ;;  %v6895_v27 = vld [vmem:[#allocation8 + $0x2a4] ss:$16 sps:$4 sm:$0xff]   ;;  %v6896_v34 = vld [vmem:[#allocation8 + $0x2c0] ss:$16 sps:$4 sm:$0xff]  }
 0x23a   :  { %3178 = vmatpush1.bf16.msra.mxu1 %v6242_v11  ;;  %v544_v11 = vld [vmem:[#allocation5 + $0xbb8] sm:$0xff] }
 0x23b   :  { %3179 = vmatprep.subr.bf16.mxu1 %v6251_v15  ;;  %v6887_v15 = vld [vmem:[#allocation8 + $0x260] ss:$16 sps:$4 sm:$0xff]   ;;  %v6910_v41 = vld [vmem:[#allocation8 + $0x304] ss:$16 sps:$4 sm:$0xff]  }
 0x23c   :  { %4890 = vmatpush1.bf16.msra.mxu0 %v6860_v12  ;;  %v6314_v12 = vcombine.low %v532_v2, %v536_v32  ;;  %v6922_v46 = vld [vmem:[#allocation8 + $0x344] ss:$16 sps:$4 sm:$0xff]   ;;  %v6935_v2 = vld [vmem:[#allocation8 + $0xc8] ss:$16 sps:$4 sm:$0xff]  }
 0x23d   :  { %4891 = vmatprep.subr.bf16.mxu0 %v6865_v16  ;;  %v6323_v16 = vcombine.high %v540_v9, %v544_v11  ;;  %v6928_v56 = vld [vmem:[#allocation8 + $0x364] ss:$16 sps:$4 sm:$0xff]  }
 0x23e   :  { %3180 = vmatpush1.bf16.msra.mxu1 %v6250_v20  ;;  %v552_v20 = vld [vmem:[#allocation5 + $0xbf8] sm:$0xff] }
 0x23f   :  { %3181 = vmatprep.subr.bf16.mxu1 %v6259_v24  ;;  %v6890_v24 = vld [vmem:[#allocation8 + $0x280] ss:$16 sps:$4 sm:$0xff]   ;;  %v6330_v28 = vcombine.low %v548_v60, %v552_v20  ;;  %v6934_v61 = vld [vmem:[#allocation8 + $0x384] ss:$16 sps:$4 sm:$0xff]  }
 0x240   :  { %4892 = vmatpush1.bf16.msra.mxu0 %v6863_v22  ;;  %v6322_v22 = vcombine.low %v540_v9, %v544_v11  ;;  %v6940_v11 = vld [vmem:[#allocation8 + $0x3a4] ss:$16 sps:$4 sm:$0xff]  }
 0x241   :  { %4893 = vmatprep.subr.bf16.mxu0 %v6868_v25  ;;  %v6331_v25 = vcombine.high %v548_v60, %v552_v20 }
 0x242   :  { %3182 = vmatpush1.bf16.msra.mxu1 %v6258_v29  ;;  %v6893_v29 = vld [vmem:[#allocation8 + $0x2a0] ss:$16 sps:$4 sm:$0xff]  }
 0x243   :  { %3183 = vmatprep.subr.bf16.mxu1 %v6267_v31  ;;  %v6898_v31 = vld [vmem:[#allocation8 + $0x2c4] ss:$16 sps:$4 sm:$0xff]  }
 0x244   :  { %4894 = vmatpush1.bf16.msra.mxu0 %v6866_v30  ;;  %v6901_v30 = vld [vmem:[#allocation8 + $0xc] ss:$16 sps:$4 sm:$0xff]  }
 0x245   :  { %4895 = vmatprep.subr.bf16.mxu0 %v6871_v33  ;;  %v6899_v33 = vld [vmem:[#allocation8 + $0x8] ss:$16 sps:$4 sm:$0xff]  }
 0x246   :  { %3184 = vmatpush1.bf16.msra.mxu1 %v6266_v36  ;;  %v6904_v36 = vld [vmem:[#allocation8 + $0x2e4] ss:$16 sps:$4 sm:$0xff]  }
 0x247   :  { %3185 = vmatprep.subr.bf16.mxu1 %v6275_v38  ;;  %v6902_v38 = vld [vmem:[#allocation8 + $0x2e0] ss:$16 sps:$4 sm:$0xff]  }
 0x248   :  { %4896 = vmatpush1.bf16.msra.mxu0 %v6869_v37  ;;  %v6905_v37 = vld [vmem:[#allocation8 + $0x28] ss:$16 sps:$4 sm:$0xff]  }
 0x249   :  { %4897 = vmatprep.subr.bf16.mxu0 %v6874_v40  ;;  %v6913_v40 = vld [vmem:[#allocation8 + $0x4c] ss:$16 sps:$4 sm:$0xff]  }
 0x24a   :  { %3186 = vmatpush1.bf16.msra.mxu1 %v6274_v43  ;;  %v6908_v43 = vld [vmem:[#allocation8 + $0x300] ss:$16 sps:$4 sm:$0xff]  }
 0x24b   :  { %3187 = vmatprep.subr.bf16.mxu1 %v6283_v44  ;;  %v6916_v44 = vld [vmem:[#allocation8 + $0x324] ss:$16 sps:$4 sm:$0xff]  }
 0x24c   :  { %4898 = vmatpush1.bf16.msra.mxu0 %v6872_v21  ;;  %v6919_v21 = vld [vmem:[#allocation8 + $0x6c] ss:$16 sps:$4 sm:$0xff]  }
 0x24d   :  { %4899 = vmatprep.subr.bf16.mxu0 %v6877_v45  ;;  %v6914_v45 = vld [vmem:[#allocation8 + $0x320] ss:$16 sps:$4 sm:$0xff]  }
 0x24e   :  { %3188 = vmatpush1.bf16.msra.mxu1 %v6282_v49  ;;  %v6923_v49 = vld [vmem:[#allocation8 + $0x88] ss:$16 sps:$4 sm:$0xff]  }
 0x24f   :  { %3189 = vmatprep.subr.bf16.mxu1 %v6291_v50  ;;  %v6920_v50 = vld [vmem:[#allocation8 + $0x340] ss:$16 sps:$4 sm:$0xff]  }
 0x250   :  { %4900 = vmatpush1.bf16.msra.mxu0 %v6875_v47  ;;  %v577_v47 = vsub.s32 3, %v7797_v13 }
 0x251   :  { %4912 = vmatprep.subr.bf16.mxu0 %v6880_v53  ;;  %v6931_v53 = vld [vmem:[#allocation8 + $0xac] ss:$16 sps:$4 sm:$0xff]  }
 0x252   :  { %3190 = vmatpush1.bf16.msra.mxu1 %v6290_v52  ;;  %v578_v52 = vrot.slane %v7804_v23, %v577_v47  ;;  %v6932_v23 = vld [vmem:[#allocation8 + $0x380] ss:$16 sps:$4 sm:$0xff]  }
 0x253   :  { %4902 = vmatmul.mubr.bf16.vlgmr.msra.gmra.mrb[16].mxu0 %v7820_v4  ;;  %3191 = vmatprep.subr.bf16.mxu1 %v6299_v55  ;;  %v6926_v55 = vld [vmem:[#allocation8 + $0x360] ss:$16 sps:$4 sm:$0xff]  }
 0x254   :  { %4913 = vmatpush1.bf16.msra.mxu0 %v6878_v54  ;;  %v6929_v54 = vld [vmem:[#allocation8 + $0xa8] ss:$16 sps:$4 sm:$0xff]  }
 0x255   :  { %4914 = vmatprep.subr.bf16.mxu0 %v6883_v59  ;;  %v6937_v59 = vld [vmem:[#allocation8 + $0xcc] ss:$16 sps:$4 sm:$0xff]  }
 0x256   :  { %3192 = vmatpush1.bf16.msra.mxu1 %v6298_v62 }
 0x257   :  { %3193 = vmatprep.subr.bf16.mxu1 %v6307_v26 }
 0x258   :  { %4915 = vmatpush1.bf16.msra.mxu0 %v6881_v63 }
 0x259   :  { %4916 = vmatprep.subr.bf16.mxu0 %v6886_v1 }
 0x25a   :  { %3194 = vmatpush1.bf16.msra.mxu1 %v6306_v48 }
 0x25b   :  { %3195 = vmatprep.subr.bf16.mxu1 %v6315_v5  ;;  %v6943_v5 = vld [vmem:[#allocation8 + $0xec] ss:$16 sps:$4 sm:$0xff]  }
 0x25c   :  { %4917 = vmatpush1.bf16.msra.mxu0 %v6884_v3 }
 0x25d   :  { %4918 = vmatprep.subr.bf16.mxu0 %v6889_v6 }
 0x25e   :  { %3196 = vmatpush1.bf16.msra.mxu1 %v6314_v12 }
 0x25f   :  { %3197 = vmatprep.subr.bf16.mxu1 %v6323_v16  ;;  %v6938_v16 = vld [vmem:[#allocation8 + $0x3a0] ss:$16 sps:$4 sm:$0xff]  }
 0x260   :  { %4919 = vmatpush1.bf16.msra.mxu0 %v6887_v15 }
 0x261   :  { %4920 = vmatprep.subr.bf16.mxu0 %v6892_v17 }
 0x262   :  { %3198 = vmatpush1.bf16.msra.mxu1 %v6322_v22  ;;  %v6949_v22 = vld [vmem:[#allocation8 + $0x10c] ss:$16 sps:$4 sm:$0xff]  }
 0x263   :  { %3199 = vmatprep.subr.bf16.mxu1 %v6331_v25 }
 0x264   :  { %4921 = vmatpush1.bf16.msra.mxu0 %v6890_v24  ;;  %v6946_v24 = vld [vmem:[#allocation8 + $0x3c4] ss:$16 sps:$4 sm:$0xff]  }
 0x265   :  { %4922 = vmatprep.subr.bf16.mxu0 %v6895_v27 }
 0x266   :  { %3200 = vmatpush1.bf16.msra.mxu1 %v6330_v28 }
 0x267   :  { %5041 = vmatprep.subr.bf16.mxu1 %v6901_v30 }
 0x268   :  { %4923 = vmatpush1.bf16.msra.mxu0 %v6893_v29  ;;  %v6947_v29 = vld [vmem:[#allocation8 + $0x108] ss:$16 sps:$4 sm:$0xff]  }
 0x269   :  { %4924 = vmatprep.subr.bf16.mxu0 %v6898_v31  ;;  %3202 = vmatmul.mubr.bf16.vlgmr.msra.gmra.mrb[8].mxu1 %v7765_v39  ;;  %v6917_v39 = vld [vmem:[#allocation8 + $0x68] ss:$16 sps:$4 sm:$0xff]  }
 0x26a   :  { %5042 = vmatpush1.bf16.msra.mxu1 %v6899_v33  ;;  %5073 = vmatprep.mubr.bf16.mxu1 %v7827_v8  ;;  %v6925_v8 = vld [vmem:[#allocation8 + $0x8c] ss:$16 sps:$4 sm:$0xff]  }
 0x26b   :  { %5043 = vmatprep.subr.bf16.mxu1 %v6907_v35  ;;  %v6955_v33 = vld [vmem:[#allocation8 + $0x12c] ss:$16 sps:$4 sm:$0xff]   ;;  %v6953_v35 = vld [vmem:[#allocation8 + $0x128] ss:$16 sps:$4 sm:$0xff]  }
 0x26c   :  { %4925 = vmatpush1.bf16.msra.mxu0 %v6896_v34  ;;  %v6952_v34 = vld [vmem:[#allocation8 + $0x3e4] ss:$16 sps:$4 sm:$0xff]  }
 0x26d   :  { %4926 = vmatprep.subr.bf16.mxu0 %v6904_v36  ;;  %v6950_v36 = vld [vmem:[#allocation8 + $0x3e0] ss:$16 sps:$4 sm:$0xff]  }
 0x26e   :  { %5044 = vmatpush1.bf16.msra.mxu1 %v6905_v37  ;;  %v6958_v37 = vld [vmem:[#allocation8 + $0x14c] ss:$16 sps:$4 sm:$0xff]  }
 0x26f   :  { %5045 = vmatprep.subr.bf16.mxu1 %v6913_v40  ;;  %v6956_v40 = vld [vmem:[#allocation8 + $0x148] ss:$16 sps:$4 sm:$0xff]  }
 0x270   :  { %4927 = vmatpush1.bf16.msra.mxu0 %v6902_v38  ;;  %v6976_v38 = vld [vmem:[#allocation8 + $0x404] ss:$16 sps:$4 sm:$0xff]  }
 0x271   :  { %4928 = vmatprep.subr.bf16.mxu0 %v6910_v41  ;;  %v6961_v41 = vld [vmem:[#allocation8 + $0x16c] ss:$16 sps:$4 sm:$0xff]  }
 0x272   :  { %5046 = vmatpush1.bf16.msra.mxu1 %v6911_v42  ;;  %v6974_v42 = vld [vmem:[#allocation8 + $0x400] ss:$16 sps:$4 sm:$0xff]  }
 0x273   :  { %5047 = vmatprep.subr.bf16.mxu1 %v6919_v21  ;;  %v6959_v21 = vld [vmem:[#allocation8 + $0x168] ss:$16 sps:$4 sm:$0xff]  }
 0x274   :  { %4929 = vmatpush1.bf16.msra.mxu0 %v6908_v43  ;;  %v6982_v43 = vld [vmem:[#allocation8 + $0x424] ss:$16 sps:$4 sm:$0xff]  }
 0x275   :  { %4930 = vmatprep.subr.bf16.mxu0 %v6916_v44  ;;  %v6964_v44 = vld [vmem:[#allocation8 + $0x18c] ss:$16 sps:$4 sm:$0xff]  }
 0x276   :  { %5048 = vmatpush1.bf16.msra.mxu1 %v6917_v39  ;;  %v6980_v39 = vld [vmem:[#allocation8 + $0x420] ss:$16 sps:$4 sm:$0xff]  }
 0x277   :  { %5049 = vmatprep.subr.bf16.mxu1 %v6925_v8  ;;  %v6962_v8 = vld [vmem:[#allocation8 + $0x188] ss:$16 sps:$4 sm:$0xff]  }
 0x278   :  { %4931 = vmatpush1.bf16.msra.mxu0 %v6914_v45  ;;  %v6988_v45 = vld [vmem:[#allocation8 + $0x444] ss:$16 sps:$4 sm:$0xff]  }
 0x279   :  { %4932 = vmatprep.subr.bf16.mxu0 %v6922_v46  ;;  %v6967_v46 = vld [vmem:[#allocation8 + $0x1ac] ss:$16 sps:$4 sm:$0xff]  }
 0x27a   :  { %5050 = vmatpush1.bf16.msra.mxu1 %v6923_v49  ;;  %v6986_v49 = vld [vmem:[#allocation8 + $0x440] ss:$16 sps:$4 sm:$0xff]  }
 0x27b   :  { %5051 = vmatprep.subr.bf16.mxu1 %v6931_v53  ;;  %v6965_v53 = vld [vmem:[#allocation8 + $0x1a8] ss:$16 sps:$4 sm:$0xff]  }
 0x27c   :  { %4933 = vmatpush1.bf16.msra.mxu0 %v6920_v50  ;;  %v2859_v57 = vpop.f32.mrb[4].mxu1  ;;  %v6994_v50 = vld [vmem:[#allocation8 + $0x464] ss:$16 sps:$4 sm:$0xff]  }
 0x27d   :  { %4934 = vmatprep.subr.bf16.mxu0 %v6928_v56  ;;  %v6713_v62 = vadd.f32 %v2859_v57, %v574_v51  ;;  %v2861_v63 = vpop.f32.mrb[5].mxu1  ;;  %v6970_v56 = vld [vmem:[#allocation8 + $0x1cc] ss:$16 sps:$4 sm:$0xff]   ;;  %v7006_v57 = vld [vmem:[#allocation8 + $0x4a4] ss:$16 sps:$4 sm:$0xff]  }
 0x27e   :  { %v6715_v26 = vadd.f32 %v2861_v63, %v578_v52  ;;  %v2863_v1 = vpop.f32.mrb[6].mxu1  ;;  %5052 = vmatpush1.bf16.msra.mxu1 %v6929_v54  ;;  %v6968_v54 = vld [vmem:[#allocation8 + $0x1c8] ss:$16 sps:$4 sm:$0xff]   ;;  %v7004_v63 = vld [vmem:[#allocation8 + $0x4a0] ss:$16 sps:$4 sm:$0xff]  }
 0x27f   :  { %v6714_v32 = vadd.f32 %v6713_v62, %v7823_v7  ;;  %v6717_v48 = vadd.f32 %v2863_v1, %v574_v51  ;;  %v2865_v3 = vpop.f32.mrb[7].mxu1  ;;  %5053 = vmatprep.subr.bf16.mxu1 %v6937_v59  ;;  %v6941_v7 = vld [vmem:[#allocation8 + $0xe8] ss:$16 sps:$4 sm:$0xff]   ;;  %v6992_v51 = vld [vmem:[#allocation8 + $0x460] ss:$16 sps:$4 sm:$0xff]  }
 0x280   :  { %4935 = vmatpush1.bf16.msra.mxu0 %v6926_v55  ;;  %v6716_v6 = vadd.f32 %v6715_v26, %v7829_v10  ;;  %v6719_v9 = vadd.f32 %v2865_v3, %v578_v52  ;;  %v7000_v52 = vld [vmem:[#allocation8 + $0x484] ss:$16 sps:$4 sm:$0xff]   ;;  %v6973_v55 = vld [vmem:[#allocation8 + $0x1ec] ss:$16 sps:$4 sm:$0xff]   ;;  %v6998_v59 = vld [vmem:[#allocation8 + $0x480] ss:$16 sps:$4 sm:$0xff]  }
 0x281   :  { %4936 = vmatprep.subr.bf16.mxu0 %v6934_v61  ;;  %v3273_v12 = vmul.f32 0.2, %v6714_v32  ;;  %v6718_v15 = vadd.f32 %v6717_v48, %v7831_v14  ;;  %vm3257_vm5 = vcmp.gt.f32.partialorder %v6714_v32, 0.0  ;;  %v6971_v61 = vld [vmem:[#allocation8 + $0x1e8] ss:$16 sps:$4 sm:$0xff]  }
 0x282   :  { %v3274_v17 = vmul.f32 0.2, %v6716_v6  ;;  %v6720_v60 = vadd.f32 %v6719_v9, %v7834_v18  ;;  %5054 = vmatpush1.bf16.msra.mxu1 %v6935_v2  ;;  %vm3258_vm6 = vcmp.gt.f32.partialorder %v6716_v6, 0.0  ;;  %v6944_v18 = vld [vmem:[#allocation8 + $0x3c0] ss:$16 sps:$4 sm:$0xff]  }
 0x283   :  { %vm3265_vm7 = vcmp.gt.f32.partialorder %v6718_v15, 0.0  ;;  %v3281_v20 = vmul.f32 0.2, %v6718_v15  ;;  %5055 = vmatprep.subr.bf16.mxu1 %v6943_v5  ;;  %v3289_v25 = vsel %vm3257_vm5, %v6714_v32, %v3273_v12  ;;  %v6979_v62 = vld [vmem:[#allocation8 + $0x20c] ss:$16 sps:$4 sm:$0xff]  }
 0x284   :  { %4937 = vmatpush1.bf16.msra.mxu0 %v6932_v23  ;;  %vm3266_vm8 = vcmp.gt.f32.partialorder %v6720_v60, 0.0  ;;  %v3282_v10 = vmul.f32 0.2, %v6720_v60  ;;  %v3290_v14 = vsel %vm3258_vm6, %v6716_v6, %v3274_v17  ;;  %v7012_v26 = vld [vmem:[#allocation8 + $0x4c4] ss:$16 sps:$4 sm:$0xff]  }
 0x285   :  { %4938 = vmatprep.subr.bf16.mxu0 %v6940_v11  ;;  %v3297_v27 = vsel %vm3265_vm7, %v6718_v15, %v3281_v20  ;;  %v6977_v1 = vld [vmem:[#allocation8 + $0x208] ss:$16 sps:$4 sm:$0xff]   ;;  %v6985_v2 = vld [vmem:[#allocation8 + $0x22c] ss:$16 sps:$4 sm:$0xff]   ;;  %v7010_v32 = vld [vmem:[#allocation8 + $0x4c0] ss:$16 sps:$4 sm:$0xff]  }
 0x286   :  { %5056 = vmatpush1.bf16.msra.mxu1 %v6941_v7  ;;  %v3298_v28 = vsel %vm3266_vm8, %v6720_v60, %v3282_v10  ;;  %v7853_v30 = vpack.c.bf16 %v3297_v27, %v3289_v25  ;;  %v7018_v48 = vld [vmem:[#allocation8 + $0x4e4] ss:$16 sps:$4 sm:$0xff]   ;;  %v6983_v3 = vld [vmem:[#allocation8 + $0x228] ss:$16 sps:$4 sm:$0xff]   ;;  %v6991_v23 = vld [vmem:[#allocation8 + $0x24c] ss:$16 sps:$4 sm:$0xff]  }
 0x287   :  { %v7855_v31 = vpack.c.bf16 %v3298_v28, %v3290_v14  ;;  %5057 = vmatprep.subr.bf16.mxu1 %v6949_v22  ;;  %v7016_v5 = vld [vmem:[#allocation8 + $0x4e0] ss:$16 sps:$4 sm:$0xff]   ;;  %v7024_v6 = vld [vmem:[#allocation8 + $0x504] ss:$16 sps:$4 sm:$0xff]   ;;  %v6989_v9 = vld [vmem:[#allocation8 + $0x248] ss:$16 sps:$4 sm:$0xff]  }
 0x288   :  { %4939 = vmatpush1.bf16.msra.mxu0 %v6938_v16  ;;  %v6997_v11 = vld [vmem:[#allocation8 + $0x26c] ss:$16 sps:$4 sm:$0xff]   ;;  %v7022_v12 = vld [vmem:[#allocation8 + $0x500] ss:$16 sps:$4 sm:$0xff]   ;;  %v7030_v15 = vld [vmem:[#allocation8 + $0x524] ss:$16 sps:$4 sm:$0xff]  }
 0x289   :  { %4940 = vmatprep.subr.bf16.mxu0 %v6946_v24  ;;  %4944 = vmatprep.mubr.bf16.mxu0 %v7855_v31  ;;  %v7003_v16 = vld [vmem:[#allocation8 + $0x28c] ss:$16 sps:$4 sm:$0xff]   ;;  %v7028_v17 = vld [vmem:[#allocation8 + $0x520] ss:$16 sps:$4 sm:$0xff]   ;;  %v7036_v60 = vld [vmem:[#allocation8 + $0x544] ss:$16 sps:$4 sm:$0xff]  }
 0x28a   :  { %5058 = vmatpush1.bf16.msra.mxu1 %v6947_v29  ;;  %v7001_v7 = vld [vmem:[#allocation8 + $0x288] ss:$16 sps:$4 sm:$0xff]   ;;  %v7009_v20 = vld [vmem:[#allocation8 + $0x2ac] ss:$16 sps:$4 sm:$0xff]   ;;  %v7034_v22 = vld [vmem:[#allocation8 + $0x540] ss:$16 sps:$4 sm:$0xff]  }
 0x28b   :  { %5059 = vmatprep.subr.bf16.mxu1 %v6955_v33  ;;  %v7042_v10 = vld [vmem:[#allocation8 + $0x564] ss:$16 sps:$4 sm:$0xff]   ;;  %v7007_v24 = vld [vmem:[#allocation8 + $0x2a8] ss:$16 sps:$4 sm:$0xff]   ;;  %v7015_v25 = vld [vmem:[#allocation8 + $0x2cc] ss:$16 sps:$4 sm:$0xff]  }
 0x28c   :  { %4941 = vmatpush1.bf16.msra.mxu0 %v6944_v18  ;;  %v7040_v27 = vld [vmem:[#allocation8 + $0x560] ss:$16 sps:$4 sm:$0xff]   ;;  %v7048_v14 = vld [vmem:[#allocation8 + $0x584] ss:$16 sps:$4 sm:$0xff]   ;;  %v7013_v28 = vld [vmem:[#allocation8 + $0x2c8] ss:$16 sps:$4 sm:$0xff]  }
 0x28d   :  { %4942 = vmatprep.subr.bf16.mxu0 %v6952_v34  ;;  %v7021_v29 = vld [vmem:[#allocation8 + $0x2ec] ss:$16 sps:$4 sm:$0xff]   ;;  %v7046_v18 = vld [vmem:[#allocation8 + $0x580] ss:$16 sps:$4 sm:$0xff]   ;;  %v7019_v33 = vld [vmem:[#allocation8 + $0x2e8] ss:$16 sps:$4 sm:$0xff]  }
 0x28e   :  { %5060 = vmatpush1.bf16.msra.mxu1 %v6953_v35  ;;  %v7027_v34 = vld [vmem:[#allocation8 + $0x30c] ss:$16 sps:$4 sm:$0xff]   ;;  %v7052_v35 = vld [vmem:[#allocation8 + $0x5a0] ss:$16 sps:$4 sm:$0xff]  }
 0x28f   :  { %5061 = vmatprep.subr.bf16.mxu1 %v6958_v37  ;;  %v7025_v37 = vld [vmem:[#allocation8 + $0x308] ss:$16 sps:$4 sm:$0xff]  }
 0x290   :  { %4943 = vmatpush1.bf16.msra.mxu0 %v6950_v36  ;;  %v7060_v36 = vld [vmem:[#allocation8 + $0x5c4] ss:$16 sps:$4 sm:$0xff]  }
 0x291   :  { %4955 = vmatprep.subr.bf16.mxu0 %v6976_v38  ;;  %v7033_v38 = vld [vmem:[#allocation8 + $0x32c] ss:$16 sps:$4 sm:$0xff]  }
 0x292   :  { %5062 = vmatpush1.bf16.msra.mxu1 %v6956_v40  ;;  %v7058_v40 = vld [vmem:[#allocation8 + $0x5c0] ss:$16 sps:$4 sm:$0xff]  }
 0x293   :  { %4945 = vmatmul.mubr.bf16.vlgmr.msra.gmra.mrb[16].mxu0 %v7853_v30  ;;  %5063 = vmatprep.subr.bf16.mxu1 %v6961_v41  ;;  %v7066_v41 = vld [vmem:[#allocation8 + $0x5e4] ss:$16 sps:$4 sm:$0xff]  }
 0x294   :  { %4956 = vmatpush1.bf16.msra.mxu0 %v6974_v42  ;;  %v7031_v42 = vld [vmem:[#allocation8 + $0x328] ss:$16 sps:$4 sm:$0xff]  }
 0x295   :  { %4957 = vmatprep.subr.bf16.mxu0 %v6982_v43  ;;  %v7039_v43 = vld [vmem:[#allocation8 + $0x34c] ss:$16 sps:$4 sm:$0xff]  }
 0x296   :  { %5064 = vmatpush1.bf16.msra.mxu1 %v6959_v21  ;;  %v7064_v21 = vld [vmem:[#allocation8 + $0x5e0] ss:$16 sps:$4 sm:$0xff]  }
 0x297   :  { %5065 = vmatprep.subr.bf16.mxu1 %v6964_v44  ;;  %v7099_v44 = vld [vmem:[#allocation8 + $0x604] ss:$16 sps:$4 sm:$0xff]  }
 0x298   :  { %4958 = vmatpush1.bf16.msra.mxu0 %v6980_v39  ;;  %v7037_v39 = vld [vmem:[#allocation8 + $0x348] ss:$16 sps:$4 sm:$0xff]  }
 0x299   :  { %4959 = vmatprep.subr.bf16.mxu0 %v6988_v45  ;;  %v7045_v45 = vld [vmem:[#allocation8 + $0x36c] ss:$16 sps:$4 sm:$0xff]  }
 0x29a   :  { %5066 = vmatpush1.bf16.msra.mxu1 %v6962_v8  ;;  %v7043_v8 = vld [vmem:[#allocation8 + $0x368] ss:$16 sps:$4 sm:$0xff]  }
 0x29b   :  { %5067 = vmatprep.subr.bf16.mxu1 %v6967_v46  ;;  %v7051_v46 = vld [vmem:[#allocation8 + $0x38c] ss:$16 sps:$4 sm:$0xff]  }
 0x29c   :  { %4960 = vmatpush1.bf16.msra.mxu0 %v6986_v49  ;;  %v7049_v49 = vld [vmem:[#allocation8 + $0x388] ss:$16 sps:$4 sm:$0xff]  }
 0x29d   :  { %4961 = vmatprep.subr.bf16.mxu0 %v6994_v50  ;;  %v581_v50 = vsub.s32 4, %v7797_v13 }
 0x29e   :  { %5068 = vmatpush1.bf16.msra.mxu1 %v6965_v53  ;;  %v585_v53 = vsub.s32 5, %v7797_v13 }
 0x29f   :  { %5069 = vmatprep.subr.bf16.mxu1 %v6970_v56  ;;  %v7057_v56 = vld [vmem:[#allocation8 + $0x3ac] ss:$16 sps:$4 sm:$0xff]  }
 0x2a0   :  { %4962 = vmatpush1.bf16.msra.mxu0 %v6992_v51  ;;  %v7863_v51 = vld [vmem:[#allocation7] sm:$0xff] }
 0x2a1   :  { %4963 = vmatprep.subr.bf16.mxu0 %v7000_v52  ;;  %v582_v52 = vrot.slane %v7863_v51, %v581_v50  ;;  %v7093_v50 = vld [vmem:[#allocation8 + $0x4ec] ss:$16 sps:$4 sm:$0xff]  }
 0x2a2   :  { %5070 = vmatpush1.bf16.msra.mxu1 %v6968_v54  ;;  %v7055_v54 = vld [vmem:[#allocation8 + $0x3a8] ss:$16 sps:$4 sm:$0xff]  }
 0x2a3   :  { %5071 = vmatprep.subr.bf16.mxu1 %v6973_v55  ;;  %v586_v55 = vrot.slane %v7863_v51, %v585_v53  ;;  %v7133_v53 = vld [vmem:[#allocation8 + $0x6c0] ss:$16 sps:$4 sm:$0xff]  }
 0x2a4   :  { %4964 = vmatpush1.bf16.msra.mxu0 %v6998_v59  ;;  %v7063_v59 = vld [vmem:[#allocation8 + $0x3cc] ss:$16 sps:$4 sm:$0xff]  }
 0x2a5   :  { %4965 = vmatprep.subr.bf16.mxu0 %v7006_v57 }
 0x2a6   :  { %5072 = vmatpush1.bf16.msra.mxu1 %v6971_v61 }
 0x2a7   :  { %5084 = vmatprep.subr.bf16.mxu1 %v6979_v62 }
 0x2a8   :  { %4966 = vmatpush1.bf16.msra.mxu0 %v7004_v63  ;;  %v7061_v63 = vld [vmem:[#allocation8 + $0x3c8] ss:$16 sps:$4 sm:$0xff]  }
 0x2a9   :  { %4967 = vmatprep.subr.bf16.mxu0 %v7012_v26  ;;  %5074 = vmatmul.mubr.bf16.vlgmr.msra.gmra.mrb[12].mxu1 %v7820_v4  ;;  %v6995_v4 = vld [vmem:[#allocation8 + $0x268] ss:$16 sps:$4 sm:$0xff]  }
 0x2aa   :  { %5085 = vmatpush1.bf16.msra.mxu1 %v6977_v1  ;;  %5116 = vmatprep.mubr.bf16.mxu1 %v7855_v31  ;;  %v7054_v31 = vld [vmem:[#allocation8 + $0x5a4] ss:$16 sps:$4 sm:$0xff]  }
 0x2ab   :  { %5086 = vmatprep.subr.bf16.mxu1 %v6985_v2  ;;  %v7069_v2 = vld [vmem:[#allocation8 + $0x3ec] ss:$16 sps:$4 sm:$0xff]  }
 0x2ac   :  { %4968 = vmatpush1.bf16.msra.mxu0 %v7010_v32 }
 0x2ad   :  { %4969 = vmatprep.subr.bf16.mxu0 %v7018_v48 }
 0x2ae   :  { %5087 = vmatpush1.bf16.msra.mxu1 %v6983_v3 }
 0x2af   :  { %5088 = vmatprep.subr.bf16.mxu1 %v6991_v23 }
 0x2b0   :  { %4970 = vmatpush1.bf16.msra.mxu0 %v7016_v5 }
 0x2b1   :  { %4971 = vmatprep.subr.bf16.mxu0 %v7024_v6 }
 0x2b2   :  { %5089 = vmatpush1.bf16.msra.mxu1 %v6989_v9  ;;  %v7067_v9 = vld [vmem:[#allocation8 + $0x3e8] ss:$16 sps:$4 sm:$0xff]  }
 0x2b3   :  { %5090 = vmatprep.subr.bf16.mxu1 %v6997_v11 }
 0x2b4   :  { %4972 = vmatpush1.bf16.msra.mxu0 %v7022_v12  ;;  %v7072_v12 = vld [vmem:[#allocation8 + $0x40c] ss:$16 sps:$4 sm:$0xff]  }
 0x2b5   :  { %4973 = vmatprep.subr.bf16.mxu0 %v7030_v15 }
 0x2b6   :  { %5091 = vmatpush1.bf16.msra.mxu1 %v6995_v4 }
 0x2b7   :  { %5092 = vmatprep.subr.bf16.mxu1 %v7003_v16 }
 0x2b8   :  { %4974 = vmatpush1.bf16.msra.mxu0 %v7028_v17 }
 0x2b9   :  { %4975 = vmatprep.subr.bf16.mxu0 %v7036_v60 }
 0x2ba   :  { %5093 = vmatpush1.bf16.msra.mxu1 %v7001_v7 }
 0x2bb   :  { %5094 = vmatprep.subr.bf16.mxu1 %v7009_v20 }
 0x2bc   :  { %4976 = vmatpush1.bf16.msra.mxu0 %v7034_v22  ;;  %v7070_v22 = vld [vmem:[#allocation8 + $0x408] ss:$16 sps:$4 sm:$0xff]  }
 0x2bd   :  { %4977 = vmatprep.subr.bf16.mxu0 %v7042_v10 }
 0x2be   :  { %5095 = vmatpush1.bf16.msra.mxu1 %v7007_v24  ;;  %v7075_v24 = vld [vmem:[#allocation8 + $0x42c] ss:$16 sps:$4 sm:$0xff]  }
 0x2bf   :  { %5096 = vmatprep.subr.bf16.mxu1 %v7015_v25  ;;  %v7097_v25 = vld [vmem:[#allocation8 + $0x600] ss:$16 sps:$4 sm:$0xff]  }
 0x2c0   :  { %4978 = vmatpush1.bf16.msra.mxu0 %v7040_v27 }
 0x2c1   :  { %4979 = vmatprep.subr.bf16.mxu0 %v7048_v14  ;;  %v7105_v14 = vld [vmem:[#allocation8 + $0x624] ss:$16 sps:$4 sm:$0xff]  }
 0x2c2   :  { %5097 = vmatpush1.bf16.msra.mxu1 %v7013_v28 }
 0x2c3   :  { %5098 = vmatprep.subr.bf16.mxu1 %v7021_v29  ;;  %v7073_v29 = vld [vmem:[#allocation8 + $0x428] ss:$16 sps:$4 sm:$0xff]  }
 0x2c4   :  { %4980 = vmatpush1.bf16.msra.mxu0 %v7046_v18  ;;  %v7078_v18 = vld [vmem:[#allocation8 + $0x44c] ss:$16 sps:$4 sm:$0xff]  }
 0x2c5   :  { %4981 = vmatprep.subr.bf16.mxu0 %v7054_v31  ;;  %v7103_v31 = vld [vmem:[#allocation8 + $0x620] ss:$16 sps:$4 sm:$0xff]  }
 0x2c6   :  { %5099 = vmatpush1.bf16.msra.mxu1 %v7019_v33  ;;  %v7111_v33 = vld [vmem:[#allocation8 + $0x644] ss:$16 sps:$4 sm:$0xff]  }
 0x2c7   :  { %5100 = vmatprep.subr.bf16.mxu1 %v7027_v34  ;;  %v7076_v34 = vld [vmem:[#allocation8 + $0x448] ss:$16 sps:$4 sm:$0xff]  }
 0x2c8   :  { %4982 = vmatpush1.bf16.msra.mxu0 %v7052_v35  ;;  %v7081_v35 = vld [vmem:[#allocation8 + $0x46c] ss:$16 sps:$4 sm:$0xff]  }
 0x2c9   :  { %4983 = vmatprep.subr.bf16.mxu0 %v7060_v36  ;;  %v7109_v36 = vld [vmem:[#allocation8 + $0x640] ss:$16 sps:$4 sm:$0xff]  }
 0x2ca   :  { %5101 = vmatpush1.bf16.msra.mxu1 %v7025_v37  ;;  %v7117_v37 = vld [vmem:[#allocation8 + $0x664] ss:$16 sps:$4 sm:$0xff]  }
 0x2cb   :  { %5102 = vmatprep.subr.bf16.mxu1 %v7033_v38  ;;  %v7079_v38 = vld [vmem:[#allocation8 + $0x468] ss:$16 sps:$4 sm:$0xff]  }
 0x2cc   :  { %4984 = vmatpush1.bf16.msra.mxu0 %v7058_v40  ;;  %v7115_v40 = vld [vmem:[#allocation8 + $0x660] ss:$16 sps:$4 sm:$0xff]  }
 0x2cd   :  { %4985 = vmatprep.subr.bf16.mxu0 %v7066_v41  ;;  %v7123_v41 = vld [vmem:[#allocation8 + $0x684] ss:$16 sps:$4 sm:$0xff]  }
 0x2ce   :  { %5103 = vmatpush1.bf16.msra.mxu1 %v7031_v42  ;;  %v7082_v42 = vld [vmem:[#allocation8 + $0x488] ss:$16 sps:$4 sm:$0xff]  }
 0x2cf   :  { %5104 = vmatprep.subr.bf16.mxu1 %v7039_v43  ;;  %v7087_v43 = vld [vmem:[#allocation8 + $0x4ac] ss:$16 sps:$4 sm:$0xff]  }
 0x2d0   :  { %4986 = vmatpush1.bf16.msra.mxu0 %v7064_v21  ;;  %v7121_v21 = vld [vmem:[#allocation8 + $0x680] ss:$16 sps:$4 sm:$0xff]  }
 0x2d1   :  { %4998 = vmatprep.subr.bf16.mxu0 %v7099_v44  ;;  %v7129_v44 = vld [vmem:[#allocation8 + $0x6a4] ss:$16 sps:$4 sm:$0xff]  }
 0x2d2   :  { %5105 = vmatpush1.bf16.msra.mxu1 %v7037_v39  ;;  %v7085_v39 = vld [vmem:[#allocation8 + $0x4a8] ss:$16 sps:$4 sm:$0xff]  }
 0x2d3   :  { %5106 = vmatprep.subr.bf16.mxu1 %v7045_v45  ;;  %v7090_v45 = vld [vmem:[#allocation8 + $0x4cc] ss:$16 sps:$4 sm:$0xff]  }
 0x2d6   :  { %5107 = vmatpush1.bf16.msra.mxu1 %v7043_v8  ;;  %v7127_v8 = vld [vmem:[#allocation8 + $0x6a0] ss:$16 sps:$4 sm:$0xff]  }
 0x2d7   :  { %5108 = vmatprep.subr.bf16.mxu1 %v7051_v46  ;;  %v7135_v46 = vld [vmem:[#allocation8 + $0x6c4] ss:$16 sps:$4 sm:$0xff]  }
 0x2da   :  { %5109 = vmatpush1.bf16.msra.mxu1 %v7049_v49  ;;  %v7088_v49 = vld [vmem:[#allocation8 + $0x4c8] ss:$16 sps:$4 sm:$0xff]  }
 0x2db   :  { %5110 = vmatprep.subr.bf16.mxu1 %v7057_v56  ;;  %v7141_v56 = vld [vmem:[#allocation8 + $0x6e4] ss:$16 sps:$4 sm:$0xff]  }
 0x2de   :  { %v3074_v57 = vpop.f32.mrb[8].mxu0  ;;  %5111 = vmatpush1.bf16.msra.mxu1 %v7055_v54  ;;  %v7096_v54 = vld [vmem:[#allocation8 + $0x50c] ss:$16 sps:$4 sm:$0xff]  }
 0x2df   :  { %v6721_v61 = vadd.f32 %v3074_v57, %v582_v52  ;;  %v3076_v62 = vpop.f32.mrb[9].mxu0  ;;  %5112 = vmatprep.subr.bf16.mxu1 %v7063_v59  ;;  %v7147_v59 = vld [vmem:[#allocation8 + $0x704] ss:$16 sps:$4 sm:$0xff]   ;;  %v7094_v57 = vld [vmem:[#allocation8 + $0x508] ss:$16 sps:$4 sm:$0xff]  }
 0x2e0   :  { %v6722_v26 = vadd.f32 %v3076_v62, %v586_v55  ;;  %v3078_v1 = vpop.f32.mrb[10].mxu0  ;;  %v7145_v62 = vld [vmem:[#allocation8 + $0x700] ss:$16 sps:$4 sm:$0xff]  }
 0x2e1   :  { %v3275_v32 = vmul.f32 0.2, %v6721_v61  ;;  %v6723_v48 = vadd.f32 %v3078_v1, %v582_v52  ;;  %v3080_v3 = vpop.f32.mrb[11].mxu0  ;;  %vm3259_vm9 = vcmp.gt.f32.partialorder %v6721_v61, 0.0  ;;  %v7091_v52 = vld [vmem:[#allocation8 + $0x4e8] ss:$16 sps:$4 sm:$0xff]  }
 0x2e2   :  { %v3276_v23 = vmul.f32 0.2, %v6722_v26  ;;  %v6724_v5 = vadd.f32 %v3080_v3, %v586_v55  ;;  %vm3260_vm10 = vcmp.gt.f32.partialorder %v6722_v26, 0.0  ;;  %5113 = vmatpush1.bf16.msra.mxu1 %v7061_v63  ;;  %v7139_v55 = vld [vmem:[#allocation8 + $0x6e0] ss:$16 sps:$4 sm:$0xff]  }
 0x2e3   :  { %vm3267_vm11 = vcmp.gt.f32.partialorder %v6723_v48, 0.0  ;;  %v3283_v6 = vmul.f32 0.2, %v6723_v48  ;;  %5114 = vmatprep.subr.bf16.mxu1 %v7069_v2  ;;  %v3291_v15 = vsel %vm3259_vm9, %v6721_v61, %v3275_v32  ;;  %v7102_v61 = vld [vmem:[#allocation8 + $0x52c] ss:$16 sps:$4 sm:$0xff]  }
 0x2e4   :  { %vm3268_vm12 = vcmp.gt.f32.partialorder %v6724_v5, 0.0  ;;  %v3284_v11 = vmul.f32 0.2, %v6724_v5  ;;  %v3292_v17 = vsel %vm3260_vm10, %v6722_v26, %v3276_v23  ;;  %v7153_v63 = vld [vmem:[#allocation8 + $0x724] ss:$16 sps:$4 sm:$0xff]  }
 0x2e5   :  { %v3299_v4 = vsel %vm3267_vm11, %v6723_v48, %v3283_v6  ;;  %v7100_v26 = vld [vmem:[#allocation8 + $0x528] ss:$16 sps:$4 sm:$0xff]   ;;  %v7108_v1 = vld [vmem:[#allocation8 + $0x54c] ss:$16 sps:$4 sm:$0xff]   ;;  %v7151_v2 = vld [vmem:[#allocation8 + $0x720] ss:$16 sps:$4 sm:$0xff]  }
 0x2e6   :  { %v7867_v16 = vpack.c.bf16 %v3299_v4, %v3291_v15  ;;  %v3300_v60 = vsel %vm3268_vm12, %v6724_v5, %v3284_v11  ;;  %v7869_v7 = vpop.f32.mrb[12].mxu0  ;;  %5115 = vmatpush1.bf16.msra.mxu1 %v7067_v9  ;;  %v7159_v32 = vld [vmem:[#allocation8 + $0x744] ss:$16 sps:$4 sm:$0xff]   ;;  %v7106_v48 = vld [vmem:[#allocation8 + $0x548] ss:$16 sps:$4 sm:$0xff]  }
 0x2e7   :  { %v3308_v20 = vpack.c.bf16 %v3300_v60, %v3292_v17  ;;  %v7871_v10 = vpop.f32.mrb[13].mxu0  ;;  %5127 = vmatprep.subr.bf16.mxu1 %v7072_v12  ;;  %v7114_v3 = vld [vmem:[#allocation8 + $0x56c] ss:$16 sps:$4 sm:$0xff]   ;;  %v7157_v23 = vld [vmem:[#allocation8 + $0x740] ss:$16 sps:$4 sm:$0xff]  }
 0x2e8   :  { %v7873_v27 = vpop.f32.mrb[14].mxu0  ;;  %v7165_v5 = vld [vmem:[#allocation8 + $0x764] ss:$16 sps:$4 sm:$0xff]   ;;  %v7112_v6 = vld [vmem:[#allocation8 + $0x568] ss:$16 sps:$4 sm:$0xff]  }
 0x2e9   :  { %4987 = vmatprep.mubr.bf16.mxu0 %v3308_v20  ;;  %v7875_v28 = vpop.f32.mrb[15].mxu0  ;;  %5117 = vmatmul.mubr.bf16.vlgmr.msra.gmra.mrb[12].mxu1 %v7853_v30  ;;  %v7084_v30 = vld [vmem:[#allocation8 + $0x48c] ss:$16 sps:$4 sm:$0xff]   ;;  %v7163_v11 = vld [vmem:[#allocation8 + $0x760] ss:$16 sps:$4 sm:$0xff]  }
 0x2ea   :  { %4988 = vmatmul.mubr.bf16.vlgmr.msra.gmra.mrb[16].mxu0 %v7867_v16  ;;  %5128 = vmatpush1.bf16.msra.mxu1 %v7070_v22  ;;  %v7120_v9 = vld [vmem:[#allocation8 + $0x58c] ss:$16 sps:$4 sm:$0xff]   ;;  %v7171_v12 = vld [vmem:[#allocation8 + $0x784] ss:$16 sps:$4 sm:$0xff]   ;;  %v7118_v15 = vld [vmem:[#allocation8 + $0x588] ss:$16 sps:$4 sm:$0xff]  }
 0x2eb   :  { %5159 = vmatprep.mubr.bf16.mxu1 %v3308_v20  ;;  %5129 = vmatprep.subr.bf16.mxu1 %v7075_v24  ;;  %v7126_v4 = vld [vmem:[#allocation8 + $0x5ac] ss:$16 sps:$4 sm:$0xff]   ;;  %v7169_v17 = vld [vmem:[#allocation8 + $0x780] ss:$16 sps:$4 sm:$0xff]   ;;  %v7177_v60 = vld [vmem:[#allocation8 + $0x7a4] ss:$16 sps:$4 sm:$0xff]  }
 0x2ec   :  { %4999 = vmatpush1.bf16.msra.mxu0 %v7097_v25  ;;  %v7124_v20 = vld [vmem:[#allocation8 + $0x5a8] ss:$16 sps:$4 sm:$0xff]   ;;  %v7132_v22 = vld [vmem:[#allocation8 + $0x5cc] ss:$16 sps:$4 sm:$0xff]   ;;  %v7175_v24 = vld [vmem:[#allocation8 + $0x7a0] ss:$16 sps:$4 sm:$0xff]  }
 0x2ed   :  { %5000 = vmatprep.subr.bf16.mxu0 %v7105_v14  ;;  %v7183_v25 = vld [vmem:[#allocation8 + $0x7c4] ss:$16 sps:$4 sm:$0xff]   ;;  %v7130_v14 = vld [vmem:[#allocation8 + $0x5c8] ss:$16 sps:$4 sm:$0xff]  }
 0x2ee   :  { %5130 = vmatpush1.bf16.msra.mxu1 %v7073_v29  ;;  %v7138_v29 = vld [vmem:[#allocation8 + $0x5ec] ss:$16 sps:$4 sm:$0xff]  }
 0x2ef   :  { %5131 = vmatprep.subr.bf16.mxu1 %v7078_v18  ;;  %v7181_v18 = vld [vmem:[#allocation8 + $0x7c0] ss:$16 sps:$4 sm:$0xff]  }
 0x2f0   :  { %5001 = vmatpush1.bf16.msra.mxu0 %v7103_v31  ;;  %v7189_v31 = vld [vmem:[#allocation8 + $0x7e4] ss:$16 sps:$4 sm:$0xff]  }
 0x2f1   :  { %5002 = vmatprep.subr.bf16.mxu0 %v7111_v33  ;;  %v7136_v33 = vld [vmem:[#allocation8 + $0x5e8] ss:$16 sps:$4 sm:$0xff]  }
 0x2f2   :  { %5132 = vmatpush1.bf16.msra.mxu1 %v7076_v34  ;;  %v7144_v34 = vld [vmem:[#allocation8 + $0x60c] ss:$16 sps:$4 sm:$0xff]  }
 0x2f3   :  { %5133 = vmatprep.subr.bf16.mxu1 %v7081_v35  ;;  %v7187_v35 = vld [vmem:[#allocation8 + $0x7e0] ss:$16 sps:$4 sm:$0xff]  }
 0x2f4   :  { %5003 = vmatpush1.bf16.msra.mxu0 %v7109_v36  ;;  %v7216_v36 = vld [vmem:[#allocation11 + $0x4] ss:$8 sps:$4 sm:$0xff]  }
 0x2f5   :  { %5004 = vmatprep.subr.bf16.mxu0 %v7117_v37  ;;  %v7142_v37 = vld [vmem:[#allocation8 + $0x608] ss:$16 sps:$4 sm:$0xff]  }
 0x2f6   :  { %5134 = vmatpush1.bf16.msra.mxu1 %v7079_v38  ;;  %v7150_v38 = vld [vmem:[#allocation8 + $0x62c] ss:$16 sps:$4 sm:$0xff]  }
 0x2f7   :  { %5135 = vmatprep.subr.bf16.mxu1 %v7084_v30  ;;  %v7148_v30 = vld [vmem:[#allocation8 + $0x628] ss:$16 sps:$4 sm:$0xff]  }
 0x2f8   :  { %5005 = vmatpush1.bf16.msra.mxu0 %v7115_v40  ;;  %v7156_v40 = vld [vmem:[#allocation8 + $0x64c] ss:$16 sps:$4 sm:$0xff]  }
 0x2f9   :  { %5006 = vmatprep.subr.bf16.mxu0 %v7123_v41  ;;  %v7154_v41 = vld [vmem:[#allocation8 + $0x648] ss:$16 sps:$4 sm:$0xff]  }
 0x2fa   :  { %5136 = vmatpush1.bf16.msra.mxu1 %v7082_v42  ;;  %v7162_v42 = vld [vmem:[#allocation8 + $0x66c] ss:$16 sps:$4 sm:$0xff]  }
 0x2fb   :  { %5137 = vmatprep.subr.bf16.mxu1 %v7087_v43  ;;  %v7160_v43 = vld [vmem:[#allocation8 + $0x668] ss:$16 sps:$4 sm:$0xff]  }
 0x2fc   :  { %5007 = vmatpush1.bf16.msra.mxu0 %v7121_v21  ;;  %v7168_v21 = vld [vmem:[#allocation8 + $0x68c] ss:$16 sps:$4 sm:$0xff]  }
 0x2fd   :  { %5008 = vmatprep.subr.bf16.mxu0 %v7129_v44  ;;  %v589_v44 = vsub.s32 6, %v7797_v13 }
 0x2fe   :  { %5138 = vmatpush1.bf16.msra.mxu1 %v7085_v39  ;;  %v7166_v39 = vld [vmem:[#allocation8 + $0x688] ss:$16 sps:$4 sm:$0xff]  }
 0x2ff   :  { %5139 = vmatprep.subr.bf16.mxu1 %v7090_v45  ;;  %v593_v45 = vsub.s32 7, %v7797_v13 }
 0x300   :  { %5009 = vmatpush1.bf16.msra.mxu0 %v7127_v8  ;;  %v590_v8 = vrot.slane %v7863_v51, %v589_v44  ;;  %v7213_v44 = vld [vmem:[#allocation8 + $0x7ec] ss:$16 sps:$4 sm:$0xff]  }
 0x301   :  { %5010 = vmatprep.subr.bf16.mxu0 %v7135_v46  ;;  %v594_v46 = vrot.slane %v7863_v51, %v593_v45  ;;  %v7237_v45 = vld [vmem:[#allocation11 + $0x74] ss:$8 sps:$4 sm:$0xff]  }
 0x302   :  { %5140 = vmatpush1.bf16.msra.mxu1 %v7088_v49  ;;  %v7172_v49 = vld [vmem:[#allocation8 + $0x6a8] ss:$16 sps:$4 sm:$0xff]  }
 0x303   :  { %5141 = vmatprep.subr.bf16.mxu1 %v7093_v50  ;;  %v7180_v50 = vld [vmem:[#allocation8 + $0x6cc] ss:$16 sps:$4 sm:$0xff]  }
 0x304   :  { %5011 = vmatpush1.bf16.msra.mxu0 %v7133_v53 }
 0x305   :  { %5012 = vmatprep.subr.bf16.mxu0 %v7141_v56 }
 0x306   :  { %5142 = vmatpush1.bf16.msra.mxu1 %v7091_v52 }
 0x307   :  { %5143 = vmatprep.subr.bf16.mxu1 %v7096_v54 }
 0x308   :  { %5013 = vmatpush1.bf16.msra.mxu0 %v7139_v55 }
 0x309   :  { %5014 = vmatprep.subr.bf16.mxu0 %v7147_v59  ;;  %v7178_v59 = vld [vmem:[#allocation8 + $0x6c8] ss:$16 sps:$4 sm:$0xff]  }
 0x30a   :  { %5144 = vmatpush1.bf16.msra.mxu1 %v7094_v57 }
 0x30b   :  { %5145 = vmatprep.subr.bf16.mxu1 %v7102_v61 }
 0x30c   :  { %5015 = vmatpush1.bf16.msra.mxu0 %v7145_v62 }
 0x30d   :  { %5016 = vmatprep.subr.bf16.mxu0 %v7153_v63  ;;  %v7186_v63 = vld [vmem:[#allocation8 + $0x6ec] ss:$16 sps:$4 sm:$0xff]  }
 0x30e   :  { %5146 = vmatpush1.bf16.msra.mxu1 %v7100_v26 }
 0x30f   :  { %5147 = vmatprep.subr.bf16.mxu1 %v7108_v1 }
 0x310   :  { %5017 = vmatpush1.bf16.msra.mxu0 %v7151_v2 }
 0x311   :  { %5018 = vmatprep.subr.bf16.mxu0 %v7159_v32 }
 0x312   :  { %5148 = vmatpush1.bf16.msra.mxu1 %v7106_v48 }
 0x313   :  { %5149 = vmatprep.subr.bf16.mxu1 %v7114_v3  ;;  %v7184_v3 = vld [vmem:[#allocation8 + $0x6e8] ss:$16 sps:$4 sm:$0xff]  }
 0x314   :  { %5019 = vmatpush1.bf16.msra.mxu0 %v7157_v23 }
 0x315   :  { %5020 = vmatprep.subr.bf16.mxu0 %v7165_v5 }
 0x316   :  { %5150 = vmatpush1.bf16.msra.mxu1 %v7112_v6 }
 0x317   :  { %5151 = vmatprep.subr.bf16.mxu1 %v7120_v9 }
 0x318   :  { %5021 = vmatpush1.bf16.msra.mxu0 %v7163_v11 }
 0x319   :  { %5022 = vmatprep.subr.bf16.mxu0 %v7171_v12  ;;  %v7190_v12 = vld [vmem:[#allocation8 + $0x708] ss:$16 sps:$4 sm:$0xff]  }
 0x31a   :  { %5152 = vmatpush1.bf16.msra.mxu1 %v7118_v15 }
 0x31b   :  { %5153 = vmatprep.subr.bf16.mxu1 %v7126_v4  ;;  %v7214_v4 = vld [vmem:[#allocation11] ss:$8 sps:$4 sm:$0xff]  }
 0x31c   :  { %5023 = vmatpush1.bf16.msra.mxu0 %v7169_v17  ;;  %v7219_v17 = vld [vmem:[#allocation11 + $0x14] ss:$8 sps:$4 sm:$0xff]  }
 0x31d   :  { %5024 = vmatprep.subr.bf16.mxu0 %v7177_v60  ;;  %v7193_v60 = vld [vmem:[#allocation8 + $0x728] ss:$16 sps:$4 sm:$0xff]  }
 0x31e   :  { %5154 = vmatpush1.bf16.msra.mxu1 %v7124_v20  ;;  %v7198_v20 = vld [vmem:[#allocation8 + $0x74c] ss:$16 sps:$4 sm:$0xff]  }
 0x31f   :  { %5155 = vmatprep.subr.bf16.mxu1 %v7132_v22  ;;  %v7217_v22 = vld [vmem:[#allocation11 + $0x10] ss:$8 sps:$4 sm:$0xff]  }
 0x320   :  { %5025 = vmatpush1.bf16.msra.mxu0 %v7175_v24  ;;  %v7222_v24 = vld [vmem:[#allocation11 + $0x24] ss:$8 sps:$4 sm:$0xff]  }
 0x321   :  { %5026 = vmatprep.subr.bf16.mxu0 %v7183_v25  ;;  %v7196_v25 = vld [vmem:[#allocation8 + $0x748] ss:$16 sps:$4 sm:$0xff]  }
 0x322   :  { %5156 = vmatpush1.bf16.msra.mxu1 %v7130_v14  ;;  %v7201_v14 = vld [vmem:[#allocation8 + $0x76c] ss:$16 sps:$4 sm:$0xff]  }
 0x323   :  { %5157 = vmatprep.subr.bf16.mxu1 %v7138_v29  ;;  %v7220_v29 = vld [vmem:[#allocation11 + $0x20] ss:$8 sps:$4 sm:$0xff]  }
 0x324   :  { %5027 = vmatpush1.bf16.msra.mxu0 %v7181_v18  ;;  %v7225_v18 = vld [vmem:[#allocation11 + $0x34] ss:$8 sps:$4 sm:$0xff]  }
 0x325   :  { %5028 = vmatprep.subr.bf16.mxu0 %v7189_v31  ;;  %v7199_v31 = vld [vmem:[#allocation8 + $0x768] ss:$16 sps:$4 sm:$0xff]  }
 0x326   :  { %5158 = vmatpush1.bf16.msra.mxu1 %v7136_v33  ;;  %v7204_v33 = vld [vmem:[#allocation8 + $0x78c] ss:$16 sps:$4 sm:$0xff]  }
 0x327   :  { %5170 = vmatprep.subr.bf16.mxu1 %v7144_v34  ;;  %v7223_v34 = vld [vmem:[#allocation11 + $0x30] ss:$8 sps:$4 sm:$0xff]  }
 0x328   :  { %5029 = vmatpush1.bf16.msra.mxu0 %v7187_v35  ;;  %v7228_v35 = vld [vmem:[#allocation11 + $0x44] ss:$8 sps:$4 sm:$0xff]  }
 0x329   :  { %5637 = vmatprep.subr.bf16.mxu0 %v7216_v36  ;;  %5160 = vmatmul.mubr.bf16.vlgmr.msra.gmra.mrb[12].mxu1 %v7867_v16  ;;  %v7174_v16 = vld [vmem:[#allocation8 + $0x6ac] ss:$16 sps:$4 sm:$0xff]   ;;  %v7202_v36 = vld [vmem:[#allocation8 + $0x788] ss:$16 sps:$4 sm:$0xff]  }
 0x32a   :  { %5171 = vmatpush1.bf16.msra.mxu1 %v7142_v37  ;;  %v7207_v37 = vld [vmem:[#allocation8 + $0x7ac] ss:$16 sps:$4 sm:$0xff]  }
 0x32b   :  { %5172 = vmatprep.subr.bf16.mxu1 %v7150_v38  ;;  %v7226_v38 = vld [vmem:[#allocation11 + $0x40] ss:$8 sps:$4 sm:$0xff]  }
 0x32e   :  { %5173 = vmatpush1.bf16.msra.mxu1 %v7148_v30  ;;  %v7231_v30 = vld [vmem:[#allocation11 + $0x54] ss:$8 sps:$4 sm:$0xff]  }
 0x32f   :  { %5174 = vmatprep.subr.bf16.mxu1 %v7156_v40  ;;  %v7205_v40 = vld [vmem:[#allocation8 + $0x7a8] ss:$16 sps:$4 sm:$0xff]  }
 0x332   :  { %5175 = vmatpush1.bf16.msra.mxu1 %v7154_v41  ;;  %v7210_v41 = vld [vmem:[#allocation8 + $0x7cc] ss:$16 sps:$4 sm:$0xff]  }
 0x333   :  { %5176 = vmatprep.subr.bf16.mxu1 %v7162_v42  ;;  %v7229_v42 = vld [vmem:[#allocation11 + $0x50] ss:$8 sps:$4 sm:$0xff]  }
 0x336   :  { %5177 = vmatpush1.bf16.msra.mxu1 %v7160_v43  ;;  %v7234_v43 = vld [vmem:[#allocation11 + $0x64] ss:$8 sps:$4 sm:$0xff]  }
 0x337   :  { %5178 = vmatprep.subr.bf16.mxu1 %v7168_v21  ;;  %v7208_v21 = vld [vmem:[#allocation8 + $0x7c8] ss:$16 sps:$4 sm:$0xff]  }
 0x33a   :  { %5179 = vmatpush1.bf16.msra.mxu1 %v7166_v39  ;;  %v7232_v39 = vld [vmem:[#allocation11 + $0x60] ss:$8 sps:$4 sm:$0xff]  }
 0x33b   :  { %5180 = vmatprep.subr.bf16.mxu1 %v7174_v16  ;;  %v7211_v16 = vld [vmem:[#allocation8 + $0x7e8] ss:$16 sps:$4 sm:$0xff]  }
 0x33c   :  { %v3203_v53 = vpop.f32.mrb[8].mxu1 }
 0x33d   :  { %v6725_v56 = vadd.f32 %v3203_v53, %v590_v8  ;;  %v3205_v52 = vpop.f32.mrb[9].mxu1  ;;  %v7241_v53 = vld [vmem:[#allocation11 + $0x90] ss:$8 sps:$4 sm:$0xff]  }
 0x33e   :  { %v6727_v54 = vadd.f32 %v3205_v52, %v594_v46  ;;  %v3207_v55 = vpop.f32.mrb[10].mxu1  ;;  %5181 = vmatpush1.bf16.msra.mxu1 %v7172_v49  ;;  %v7238_v49 = vld [vmem:[#allocation11 + $0x80] ss:$8 sps:$4 sm:$0xff]  }
 0x33f   :  { %v6726_v57 = vadd.f32 %v6725_v56, %v7869_v7  ;;  %v6729_v61 = vadd.f32 %v3207_v55, %v590_v8  ;;  %v3209_v62 = vpop.f32.mrb[11].mxu1  ;;  %5182 = vmatprep.subr.bf16.mxu1 %v7180_v50  ;;  %v7192_v7 = vld [vmem:[#allocation8 + $0x70c] ss:$16 sps:$4 sm:$0xff]   ;;  %v7243_v50 = vld [vmem:[#allocation11 + $0x94] ss:$8 sps:$4 sm:$0xff]  }
 0x340   :  { %v6728_v26 = vadd.f32 %v6727_v54, %v7871_v10  ;;  %v6731_v1 = vadd.f32 %v3209_v62, %v594_v46  ;;  %v7235_v8 = vld [vmem:[#allocation11 + $0x70] ss:$8 sps:$4 sm:$0xff]   ;;  %v7240_v46 = vld [vmem:[#allocation11 + $0x84] ss:$8 sps:$4 sm:$0xff]   ;;  %v7244_v52 = vld [vmem:[#allocation11 + $0xa0] ss:$8 sps:$4 sm:$0xff]  }
 0x341   :  { %v3277_v51 = vmul.f32 0.2, %v6726_v57  ;;  %v6730_v2 = vadd.f32 %v6729_v61, %v7873_v27  ;;  %vm3261_vm13 = vcmp.gt.f32.partialorder %v6726_v57, 0.0  ;;  %v7246_v56 = vld [vmem:[#allocation11 + $0xa4] ss:$8 sps:$4 sm:$0xff]  }
 0x342   :  { %v3278_v32 = vmul.f32 0.2, %v6728_v26  ;;  %v6732_v48 = vadd.f32 %v6731_v1, %v7875_v28  ;;  %5183 = vmatpush1.bf16.msra.mxu1 %v7178_v59  ;;  %vm3262_vm14 = vcmp.gt.f32.partialorder %v6728_v26, 0.0  ;;  %v7195_v28 = vld [vmem:[#allocation8 + $0x72c] ss:$16 sps:$4 sm:$0xff]  }
 0x343   :  { %vm3269_vm15 = vcmp.gt.f32.partialorder %v6730_v2, 0.0  ;;  %v3285_v23 = vmul.f32 0.2, %v6730_v2  ;;  %5184 = vmatprep.subr.bf16.mxu1 %v7186_v63  ;;  %v3293_v6 = vsel %vm3261_vm13, %v6726_v57, %v3277_v51  ;;  %v7249_v54 = vld [vmem:[#allocation11 + $0xb4] ss:$8 sps:$4 sm:$0xff]  }
 0x344   :  { %vm3270_vm0 = vcmp.gt.f32.partialorder %v6732_v48, 0.0  ;;  %v3286_v5 = vmul.f32 0.2, %v6732_v48  ;;  %v3294_v10 = vsel %vm3262_vm14, %v6728_v26, %v3278_v32  ;;  %v7247_v55 = vld [vmem:[#allocation11 + $0xb0] ss:$8 sps:$4 sm:$0xff]   ;;  %v7310_v32 = vld [vmem:[#allocation14 + $0x40] sm:$0xff]  }
 0x345   :  { %v3301_v9 = vsel %vm3269_vm15, %v6730_v2, %v3285_v23  ;;  %v7252_v59 = vld [vmem:[#allocation11 + $0xc4] ss:$8 sps:$4 sm:$0xff]   ;;  %v7250_v57 = vld [vmem:[#allocation11 + $0xc0] ss:$8 sps:$4 sm:$0xff]   ;;  %v7255_v61 = vld [vmem:[#allocation11 + $0xd4] ss:$8 sps:$4 sm:$0xff]  }
 0x346   :  { %5185 = vmatpush1.bf16.msra.mxu1 %v7184_v3  ;;  %v3302_v11 = vsel %vm3270_vm0, %v6732_v48, %v3286_v5  ;;  %v7888_v27 = vpack.c.bf16 %v3301_v9, %v3293_v6  ;;  %v7253_v62 = vld [vmem:[#allocation11 + $0xd0] ss:$8 sps:$4 sm:$0xff]   ;;  %v7258_v63 = vld [vmem:[#allocation11 + $0xe4] ss:$8 sps:$4 sm:$0xff]   ;;  %v7256_v26 = vld [vmem:[#allocation11 + $0xe0] ss:$8 sps:$4 sm:$0xff]  }
 0x347   :  { %v3310_v15 = vpack.c.bf16 %v3302_v11, %v3294_v10  ;;  %5186 = vmatprep.subr.bf16.mxu1 %v7192_v7  ;;  %v7259_v1 = vld [vmem:[#allocation11 + $0xf0] ss:$8 sps:$4 sm:$0xff]   ;;  %v7261_v51 = vld [vmem:[#allocation11 + $0xf4] ss:$8 sps:$4 sm:$0xff]   ;;  %v7264_v2 = vld [vmem:[#allocation11 + $0x104] ss:$8 sps:$4 sm:$0xff]  }
 0x348   :  { %v7311_v48 = vld [vmem:[#allocation14] sm:$0xff]   ;;  %v7312_v3 = vld [vmem:[#allocation14 + $0x48] sm:$0xff]   ;;  %v7314_v7 = vld [vmem:[#allocation14 + $0x50] sm:$0xff]  }
 0x349   :  { %5030 = vmatprep.mubr.bf16.mxu0 %v3310_v15  ;;  %5202 = vmatprep.mubr.bf16.mxu1 %v3310_v15  ;;  %v7313_v23 = vld [vmem:[#allocation14 + $0x8] sm:$0xff]   ;;  %v7315_v5 = vld [vmem:[#allocation14 + $0x10] sm:$0xff]   ;;  %v7316_v6 = vld [vmem:[#allocation14 + $0x58] sm:$0xff]  }
 0x34a   :  { %5031 = vmatmul.mubr.bf16.vlgmr.msra.gmra.mrb[16].mxu0 %v7888_v27  ;;  %5187 = vmatpush1.bf16.msra.mxu1 %v7190_v12  ;;  %v7317_v9 = vld [vmem:[#allocation14 + $0x18] sm:$0xff]   ;;  %v7318_v10 = vld [vmem:[#allocation14 + $0x60] sm:$0xff]  }
 0x34b   :  { %5188 = vmatprep.subr.bf16.mxu1 %v7195_v28  ;;  %5638 = vmatpush1.bf16.msra.mxu0 %v7214_v4  ;;  %v7319_v11 = vld [vmem:[#allocation14 + $0x20] sm:$0xff]   ;;  %v3567_v12 = vld [vmem:[#allocation10] sm:$0xf] }
 0x34c   :  { %5639 = vmatprep.subr.bf16.mxu0 %v7219_v17  ;;  %v3576_v15 = vrot.slane %v3567_v12, %v7807_v58 }
 0x34e   :  { %5189 = vmatpush1.bf16.msra.mxu1 %v7193_v60 }
 0x34f   :  { %5190 = vmatprep.subr.bf16.mxu1 %v7198_v20  ;;  %5640 = vmatpush1.bf16.msra.mxu0 %v7217_v22 }
 0x350   :  { %5641 = vmatprep.subr.bf16.mxu0 %v7222_v24 }
 0x352   :  { %5191 = vmatpush1.bf16.msra.mxu1 %v7196_v25 }
 0x353   :  { %5192 = vmatprep.subr.bf16.mxu1 %v7201_v14  ;;  %5642 = vmatpush1.bf16.msra.mxu0 %v7220_v29 }
 0x354   :  { %5643 = vmatprep.subr.bf16.mxu0 %v7225_v18 }
 0x356   :  { %5193 = vmatpush1.bf16.msra.mxu1 %v7199_v31 }
 0x357   :  { %5194 = vmatprep.subr.bf16.mxu1 %v7204_v33  ;;  %5644 = vmatpush1.bf16.msra.mxu0 %v7223_v34 }
 0x358   :  { %5645 = vmatprep.subr.bf16.mxu0 %v7228_v35 }
 0x35a   :  { %5195 = vmatpush1.bf16.msra.mxu1 %v7202_v36 }
 0x35b   :  { %5196 = vmatprep.subr.bf16.mxu1 %v7207_v37  ;;  %5646 = vmatpush1.bf16.msra.mxu0 %v7226_v38 }
 0x35c   :  { %5647 = vmatprep.subr.bf16.mxu0 %v7231_v30  ;;  %v7262_v30 = vld [vmem:[#allocation11 + $0x100] ss:$8 sps:$4 sm:$0xff]  }
 0x35e   :  { %5197 = vmatpush1.bf16.msra.mxu1 %v7205_v40  ;;  %v7267_v40 = vld [vmem:[#allocation11 + $0x114] ss:$8 sps:$4 sm:$0xff]  }
 0x35f   :  { %5198 = vmatprep.subr.bf16.mxu1 %v7210_v41  ;;  %5648 = vmatpush1.bf16.msra.mxu0 %v7229_v42  ;;  %v7265_v41 = vld [vmem:[#allocation11 + $0x110] ss:$8 sps:$4 sm:$0xff]   ;;  %v7270_v42 = vld [vmem:[#allocation11 + $0x124] ss:$8 sps:$4 sm:$0xff]  }
 0x360   :  { %5649 = vmatprep.subr.bf16.mxu0 %v7234_v43  ;;  %v7268_v43 = vld [vmem:[#allocation11 + $0x120] ss:$8 sps:$4 sm:$0xff]  }
 0x362   :  { %5199 = vmatpush1.bf16.msra.mxu1 %v7208_v21  ;;  %v7273_v21 = vld [vmem:[#allocation11 + $0x134] ss:$8 sps:$4 sm:$0xff]  }
 0x363   :  { %5200 = vmatprep.subr.bf16.mxu1 %v7213_v44  ;;  %5650 = vmatpush1.bf16.msra.mxu0 %v7232_v39  ;;  %v7271_v44 = vld [vmem:[#allocation11 + $0x130] ss:$8 sps:$4 sm:$0xff]   ;;  %v7276_v39 = vld [vmem:[#allocation11 + $0x144] ss:$8 sps:$4 sm:$0xff]  }
 0x364   :  { %5651 = vmatprep.subr.bf16.mxu0 %v7237_v45  ;;  %v7274_v45 = vld [vmem:[#allocation11 + $0x140] ss:$8 sps:$4 sm:$0xff]  }
 0x366   :  { %5201 = vmatpush1.bf16.msra.mxu1 %v7211_v16  ;;  %v7279_v16 = vld [vmem:[#allocation11 + $0x154] ss:$8 sps:$4 sm:$0xff]  }
 0x367   :  { %5652 = vmatpush1.bf16.msra.mxu0 %v7235_v8  ;;  %6683 = vmatprep.subr.bf16.mxu1 %v7310_v32  ;;  %v3580_v8 = vrot.slane %v3567_v12, %v573_v0  ;;  %v7288_v32 = vld [vmem:[#allocation11 + $0x184] ss:$8 sps:$4 sm:$0xff]  }
 0x368   :  { %5653 = vmatprep.subr.bf16.mxu0 %v7240_v46  ;;  %v7277_v46 = vld [vmem:[#allocation11 + $0x150] ss:$8 sps:$4 sm:$0xff]  }
 0x369   :  { %5203 = vmatmul.mubr.bf16.vlgmr.msra.gmra.mrb[12].mxu1 %v7888_v27  ;;  %v3572_v27 = vrot.slane %v3567_v12, %v7801_v19 }
 0x36a   :  { %6684 = vmatpush3.bf16.msra.mxu1 %v7311_v48 }
 0x36b   :  { %5654 = vmatpush1.bf16.msra.mxu0 %v7238_v49  ;;  %6685 = vmatprep.subr.bf16.mxu1 %v7312_v3  ;;  %v3584_v49 = vrot.slane %v3567_v12, %v577_v47  ;;  %v7297_v12 = vld [vmem:[#allocation11 + $0x1b4] ss:$8 sps:$4 sm:$0xff]  }
 0x36c   :  { %5655 = vmatprep.subr.bf16.mxu0 %v7243_v50  ;;  %v7282_v50 = vld [vmem:[#allocation11 + $0x164] ss:$8 sps:$4 sm:$0xff]  }
 0x36e   :  { %6686 = vmatpush3.bf16.msra.mxu1 %v7313_v23 }
 0x36f   :  { %5656 = vmatpush1.bf16.msra.mxu0 %v7241_v53  ;;  %6687 = vmatprep.subr.bf16.mxu1 %v7314_v7 }
 0x370   :  { %5657 = vmatprep.subr.bf16.mxu0 %v7246_v56 }
 0x372   :  { %6688 = vmatpush3.bf16.msra.mxu1 %v7315_v5  ;;  %v7286_v5 = vld [vmem:[#allocation11 + $0x180] ss:$8 sps:$4 sm:$0xff]  }
 0x373   :  { %5658 = vmatpush1.bf16.msra.mxu0 %v7244_v52  ;;  %6689 = vmatprep.subr.bf16.mxu1 %v7316_v6  ;;  %v7291_v6 = vld [vmem:[#allocation11 + $0x194] ss:$8 sps:$4 sm:$0xff]  }
 0x374   :  { %5659 = vmatprep.subr.bf16.mxu0 %v7249_v54 }
 0x376   :  { %6690 = vmatpush3.bf16.msra.mxu1 %v7317_v9  ;;  %v7289_v9 = vld [vmem:[#allocation11 + $0x190] ss:$8 sps:$4 sm:$0xff]  }
 0x377   :  { %5660 = vmatpush1.bf16.msra.mxu0 %v7247_v55  ;;  %6691 = vmatprep.subr.bf16.mxu1 %v7318_v10  ;;  %v7294_v10 = vld [vmem:[#allocation11 + $0x1a4] ss:$8 sps:$4 sm:$0xff]  }
 0x378   :  { %5661 = vmatprep.subr.bf16.mxu0 %v7252_v59  ;;  %v7280_v59 = vld [vmem:[#allocation11 + $0x160] ss:$8 sps:$4 sm:$0xff]  }
 0x37a   :  { %6692 = vmatpush3.bf16.msra.mxu1 %v7319_v11  ;;  %v7292_v11 = vld [vmem:[#allocation11 + $0x1a0] ss:$8 sps:$4 sm:$0xff]  }
 0x37b   :  { %5662 = vmatpush1.bf16.msra.mxu0 %v7250_v57 }
 0x37c   :  { %5663 = vmatprep.subr.bf16.mxu0 %v7255_v61 }
 0x37f   :  { %5664 = vmatpush1.bf16.msra.mxu0 %v7253_v62 }
 0x380   :  { %5665 = vmatprep.subr.bf16.mxu0 %v7258_v63  ;;  %v7285_v63 = vld [vmem:[#allocation11 + $0x174] ss:$8 sps:$4 sm:$0xff]  }
 0x383   :  { %5666 = vmatpush1.bf16.msra.mxu0 %v7256_v26 }
 0x384   :  { %5667 = vmatprep.subr.bf16.mxu0 %v7261_v51 }
 0x387   :  { %5668 = vmatpush1.bf16.msra.mxu0 %v7259_v1  ;;  %v7283_v1 = vld [vmem:[#allocation11 + $0x170] ss:$8 sps:$4 sm:$0xff]  }
 0x388   :  { %5680 = vmatprep.subr.bf16.mxu0 %v7264_v2 }
 0x41d   :  { %v5032_v28 = vpop.f32.mrb[16].mxu0 }
 0x41e   :  { %v6733_v4 = vadd.f32 %v5032_v28, %v3572_v27  ;;  %v5034_v17 = vpop.f32.mrb[17].mxu0  ;;  %v7298_v28 = vld [vmem:[#allocation11 + $0x1c0] ss:$8 sps:$4 sm:$0xff]  }
 0x41f   :  { %v6734_v60 = vadd.f32 %v5034_v17, %v3576_v15  ;;  %v5036_v20 = vpop.f32.mrb[18].mxu0  ;;  %v7301_v17 = vld [vmem:[#allocation11 + $0x1d0] ss:$8 sps:$4 sm:$0xff]  }
 0x420   :  { %v5221_v22 = vmul.f32 0.2, %v6733_v4  ;;  %v6735_v24 = vadd.f32 %v5036_v20, %v3572_v27  ;;  %v5038_v25 = vpop.f32.mrb[19].mxu0  ;;  %vm5213_vm1 = vcmp.gt.f32.partialorder %v6733_v4, 0.0  ;;  %v7295_v27 = vld [vmem:[#allocation11 + $0x1b0] ss:$8 sps:$4 sm:$0xff]  }
 0x421   :  { %v5222_v14 = vmul.f32 0.2, %v6734_v60  ;;  %v6736_v29 = vadd.f32 %v5038_v25, %v3576_v15  ;;  %vm5214_vm2 = vcmp.gt.f32.partialorder %v6734_v60, 0.0  ;;  %v7300_v15 = vld [vmem:[#allocation11 + $0x1c4] ss:$8 sps:$4 sm:$0xff]  }
 0x422   :  { %vm5217_vm3 = vcmp.gt.f32.partialorder %v6735_v24, 0.0  ;;  %v5225_v18 = vmul.f32 0.2, %v6735_v24  ;;  %v5229_v33 = vsel %vm5213_vm1, %v6733_v4, %v5221_v22  ;;  %v7303_v4 = vld [vmem:[#allocation11 + $0x1d4] ss:$8 sps:$4 sm:$0xff]   ;;  %v7320_v25 = vld [vmem:[#allocation14 + $0x68] sm:$0xff]  }
 0x423   :  { %vm5218_vm4 = vcmp.gt.f32.partialorder %v6736_v29, 0.0  ;;  %v5226_v31 = vmul.f32 0.2, %v6736_v29  ;;  %v5230_v36 = vsel %vm5214_vm2, %v6734_v60, %v5222_v14  ;;  %v7306_v60 = vld [vmem:[#allocation11 + $0x1e4] ss:$8 sps:$4 sm:$0xff]   ;;  %6693 = vmatprep.subr.bf16.mxu1 %v7320_v25 }
 0x424   :  { %v5233_v34 = vsel %vm5217_vm3, %v6735_v24, %v5225_v18  ;;  %v7304_v20 = vld [vmem:[#allocation11 + $0x1e0] ss:$8 sps:$4 sm:$0xff]   ;;  %v7309_v22 = vld [vmem:[#allocation11 + $0x1f4] ss:$8 sps:$4 sm:$0xff]   ;;  %v7307_v24 = vld [vmem:[#allocation11 + $0x1f0] ss:$8 sps:$4 sm:$0xff]  }
 0x425   :  { %v5237_v35 = vpack.c.bf16 %v5233_v34, %v5229_v33  ;;  %v5234_v37 = vsel %vm5218_vm4, %v6736_v29, %v5226_v31  ;;  %v7321_v14 = vld [vmem:[#allocation14 + $0x28] sm:$0xff]   ;;  %v7322_v29 = vld [vmem:[#allocation14 + $0x70] sm:$0xff]   ;;  %v7324_v31 = vld [vmem:[#allocation14 + $0x78] sm:$0xff]  }
 0x426   :  { %v5238_v38 = vpack.c.bf16 %v5234_v37, %v5230_v36  ;;  %6694 = vmatpush3.bf16.msra.mxu1 %v7321_v14  ;;  %v7323_v18 = vld [vmem:[#allocation14 + $0x30] sm:$0xff]   ;;  %v7325_v33 = vld [vmem:[#allocation14 + $0x38] sm:$0xff]  }
 0x427   :  { %6695 = vmatprep.subr.bf16.mxu1 %v7322_v29  ;;  %v5305_v34 = vld [vmem:[#allocation13] sm:$0x3] }
 0x428   :  { %5669 = vmatprep.mubr.bf16.mxu0 %v5238_v38  ;;  %v5314_v36 = vrot.slane %v5305_v34, %v7807_v58 }
 0x429   :  { %5670 = vmatmul.mubr.bf16.vlgmr.msra.gmra.mrb[20].mxu0 %v5237_v35  ;;  %v5310_v35 = vrot.slane %v5305_v34, %v7801_v19 }
 0x42a   :  { %5681 = vmatpush1.bf16.msra.mxu0 %v7262_v30  ;;  %6696 = vmatpush3.bf16.msra.mxu1 %v7323_v18 }
 0x42b   :  { %5682 = vmatprep.subr.bf16.mxu0 %v7267_v40  ;;  %6697 = vmatprep.subr.bf16.mxu1 %v7324_v31 }
 0x42e   :  { %5683 = vmatpush1.bf16.msra.mxu0 %v7265_v41  ;;  %6698 = vmatpush3.bf16.msra.mxu1 %v7325_v33 }
 0x42f   :  { %5684 = vmatprep.subr.bf16.mxu0 %v7270_v42 }
 0x432   :  { %5685 = vmatpush1.bf16.msra.mxu0 %v7268_v43 }
 0x433   :  { %5686 = vmatprep.subr.bf16.mxu0 %v7273_v21 }
 0x436   :  { %5687 = vmatpush1.bf16.msra.mxu0 %v7271_v44 }
 0x437   :  { %5688 = vmatprep.subr.bf16.mxu0 %v7276_v39 }
 0x43a   :  { %5689 = vmatpush1.bf16.msra.mxu0 %v7274_v45 }
 0x43b   :  { %5690 = vmatprep.subr.bf16.mxu0 %v7279_v16 }
 0x43c   :  { %v5204_v53 = vpop.f32.mrb[12].mxu1 }
 0x43d   :  { %v6737_v56 = vadd.f32 %v5204_v53, %v3580_v8  ;;  %v5206_v52 = vpop.f32.mrb[13].mxu1 }
 0x43e   :  { %v6738_v54 = vadd.f32 %v5206_v52, %v3584_v49  ;;  %5691 = vmatpush1.bf16.msra.mxu0 %v7277_v46  ;;  %v5208_v55 = vpop.f32.mrb[14].mxu1 }
 0x43f   :  { %v5223_v57 = vmul.f32 0.2, %v6737_v56  ;;  %v6739_v61 = vadd.f32 %v5208_v55, %v3580_v8  ;;  %v5210_v62 = vpop.f32.mrb[15].mxu1  ;;  %5692 = vmatprep.subr.bf16.mxu0 %v7282_v50  ;;  %vm5215_vm5 = vcmp.gt.f32.partialorder %v6737_v56, 0.0 }
 0x440   :  { %v5224_v0 = vmul.f32 0.2, %v6738_v54  ;;  %v6740_v26 = vadd.f32 %v5210_v62, %v3584_v49  ;;  %vm5216_vm6 = vcmp.gt.f32.partialorder %v6738_v54, 0.0 }
 0x441   :  { %vm5219_vm7 = vcmp.gt.f32.partialorder %v6739_v61, 0.0  ;;  %v5227_v13 = vmul.f32 0.2, %v6739_v61  ;;  %v5231_v51 = vsel %vm5215_vm5, %v6737_v56, %v5223_v57  ;;  %v6664_v56 = vld [vmem:[#allocation16] ss:$0 sm:$0xff] }
 0x442   :  { %vm5220_vm8 = vcmp.gt.f32.partialorder %v6740_v26, 0.0  ;;  %v5228_v47 = vmul.f32 0.2, %v6740_v26  ;;  %5693 = vmatpush1.bf16.msra.mxu0 %v7280_v59  ;;  %v5232_v3 = vsel %vm5216_vm6, %v6738_v54, %v5224_v0 }
 0x443   :  { %v5235_v2 = vsel %vm5219_vm7, %v6739_v61, %v5227_v13  ;;  %5694 = vmatprep.subr.bf16.mxu0 %v7285_v63 }
 0x444   :  { %v5239_v48 = vpack.c.bf16 %v5235_v2, %v5231_v51  ;;  %v5236_v23 = vsel %vm5220_vm8, %v6740_v26, %v5228_v47 }
 0x445   :  { %v5240_v7 = vpack.c.bf16 %v5236_v23, %v5232_v3 }
 0x446   :  { %5695 = vmatpush1.bf16.msra.mxu0 %v7283_v1 }
 0x447   :  { %5712 = vmatprep.mubr.bf16.mxu0 %v5240_v7  ;;  %5696 = vmatprep.subr.bf16.mxu0 %v7288_v32 }
 0x44a   :  { %5697 = vmatpush1.bf16.msra.mxu0 %v7286_v5 }
 0x44b   :  { %5698 = vmatprep.subr.bf16.mxu0 %v7291_v6 }
 0x44e   :  { %5699 = vmatpush1.bf16.msra.mxu0 %v7289_v9 }
 0x44f   :  { %5700 = vmatprep.subr.bf16.mxu0 %v7294_v10 }
 0x452   :  { %5701 = vmatpush1.bf16.msra.mxu0 %v7292_v11 }
 0x453   :  { %5702 = vmatprep.subr.bf16.mxu0 %v7297_v12 }
 0x456   :  { %5703 = vmatpush1.bf16.msra.mxu0 %v7295_v27 }
 0x457   :  { %5704 = vmatprep.subr.bf16.mxu0 %v7300_v15 }
 0x45a   :  { %5705 = vmatpush1.bf16.msra.mxu0 %v7298_v28 }
 0x45b   :  { %5706 = vmatprep.subr.bf16.mxu0 %v7303_v4 }
 0x45e   :  { %5707 = vmatpush1.bf16.msra.mxu0 %v7301_v17 }
 0x45f   :  { %5708 = vmatprep.subr.bf16.mxu0 %v7306_v60 }
 0x462   :  { %5709 = vmatpush1.bf16.msra.mxu0 %v7304_v20 }
 0x463   :  { %5710 = vmatprep.subr.bf16.mxu0 %v7309_v22 }
 0x466   :  { %5711 = vmatpush1.bf16.msra.mxu0 %v7307_v24 }
 0x469   :  { %5713 = vmatmul.mubr.bf16.vlgmr.msra.gmra.mrb[20].mxu0 %v5239_v48 }
 0x53c   :  { %v5714_v37 = vpop.f32.mrb[20].mxu0 }
 0x53d   :  { %v6741_v38 = vadd.f32 %v5714_v37, %v5310_v35  ;;  %v5716_v30 = vpop.f32.mrb[21].mxu0 }
 0x53e   :  { %v6742_v40 = vadd.f32 %v5716_v30, %v5314_v36  ;;  %v5718_v41 = vpop.f32.mrb[22].mxu0 }
 0x53f   :  { %v5727_v42 = vmul.f32 0.2, %v6741_v38  ;;  %v6743_v43 = vadd.f32 %v5718_v41, %v5310_v35  ;;  %v5720_v21 = vpop.f32.mrb[23].mxu0  ;;  %vm5723_vm9 = vcmp.gt.f32.partialorder %v6741_v38, 0.0 }
 0x540   :  { %v5728_v44 = vmul.f32 0.2, %v6742_v40  ;;  %v6744_v39 = vadd.f32 %v5720_v21, %v5314_v36  ;;  %vm5724_vm10 = vcmp.gt.f32.partialorder %v6742_v40, 0.0 }
 0x541   :  { %vm5725_vm11 = vcmp.gt.f32.partialorder %v6743_v43, 0.0  ;;  %v5729_v45 = vmul.f32 0.2, %v6743_v43  ;;  %v5731_v8 = vsel %vm5723_vm9, %v6741_v38, %v5727_v42 }
 0x542   :  { %vm5726_vm12 = vcmp.gt.f32.partialorder %v6744_v39, 0.0  ;;  %v5730_v16 = vmul.f32 0.2, %v6744_v39  ;;  %v5732_v58 = vsel %vm5724_vm10, %v6742_v40, %v5728_v44 }
 0x543   :  { %v5733_v19 = vsel %vm5725_vm11, %v6743_v43, %v5729_v45 }
 0x544   :  { %v5735_v46 = vpack.c.bf16 %v5733_v19, %v5731_v8  ;;  %v5734_v49 = vsel %vm5726_vm12, %v6744_v39, %v5730_v16 }
 0x545   :  { %v5736_v50 = vpack.c.bf16 %v5734_v49, %v5732_v58 }
 0x547   :  { %5904 = vmatprep.mubr.bf16.mxu1 %v5736_v50 }
 0x548   :  { %5905 = vmatmul.mubr.bf16.vlgmr.msra.gmra.mrb[16].mxu1 %v5735_v46 }
 0x61b   :  { %v6699_v53 = vpop.f32.mrb[16].mxu1 }
 0x61c   :  { %v6700_v52 = vpop.f32.mrb[17].mxu1 }
 0x61d   :  { %v6701_v54 = vadd.f32 %v6700_v52, %v6699_v53  ;;  %v6702_v55 = vpop.f32.mrb[18].mxu1 }
 0x61e   :  { %v6703_v59 = vpop.f32.mrb[19].mxu1 }
 0x61f   :  { %v5907_v57 = vadd.f32 %v6701_v54, %v6664_v56  ;;  %v6704_v61 = vadd.f32 %v6703_v59, %v6702_v55 }
 0x621   :  { %v6681_v62 = vmul.f32 -1.442695, %v5907_v57  ;;  %v5910_v63 = vadd.f32 %v6704_v61, %v6664_v56 }
 0x623   :  { %7326 = vpow2.f32 %v6681_v62  ;;  %v6682_v0 = vmul.f32 -1.442695, %v5910_v63 }
 0x625   :  { %7328 = vpow2.f32 %v6682_v0 }
 0x62d   :  { %v7327_v26 = vpop.eup %7326 }
 0x62e   :  { %v5919_v13 = vadd.f32 1.0, %v7327_v26 }
 0x62f   :  { %v7329_v47 = vpop.eup %7328 }
 0x630   :  { %7330 = vrcp.f32 %v5919_v13  ;;  %v5920_v1 = vadd.f32 1.0, %v7329_v47 }
 0x632   :  { %7332 = vrcp.f32 %v5920_v1 }
 0x63a   :  { %v7331_v51 = vpop.eup %7330 }
 0x63b   :  { %5925 = vst [vmem:[#allocation17] sm:$0xff] %v7331_v51 }
 0x63c   :  { %v7333_v2 = vpop.eup %7332 }
 0x63d   :  { %5926 = vst [vmem:[#allocation17 + $0x8] sm:$0xff] %v7333_v2 }
 0x63e   :  { %7544 = shalt.err (!%p7541_p6)
}
 0x63f   :  { %s7545_s10 = scalar_lea.hbm %s7924_s9, 256 }
 0x640   :  { %p7546_p7 = scmp.ne.s32.totalorder %s7924_s9, %s7545_s10  ;;  %p7549_p8 = scmp.lt.u32.totalorder %s7545_s10, %s7924_s9 }
 0x642   :  { %p7551_p9 = pnand %p7549_p8, %p7546_p7 }
 0x644   :  { %7554 = shalt.err (!%p7551_p9)
}
 0x645   :  { %5938 = dma.vmem_to_hbm [thread:$0]  %s5933_s2, 256, %s7924_s9, [#allocation4], %s7574_s3, %s7574_s3, %s7575_s24  }
 0x646   :  { %7565 = dma.done.wait [#allocation4], 256  }
 0x647   :  { %7566 = vsyncadd [#allocation4], 4294967040 }
 0x648   :  { %5942 = vsyncpa [#allocation3], 1 }
 0x649   :  { %5943 = vsyncpa [#allocation6], 1 }
 0x64a   :  { %5944 = vsyncpa [#allocation9], 1 }
 0x64b   :  { %5945 = vsyncpa [#allocation12], 1 }
 0x64c   :  { %5946 = vsyncpa [#allocation15], 1 }
 0x64d   :  { %5947 = vsyncpa [#allocation4], 1 }

</bundles_post_ra>
